<compile_context>
chip_gen: v7x
topology: tpu7x:2x2x1
jax: 0.10.0
libtpu: 0.0.40
codegen_flags: <defaults>
</compile_context>

<pallas_src>
import functools

import jax
import jax.numpy as jnp
from jax import lax
from jax.experimental import pallas as pl
from jax.experimental.pallas import tpu as pltpu

# Atom feature cardinalities: list(map(len, x_map.values())) from
# torch_geometric.utils.smiles.x_map
FEAT_DIMS = (119, 4, 11, 12, 9, 5, 8, 2, 2)
NUM_FEATS = len(FEAT_DIMS)

HALF = 128                       # 128-lane half of the concatenated table
D_PAD = 2 * HALF                 # 256 rows total (MXU K dim = 2 x 128)
ROW_CHUNK = 128                  # rows of counts materialized / fed to MXU at once

assert FEAT_DIMS[0] <= HALF
assert sum(FEAT_DIMS[1:]) <= HALF

# Row offsets of each feature *within its 128-row half* (feature 0 -> low half,
# features 1..8 -> high half).  Compile-time constants.
_hi_cum = [0]
for _d in FEAT_DIMS[1:]:
    _hi_cum.append(_hi_cum[-1] + _d)
LOC_OFFSETS_PY = (0,) + tuple(_hi_cum[:-1])                       # len 9
# Global row offsets into the [256, emb_dim] table (for the reference).
GLOB_OFFSETS_PY = (0,) + tuple(HALF + o for o in _hi_cum[:-1])    # len 9


def _atom_encoder_kernel(idx_ref, offs_ref, table_ref, out_ref):
    # idx_ref:   [TN, F]        int32   raw per-feature indices
    # offs_ref:  [1, F]         int32   per-feature offsets within their half
    # table_ref: [256, E]       float32 boundary-aligned concatenated table
    # out_ref:   [TN, E]        float32
    tn = idx_ref.shape[0]
    chunk = ROW_CHUNK
    n_chunks = tn // chunk

    # Loop-invariant values, hoisted (JAX does not CSE broadcast_in_dim).
    iota = lax.broadcasted_iota(jnp.int32, (chunk, HALF), 1)        # lanes 0..127
    offs = jnp.broadcast_to(offs_ref[...], (chunk, NUM_FEATS))      # [chunk, F]
    t_lo = table_ref[0:HALF, :]                                     # feature 0 rows
    t_hi = table_ref[HALF:D_PAD, :]                                 # features 1..8

    def body(c, carry):
        r0 = pl.multiple_of(c * chunk, chunk)
        idx = idx_ref[pl.ds(r0, chunk), :] + offs                   # [chunk, F]

        # Low half: only feature 0 lives here -> one compare, one convert.
        lo = (iota == idx[:, 0:1]).astype(jnp.float32)              # [chunk, 128]

        # High half: features 1..8, disjoint ranges -> OR of one-hots == sum;
        # single bool->f32 convert at the end.
        hit = iota == idx[:, 1:2]
        for f in range(2, NUM_FEATS):                               # static unroll
            hit = jnp.logical_or(hit, iota == idx[:, f:f + 1])
        hi = hit.astype(jnp.float32)                                # [chunk, 128]

        # Embedding-bag sum == counts @ table (MXU), split over the two halves.
        out_ref[pl.ds(r0, chunk), :] = (
            jnp.dot(lo, t_lo, preferred_element_type=jnp.float32)
            + jnp.dot(hi, t_hi, preferred_element_type=jnp.float32))
        return carry

    lax.fori_loop(0, n_chunks, body, 0, unroll=min(n_chunks, 2))


def _default_tile_n(n):
    # Big tiles amortize the ~0.35-0.6 us per-grid-step overhead, but keep at
    # least 2 grid steps for moderate N so v7x's 2 TensorCores both get work
    # on the 'parallel' axis.  Cap at 2048 rows.
    if n <= 2 * ROW_CHUNK:
        return 2 * ROW_CHUNK
    t = pl.cdiv(n, 2)
    t = pl.cdiv(t, ROW_CHUNK) * ROW_CHUNK
    return int(min(2048, t))


@functools.partial(jax.jit, static_argnames=("tile_n",))
def atom_encoder(x_idx, table, loc_offsets, *, tile_n=None):
    """x_idx: [N, F] int per-feature indices; table: [256, emb_dim] f32
    boundary-aligned concat of the F embedding tables; loc_offsets: [1, F]
    int32 per-feature offsets within their 128-row half.
    Returns [N, emb_dim] float32 (== sum_f Emb_f[x[:, f]])."""
    n, f = x_idx.shape
    d_pad, emb_dim = table.shape
    assert f == NUM_FEATS
    assert d_pad == D_PAD
    if tile_n is None:
        tile_n = _default_tile_n(n)
    assert tile_n % ROW_CHUNK == 0 and tile_n >= ROW_CHUNK

    grid_n = pl.cdiv(n, tile_n)
    n_pad = grid_n * tile_n

    idx = x_idx.astype(jnp.int32)
    if n_pad != n:
        # Only the cheap integer index rows are padded; the output keeps its
        # true (N, emb_dim) shape and the out-of-range rows of the last block
        # are masked on writeback -> no padded-output buffer, no slice copy.
        idx = jnp.pad(idx, ((0, n_pad - n), (0, 0)))

    cost = pl.CostEstimate(
        flops=2 * n_pad * D_PAD * emb_dim,
        transcendentals=0,
        bytes_accessed=n_pad * f * 4 + n * emb_dim * 4 + D_PAD * emb_dim * 4,
    )

    return pl.pallas_call(
        _atom_encoder_kernel,
        out_shape=jax.ShapeDtypeStruct((n, emb_dim), jnp.float32),
        grid_spec=pltpu.PrefetchScalarGridSpec(
            num_scalar_prefetch=0,
            grid=(grid_n,),
            in_specs=[
                pl.BlockSpec((tile_n, f), lambda i: (i, 0)),        # node index tile
                pl.BlockSpec((1, f), lambda i: (0, 0)),             # offsets (resident)
                pl.BlockSpec((D_PAD, emb_dim), lambda i: (0, 0)),   # full table (resident)
            ],
            out_specs=pl.BlockSpec((tile_n, emb_dim), lambda i: (i, 0)),
        ),
        compiler_params=pltpu.CompilerParams(
            dimension_semantics=("parallel",)),
        cost_estimate=cost,
    )(idx, loc_offsets, table)


def make_params(key, emb_dim):
    """Xavier-uniform init of the F embedding tables, laid out so that no
    feature straddles the 128-lane boundary of the concatenated table."""
    tables = []
    for i, dim in enumerate(FEAT_DIMS):
        k = jax.random.fold_in(key, i)
        bound = (6.0 / (dim + emb_dim)) ** 0.5
        tables.append(jax.random.uniform(k, (dim, emb_dim), jnp.float32, -bound, bound))
    lo = jnp.pad(tables[0], ((0, HALF - FEAT_DIMS[0]), (0, 0)))        # [128, E]
    hi = jnp.concatenate(tables[1:], axis=0)
    hi = jnp.pad(hi, ((0, HALF - hi.shape[0]), (0, 0)))                # [128, E]
    table = jnp.concatenate([lo, hi], axis=0)                          # [256, E]
    loc_offs = jnp.array([LOC_OFFSETS_PY], dtype=jnp.int32)            # [1, F]
    glob_offs = jnp.array(GLOB_OFFSETS_PY, dtype=jnp.int32)            # [F]
    return table, loc_offs, glob_offs


def reference(x_idx, table, glob_offs):
    gidx = x_idx.astype(jnp.int32) + glob_offs[None, :]
    return jnp.take(table, gidx, axis=0).sum(axis=1)


if __name__ == "__main__":
    key = jax.random.PRNGKey(0)
    emb_dim = 32
    n_nodes = 500   # not a tile multiple -> exercises masked last block; grid = 2

    table, loc_offs, glob_offs = make_params(key, emb_dim)

    # Deterministic valid per-feature indices (node features).
    idx_cols = []
    for i, dim in enumerate(FEAT_DIMS):
        k = jax.random.fold_in(key, 1000 + i)
        idx_cols.append(jax.random.randint(k, (n_nodes, 1), 0, dim, jnp.int32))
    x_idx = jnp.concatenate(idx_cols, axis=1)                          # [N, F] int32

    out = atom_encoder(x_idx, table, loc_offs)
    out = jax.block_until_ready(out)

    ref = reference(x_idx, table, glob_offs)
    assert out.shape == (n_nodes, emb_dim)
    assert jnp.allclose(out, ref, atol=1e-5, rtol=1e-5), "mismatch vs reference"

    print("KERNEL_OK")
</pallas_src>

<mosaic_0001>
module attributes {stable_mosaic.version = 11 : i64} {
  func.func @_atom_encoder_kernel(%arg0: i32, %arg1: memref<256x9xi32, #tpu.memory_space<vmem>>, %arg2: memref<1x9xi32, #tpu.memory_space<vmem>>, %arg3: memref<256x32xf32, #tpu.memory_space<vmem>>, %arg4: memref<256x32xf32, #tpu.memory_space<vmem>>) attributes {dimension_semantics = [#tpu.dimension_semantics<parallel>], iteration_bounds = array<i64: 2>, scalar_prefetch = 0 : i64, scratch_operands = 0 : i64, tpu.core_type = #tpu.core_type<tc>, window_params = [{transform_indices = @transform_0, window_bounds = array<i64: 256, 9>}, {pipeline_mode = #tpu.pipeline_mode<synchronous>, transform_indices = @transform_1, window_bounds = array<i64: 1, 9>}, {pipeline_mode = #tpu.pipeline_mode<synchronous>, transform_indices = @transform_2, window_bounds = array<i64: 256, 32>}, {transform_indices = @transform_3, window_bounds = array<i64: 256, 32>}]} {
    %0 = tpu.iota {dimensions = array<i32: 1>} : vector<128x128xi32>
    %c0 = arith.constant 0 : index
    %c0_0 = arith.constant 0 : index
    %1 = vector.load %arg2[%c0, %c0_0] : memref<1x9xi32, #tpu.memory_space<vmem>>, vector<1x9xi32>
    %2 = vector.shape_cast %1 : vector<1x9xi32> to vector<1x9xi32>
    %3 = vector.broadcast %2 : vector<1x9xi32> to vector<128x9xi32>
    %c0_1 = arith.constant 0 : index
    %c0_2 = arith.constant 0 : index
    %4 = vector.load %arg3[%c0_1, %c0_2] : memref<256x32xf32, #tpu.memory_space<vmem>>, vector<128x32xf32>
    %c128 = arith.constant 128 : index
    %c0_3 = arith.constant 0 : index
    %5 = vector.load %arg3[%c128, %c0_3] : memref<256x32xf32, #tpu.memory_space<vmem>>, vector<128x32xf32>
    %c0_i32 = arith.constant 0 : i32
    %c128_i32 = arith.constant 128 : i32
    %6 = arith.muli %c0_i32, %c128_i32 : i32
    %7 = tpu.assume_multiple %6, 128 : i32
    %8 = arith.index_cast %7 : i32 to index
    %c0_4 = arith.constant 0 : index
    %9 = vector.load %arg1[%8, %c0_4] : memref<256x9xi32, #tpu.memory_space<vmem>>, vector<128x9xi32>
    %10 = arith.addi %9, %3 : vector<128x9xi32>
    %11 = vector.extract_strided_slice %10 {offsets = [0, 0], sizes = [128, 1], strides = [1, 1]} : vector<128x9xi32> to vector<128x1xi32>
    %12 = vector.broadcast %11 : vector<128x1xi32> to vector<128x128xi32>
    %13 = arith.cmpi eq, %0, %12 : vector<128x128xi32>
    %14 = arith.extui %13 : vector<128x128xi1> to vector<128x128xi32>
    %15 = arith.sitofp %14 : vector<128x128xi32> to vector<128x128xf32>
    %16 = vector.extract_strided_slice %10 {offsets = [0, 1], sizes = [128, 1], strides = [1, 1]} : vector<128x9xi32> to vector<128x1xi32>
    %17 = vector.broadcast %16 : vector<128x1xi32> to vector<128x128xi32>
    %18 = arith.cmpi eq, %0, %17 : vector<128x128xi32>
    %19 = vector.extract_strided_slice %10 {offsets = [0, 2], sizes = [128, 1], strides = [1, 1]} : vector<128x9xi32> to vector<128x1xi32>
    %20 = vector.broadcast %19 : vector<128x1xi32> to vector<128x128xi32>
    %21 = arith.cmpi eq, %0, %20 : vector<128x128xi32>
    %22 = arith.ori %18, %21 : vector<128x128xi1>
    %23 = vector.extract_strided_slice %10 {offsets = [0, 3], sizes = [128, 1], strides = [1, 1]} : vector<128x9xi32> to vector<128x1xi32>
    %24 = vector.broadcast %23 : vector<128x1xi32> to vector<128x128xi32>
    %25 = arith.cmpi eq, %0, %24 : vector<128x128xi32>
    %26 = arith.ori %22, %25 : vector<128x128xi1>
    %27 = vector.extract_strided_slice %10 {offsets = [0, 4], sizes = [128, 1], strides = [1, 1]} : vector<128x9xi32> to vector<128x1xi32>
    %28 = vector.broadcast %27 : vector<128x1xi32> to vector<128x128xi32>
    %29 = arith.cmpi eq, %0, %28 : vector<128x128xi32>
    %30 = arith.ori %26, %29 : vector<128x128xi1>
    %31 = vector.extract_strided_slice %10 {offsets = [0, 5], sizes = [128, 1], strides = [1, 1]} : vector<128x9xi32> to vector<128x1xi32>
    %32 = vector.broadcast %31 : vector<128x1xi32> to vector<128x128xi32>
    %33 = arith.cmpi eq, %0, %32 : vector<128x128xi32>
    %34 = arith.ori %30, %33 : vector<128x128xi1>
    %35 = vector.extract_strided_slice %10 {offsets = [0, 6], sizes = [128, 1], strides = [1, 1]} : vector<128x9xi32> to vector<128x1xi32>
    %36 = vector.broadcast %35 : vector<128x1xi32> to vector<128x128xi32>
    %37 = arith.cmpi eq, %0, %36 : vector<128x128xi32>
    %38 = arith.ori %34, %37 : vector<128x128xi1>
    %39 = vector.extract_strided_slice %10 {offsets = [0, 7], sizes = [128, 1], strides = [1, 1]} : vector<128x9xi32> to vector<128x1xi32>
    %40 = vector.broadcast %39 : vector<128x1xi32> to vector<128x128xi32>
    %41 = arith.cmpi eq, %0, %40 : vector<128x128xi32>
    %42 = arith.ori %38, %41 : vector<128x128xi1>
    %43 = vector.extract_strided_slice %10 {offsets = [0, 8], sizes = [128, 1], strides = [1, 1]} : vector<128x9xi32> to vector<128x1xi32>
    %44 = vector.broadcast %43 : vector<128x1xi32> to vector<128x128xi32>
    %45 = arith.cmpi eq, %0, %44 : vector<128x128xi32>
    %46 = arith.ori %42, %45 : vector<128x128xi1>
    %47 = arith.extui %46 : vector<128x128xi1> to vector<128x128xi32>
    %48 = arith.sitofp %47 : vector<128x128xi32> to vector<128x128xf32>
    %cst = arith.constant dense<0.000000e+00> : vector<128x32xf32>
    %49 = tpu.matmul %15, %4, %cst {dimension_numbers = #tpu.dot_dimension_numbers<[1], [0], [0], [1], [0, 0, 1, 1], [], []>} : vector<128x128xf32>, vector<128x32xf32>, vector<128x32xf32> -> vector<128x32xf32>
    %cst_5 = arith.constant dense<0.000000e+00> : vector<128x32xf32>
    %50 = tpu.matmul %48, %5, %cst_5 {dimension_numbers = #tpu.dot_dimension_numbers<[1], [0], [0], [1], [0, 0, 1, 1], [], []>} : vector<128x128xf32>, vector<128x32xf32>, vector<128x32xf32> -> vector<128x32xf32>
    %51 = arith.addf %49, %50 : vector<128x32xf32>
    %52 = arith.index_cast %7 : i32 to index
    %c0_6 = arith.constant 0 : index
    %53 = vector.load %arg4[%52, %c0_6] : memref<256x32xf32, #tpu.memory_space<vmem>>, vector<128x32xf32>
    tpu.vector_store %arg4[%52, %c0_6], %51 {strides = array<i32>} : memref<256x32xf32, #tpu.memory_space<vmem>>, vector<128x32xf32>,
    %c1_i32 = arith.constant 1 : i32
    %c128_i32_7 = arith.constant 128 : i32
    %54 = arith.muli %c1_i32, %c128_i32_7 : i32
    %55 = tpu.assume_multiple %54, 128 : i32
    %56 = arith.index_cast %55 : i32 to index
    %c0_8 = arith.constant 0 : index
    %57 = vector.load %arg1[%56, %c0_8] : memref<256x9xi32, #tpu.memory_space<vmem>>, vector<128x9xi32>
    %58 = arith.addi %57, %3 : vector<128x9xi32>
    %59 = vector.extract_strided_slice %58 {offsets = [0, 0], sizes = [128, 1], strides = [1, 1]} : vector<128x9xi32> to vector<128x1xi32>
    %60 = vector.broadcast %59 : vector<128x1xi32> to vector<128x128xi32>
    %61 = arith.cmpi eq, %0, %60 : vector<128x128xi32>
    %62 = arith.extui %61 : vector<128x128xi1> to vector<128x128xi32>
    %63 = arith.sitofp %62 : vector<128x128xi32> to vector<128x128xf32>
    %64 = vector.extract_strided_slice %58 {offsets = [0, 1], sizes = [128, 1], strides = [1, 1]} : vector<128x9xi32> to vector<128x1xi32>
    %65 = vector.broadcast %64 : vector<128x1xi32> to vector<128x128xi32>
    %66 = arith.cmpi eq, %0, %65 : vector<128x128xi32>
    %67 = vector.extract_strided_slice %58 {offsets = [0, 2], sizes = [128, 1], strides = [1, 1]} : vector<128x9xi32> to vector<128x1xi32>
    %68 = vector.broadcast %67 : vector<128x1xi32> to vector<128x128xi32>
    %69 = arith.cmpi eq, %0, %68 : vector<128x128xi32>
    %70 = arith.ori %66, %69 : vector<128x128xi1>
    %71 = vector.extract_strided_slice %58 {offsets = [0, 3], sizes = [128, 1], strides = [1, 1]} : vector<128x9xi32> to vector<128x1xi32>
    %72 = vector.broadcast %71 : vector<128x1xi32> to vector<128x128xi32>
    %73 = arith.cmpi eq, %0, %72 : vector<128x128xi32>
    %74 = arith.ori %70, %73 : vector<128x128xi1>
    %75 = vector.extract_strided_slice %58 {offsets = [0, 4], sizes = [128, 1], strides = [1, 1]} : vector<128x9xi32> to vector<128x1xi32>
    %76 = vector.broadcast %75 : vector<128x1xi32> to vector<128x128xi32>
    %77 = arith.cmpi eq, %0, %76 : vector<128x128xi32>
    %78 = arith.ori %74, %77 : vector<128x128xi1>
    %79 = vector.extract_strided_slice %58 {offsets = [0, 5], sizes = [128, 1], strides = [1, 1]} : vector<128x9xi32> to vector<128x1xi32>
    %80 = vector.broadcast %79 : vector<128x1xi32> to vector<128x128xi32>
    %81 = arith.cmpi eq, %0, %80 : vector<128x128xi32>
    %82 = arith.ori %78, %81 : vector<128x128xi1>
    %83 = vector.extract_strided_slice %58 {offsets = [0, 6], sizes = [128, 1], strides = [1, 1]} : vector<128x9xi32> to vector<128x1xi32>
    %84 = vector.broadcast %83 : vector<128x1xi32> to vector<128x128xi32>
    %85 = arith.cmpi eq, %0, %84 : vector<128x128xi32>
    %86 = arith.ori %82, %85 : vector<128x128xi1>
    %87 = vector.extract_strided_slice %58 {offsets = [0, 7], sizes = [128, 1], strides = [1, 1]} : vector<128x9xi32> to vector<128x1xi32>
    %88 = vector.broadcast %87 : vector<128x1xi32> to vector<128x128xi32>
    %89 = arith.cmpi eq, %0, %88 : vector<128x128xi32>
    %90 = arith.ori %86, %89 : vector<128x128xi1>
    %91 = vector.extract_strided_slice %58 {offsets = [0, 8], sizes = [128, 1], strides = [1, 1]} : vector<128x9xi32> to vector<128x1xi32>
    %92 = vector.broadcast %91 : vector<128x1xi32> to vector<128x128xi32>
    %93 = arith.cmpi eq, %0, %92 : vector<128x128xi32>
    %94 = arith.ori %90, %93 : vector<128x128xi1>
    %95 = arith.extui %94 : vector<128x128xi1> to vector<128x128xi32>
    %96 = arith.sitofp %95 : vector<128x128xi32> to vector<128x128xf32>
    %cst_9 = arith.constant dense<0.000000e+00> : vector<128x32xf32>
    %97 = tpu.matmul %63, %4, %cst_9 {dimension_numbers = #tpu.dot_dimension_numbers<[1], [0], [0], [1], [0, 0, 1, 1], [], []>} : vector<128x128xf32>, vector<128x32xf32>, vector<128x32xf32> -> vector<128x32xf32>
    %cst_10 = arith.constant dense<0.000000e+00> : vector<128x32xf32>
    %98 = tpu.matmul %96, %5, %cst_10 {dimension_numbers = #tpu.dot_dimension_numbers<[1], [0], [0], [1], [0, 0, 1, 1], [], []>} : vector<128x128xf32>, vector<128x32xf32>, vector<128x32xf32> -> vector<128x32xf32>
    %99 = arith.addf %97, %98 : vector<128x32xf32>
    %100 = arith.index_cast %55 : i32 to index
    %c0_11 = arith.constant 0 : index
    %101 = vector.load %arg4[%100, %c0_11] : memref<256x32xf32, #tpu.memory_space<vmem>>, vector<128x32xf32>
    tpu.vector_store %arg4[%100, %c0_11], %99 {strides = array<i32>} : memref<256x32xf32, #tpu.memory_space<vmem>>, vector<128x32xf32>,
    %c2_i32 = arith.constant 2 : i32
    return
  }
  func.func @transform_0(%arg0: i32) -> (i32, i32) {
    %c0_i32 = arith.constant 0 : i32
    %c0_i32_0 = arith.constant 0 : i32
    return %arg0, %c0_i32 : i32, i32
  }
  func.func @transform_1(%arg0: i32) -> (i32, i32) {
    %c0_i32 = arith.constant 0 : i32
    %c0_i32_0 = arith.constant 0 : i32
    %c0_i32_1 = arith.constant 0 : i32
    return %c0_i32, %c0_i32_0 : i32, i32
  }
  func.func @transform_2(%arg0: i32) -> (i32, i32) {
    %c0_i32 = arith.constant 0 : i32
    %c0_i32_0 = arith.constant 0 : i32
    %c0_i32_1 = arith.constant 0 : i32
    return %c0_i32, %c0_i32_0 : i32, i32
  }
  func.func @transform_3(%arg0: i32) -> (i32, i32) {
    %c0_i32 = arith.constant 0 : i32
    %c0_i32_0 = arith.constant 0 : i32
    return %arg0, %c0_i32 : i32, i32
  }
}

</mosaic_0001>

<bundles_post_ra>
// kernel: atom_encoder.1
= control target key start
LH: loop header
LB: loop body
LE: loop exit
PB: predicated region body
PF: predicated region fallthrough
CT: control target
= control target key end

     0   :  { %s3688_s12 = smov 0   ;;  %s3690_s13 = smov 0   ;;  %s6173_s0 = inlined_call_operand.vmem [shape: s32[512,9], index: 0, kind: input, shape index: {}]   ;;  %s6174_s1 = inlined_call_operand.vmem [shape: s32[1,9], index: 1, kind: input, shape index: {}]   ;;  %s6175_s2 = inlined_call_operand.vmem [shape: f32[256,32], index: 2, kind: input, shape index: {}]   ;;  %s6176_s3 = inlined_call_operand.vmem [shape: f32[500,32], index: 3, kind: output, shape index: {}]  }
   0x1   :  { %s3692_s14 = smov 0  }
   0x2 LB: > { %s3701_s15 = sadd.s32 4294967295, %s3623_s14   ;;  %s3703_s16 = sadd.s32 1, %s3623_s14   ;;  %s3623_s14 = sphi %s3692_s14, %s6759_s14   ;;  %s3619_s13 = sphi %s3690_s13, %s6758_s13   ;;  %s3615_s12 = sphi %s3688_s12, %s6757_s12  }
   0x3   : > { %s85_s17 = ssub.s32 %s3623_s14, %s3703_s16  ;;  %s88_s18 = sadd.s32 1, %s3619_s13 }
   0x4   : > { %p86_p0 = scmp.eq.s32.totalorder %s85_s17, 0  ;;  %p98_p1 = scmp.ne.s32.totalorder %s3619_s13, %s3615_s12 }
   0x5   : > { %p99_p2 = scmp.eq.s32.totalorder %s3701_s15, 1  ;;  %p2736_p3 = scmp.ge.s32.totalorder %s3623_s14, 1 }
   0x6   : > { %s3711_s19 = scalar_select %p86_p0, %s3619_s13, %s88_s18  }
   0x7   : > { %p3713_p4 = por %p99_p2, %p98_p1  ;;  %p138_p5 = scmp.lt.s32.totalorder %s3623_s14, 3 }
   0x9   : > { %p139_p6 = pnand %p2736_p3, %p138_p5 }
   0xb   : > { %142 = sbr.rel (%p139_p6) target bundleno = 1185 (0x4a1), region = 32 }
  0x12   : > { %s3718_s21 = sshll.u32 %s3701_s15, 5  ;;  %v6183_v0 = vmov 0   ;;  %v3727_v1 = vld [vmem:[%s6174_s1] ss:$0 sm:$0xff]  ;;  %v6180_v37 = vmov 1   ;;  %v6179_v51 = vmov 2  }
  0x13   : > { %3501 = vset.pattern.permute.xlu1 %v6183_v0  ;;  %3500 = vset.pattern.permute.xlu0 %v6183_v0  ;;  %p162_p7 = scmp.lt.s32.totalorder %s3718_s21, 63  ;;  %v6184_v58 = vmov 3   ;;  %v6186_v0 = vmov 8   ;;  %s158_s6 = sand.u32 1, %s3615_s12  }
  0x14   : > { %s2737_s7 = sshll.u32 %s158_s6, 8  ;;  %s2402_s8 = ssub.s32 (%p3713_p4), 63, %s3718_s21 }
  0x15   : > { %s163_s22 = scalar_select %p162_p7, %s3718_s21, 63 }
  0x16   : > { %s5919_s12 = scalar_lea.vmem [#allocation2], %s2737_s7   ;;  %s2886_s9 = sshll.u32 (%p3713_p4), %s3701_s15, 8 }
  0x17   : > { %s2739_s23 = sshll.u32 %s163_s22, 3  ;;  %p2403_p8 = scmp.lt.s32.totalorder (%p3713_p4), %s2402_s8, 32 }
  0x18   : > { %s3732_s28 = scalar_lea.vmem %s6173_s0, %s2739_s23  ;;  %s6041_s14 = scalar_lea.vmem (%p3713_p4), %s6176_s3, %s2886_s9  }
  0x19   : > { %v213_v2 = vld [vmem:[%s3732_s28 + $0x10] sm:$0xff]  ;;  %v211_v3 = vld [vmem:[%s3732_s28] sm:$0xff]  ;;  %v214_v4 = vld [vmem:[%s3732_s28 + $0x18] sm:$0xff] }
  0x1a   : > { %v3738_v5 = vadd.s32 %v3727_v1, %v213_v2  ;;  %v3741_v6 = vadd.s32 %v3727_v1, %v211_v3  ;;  %v212_v7 = vld [vmem:[%s3732_s28 + $0x8] sm:$0xff]  ;;  %v3747_v8 = vadd.s32 %v3727_v1, %v214_v4  ;;  %v215_v11 = vld [vmem:[%s3732_s28 + $0x20] sm:$0xff]  ;;  %v218_v14 = vld [vmem:[%s3732_s28 + $0x38] sm:$0xff] }
  0x1b   : > { %v3750_v9 = vadd.s32 %v3727_v1, %v212_v7  ;;  %v216_v10 = vld [vmem:[%s3732_s28 + $0x28] sm:$0xff]  ;;  %v3760_v13 = vadd.s32 %v3727_v1, %v215_v11  ;;  %v217_v15 = vld [vmem:[%s3732_s28 + $0x30] sm:$0xff]  ;;  %v3767_v16 = vadd.s32 %v3727_v1, %v218_v14  ;;  %v219_v19 = vld [vmem:[%s3732_s28 + $0x40] sm:$0xff] }
  0x1c   : > { %250 = vperm.xlu1 %3501, %v3738_v5   ;;  %244 = vperm.xlu0 %3500, %v3741_v6   ;;  %v3757_v12 = vadd.s32 %v3727_v1, %v216_v10  ;;  %v3770_v17 = vadd.s32 %v3727_v1, %v217_v15  ;;  %v220_v18 = vld [vmem:[%s3732_s28 + $0x48] sm:$0xff]  ;;  %v3780_v21 = vadd.s32 %v3727_v1, %v219_v19  ;;  %v222_v22 = vld [vmem:[%s3732_s28 + $0x58] sm:$0xff]  ;;  %v221_v23 = vld [vmem:[%s3732_s28 + $0x50] sm:$0xff] }
  0x1d   : > { %v3777_v20 = vadd.s32 %v3727_v1, %v220_v18  ;;  %v3787_v24 = vadd.s32 %v3727_v1, %v222_v22  ;;  %v3790_v25 = vadd.s32 %v3727_v1, %v221_v23  ;;  %v224_v26 = vld [vmem:[%s3732_s28 + $0x68] sm:$0xff]  ;;  %v223_v27 = vld [vmem:[%s3732_s28 + $0x60] sm:$0xff]  ;;  %v226_v30 = vld [vmem:[%s3732_s28 + $0x78] sm:$0xff]  ;;  %v6177_v18 = vmov 4  }
  0x1e   : > { %v3797_v28 = vadd.s32 %v3727_v1, %v224_v26  ;;  %v3800_v29 = vadd.s32 %v3727_v1, %v223_v27  ;;  %v225_v31 = vld [vmem:[%s3732_s28 + $0x70] sm:$0xff]  ;;  %v3807_v32 = vadd.s32 %v3727_v1, %v226_v30  ;;  %v2789_v34 = vld [vmem:[%s3732_s28 + $0x80] sm:$0xff]  ;;  %v2792_v36 = vld [vmem:[%s3732_s28 + $0x98] sm:$0xff] }
  0x1f   : > { %v3810_v33 = vadd.s32 %v3727_v1, %v225_v31  ;;  %v3816_v35 = vadd.s32 %v2789_v34, %v3727_v1  ;;  %v3822_v38 = vadd.s32 %v2792_v36, %v3727_v1  ;;  %v2794_v39 = vld [vmem:[%s3732_s28 + $0xa8] sm:$0xff]  ;;  %v2796_v41 = vld [vmem:[%s3732_s28 + $0xb8] sm:$0xff]  ;;  %v2793_v54 = vld [vmem:[%s3732_s28 + $0xa0] sm:$0xff] }
  0x20   : > { %253 = vperm.xlu1 %3501, %v3747_v8   ;;  %247 = vperm.xlu0 %3500, %v3750_v9   ;;  %v3828_v40 = vadd.s32 %v2794_v39, %v3727_v1  ;;  %v3834_v42 = vadd.s32 %v2796_v41, %v3727_v1  ;;  %v2798_v43 = vld [vmem:[%s3732_s28 + $0xc8] sm:$0xff]  ;;  %v2800_v45 = vld [vmem:[%s3732_s28 + $0xd8] sm:$0xff]  ;;  %v3888_v55 = vadd.s32 %v2793_v54, %v3727_v1  ;;  %v2795_v56 = vld [vmem:[%s3732_s28 + $0xb0] sm:$0xff] }
  0x21   : > { %v3840_v44 = vadd.s32 %v2798_v43, %v3727_v1  ;;  %v3846_v46 = vadd.s32 %v2800_v45, %v3727_v1  ;;  %v2802_v47 = vld [vmem:[%s3732_s28 + $0xe8] sm:$0xff]  ;;  %v2804_v49 = vld [vmem:[%s3732_s28 + $0xf8] sm:$0xff]  ;;  %v3894_v57 = vadd.s32 %v2795_v56, %v3727_v1  ;;  %v2797_v59 = vld [vmem:[%s3732_s28 + $0xc0] sm:$0xff] }
  0x22   : > { %v3852_v48 = vadd.s32 %v2802_v47, %v3727_v1  ;;  %v3858_v50 = vadd.s32 %v2804_v49, %v3727_v1  ;;  %v2790_v52 = vld [vmem:[%s3732_s28 + $0x88] sm:$0xff]  ;;  %v3901_v60 = vadd.s32 %v2797_v59, %v3727_v1  ;;  %v2799_v61 = vld [vmem:[%s3732_s28 + $0xd0] sm:$0xff]  ;;  %v2801_v63 = vld [vmem:[%s3732_s28 + $0xe0] sm:$0xff] }
  0x23   : > { %6211 = vst [vmem:[#allocation3_spill] sm:$0xff] %v3840_v44  ;;  %6212 = vst [vmem:[#allocation4_spill] sm:$0xff] %v3846_v46  ;;  %v3882_v53 = vadd.s32 %v2790_v52, %v3727_v1  ;;  %v3907_v62 = vadd.s32 %v2799_v61, %v3727_v1  ;;  %v3913_v2 = vadd.s32 %v2801_v63, %v3727_v1  ;;  %v2803_v3 = vld [vmem:[%s3732_s28 + $0xf0] sm:$0xff]  ;;  %v6181_v61 = vmov 5  }
  0x24   : > { %259 = vperm.xlu1 %3501, %v3757_v12   ;;  %256 = vperm.xlu0 %3500, %v3760_v13   ;;  %6213 = vst [vmem:[#allocation5_spill] sm:$0xff] %v3901_v60  ;;  %v3919_v4 = vadd.s32 %v2803_v3, %v3727_v1 }
  0x25   : > { %6214 = vst [vmem:[#allocation6_spill] sm:$0xff] %v3913_v2 }
  0x28   : > { %265 = vperm.xlu1 %3501, %v3767_v16   ;;  %262 = vperm.xlu0 %3500, %v3770_v17  }
  0x2c   : > { %271 = vperm.xlu1 %3501, %v3777_v20   ;;  %268 = vperm.xlu0 %3500, %v3780_v21  }
  0x30   : > { %277 = vperm.xlu1 %3501, %v3787_v24   ;;  %274 = vperm.xlu0 %3500, %v3790_v25  }
  0x34   : > { %283 = vperm.xlu1 %3501, %v3797_v28   ;;  %280 = vperm.xlu0 %3500, %v3800_v29  }
  0x38   : > { %289 = vperm.xlu1 %3501, %v3807_v32   ;;  %286 = vperm.xlu0 %3500, %v3810_v33  }
  0x3c   : > { %3502 = vset.pattern.permute.xlu1 %v6180_v37  ;;  %1336 = vperm.xlu0 %3500, %v3816_v35  }
  0x3d   : > { %343 = vperm.xlu1 %3502, %v3750_v9  }
  0x40   : > { %1345 = vperm.xlu0 %3500, %v3822_v38  }
  0x41   : > { %346 = vperm.xlu1 %3502, %v3738_v5  }
  0x44   : > { %1351 = vperm.xlu0 %3500, %v3828_v40  }
  0x45   : > { %352 = vperm.xlu1 %3502, %v3760_v13  }
  0x48   : > { %1357 = vperm.xlu0 %3500, %v3834_v42  }
  0x49   : > { %358 = vperm.xlu1 %3502, %v3770_v17  }
  0x4c   : > { %1363 = vperm.xlu0 %3500, %v3840_v44  }
  0x4d   : > { %364 = vperm.xlu1 %3502, %v3780_v21  }
  0x50   : > { %1369 = vperm.xlu0 %3500, %v3846_v46  }
  0x51   : > { %370 = vperm.xlu1 %3502, %v3790_v25  }
  0x54   : > { %1375 = vperm.xlu0 %3500, %v3852_v48  }
  0x55   : > { %376 = vperm.xlu1 %3502, %v3800_v29  }
  0x58   : > { %1381 = vperm.xlu0 %3500, %v3858_v50  }
  0x59   : > { %382 = vperm.xlu1 %3502, %v3810_v33  }
  0x5c   : > { %3511 = vset.pattern.permute.xlu0 %v6180_v37 }
  0x5d   : > { %3503 = vset.pattern.permute.xlu1 %v6179_v51  ;;  %340 = vperm.xlu0 %3511, %v3741_v6  }
  0x5e   : > { %404 = vperm.xlu1 %3503, %v3741_v6  }
  0x61   : > { %349 = vperm.xlu0 %3511, %v3747_v8  }
  0x62   : > { %410 = vperm.xlu1 %3503, %v3738_v5  }
  0x65   : > { %355 = vperm.xlu0 %3511, %v3757_v12  }
  0x66   : > { %413 = vperm.xlu1 %3503, %v3747_v8  }
  0x69   : > { %361 = vperm.xlu0 %3511, %v3767_v16  }
  0x6a   : > { %419 = vperm.xlu1 %3503, %v3757_v12  }
  0x6d   : > { %367 = vperm.xlu0 %3511, %v3777_v20  }
  0x6e   : > { %425 = vperm.xlu1 %3503, %v3767_v16  }
  0x71   : > { %373 = vperm.xlu0 %3511, %v3787_v24  }
  0x72   : > { %431 = vperm.xlu1 %3503, %v3777_v20  }
  0x75   : > { %379 = vperm.xlu0 %3511, %v3797_v28  }
  0x76   : > { %437 = vperm.xlu1 %3503, %v3787_v24  }
  0x79   : > { %385 = vperm.xlu0 %3511, %v3807_v32  }
  0x7a   : > { %443 = vperm.xlu1 %3503, %v3797_v28  }
  0x7d   : > { %1435 = vperm.xlu0 %3511, %v3882_v53  }
  0x7e   : > { %449 = vperm.xlu1 %3503, %v3807_v32  }
  0x81   : > { %1444 = vperm.xlu0 %3511, %v3888_v55  }
  0x82   : > { %3504 = vset.pattern.permute.xlu1 %v6184_v58 }
  0x83   : > { %487 = vperm.xlu1 %3504, %v3750_v9  }
  0x85   : > { %1450 = vperm.xlu0 %3511, %v3894_v57  }
  0x87   : > { %490 = vperm.xlu1 %3504, %v3738_v5  }
  0x89   : > { %1456 = vperm.xlu0 %3511, %v3901_v60  }
  0x8b   : > { %496 = vperm.xlu1 %3504, %v3760_v13  }
  0x8d   : > { %1462 = vperm.xlu0 %3511, %v3907_v62  }
  0x8f   : > { %502 = vperm.xlu1 %3504, %v3770_v17  }
  0x91   : > { %1468 = vperm.xlu0 %3511, %v3913_v2  }
  0x93   : > { %508 = vperm.xlu1 %3504, %v3780_v21  }
  0x95   : > { %1474 = vperm.xlu0 %3511, %v3919_v4  }
  0x97   : > { %514 = vperm.xlu1 %3504, %v3790_v25  }
  0x99   : > { %3513 = vset.pattern.permute.xlu0 %v6179_v51 }
  0x9a   : > { %407 = vperm.xlu0 %3513, %v3750_v9  }
  0x9b   : > { %v3926_v7 = vpop.permute.xlu1 %250  ;;  %520 = vperm.xlu1 %3504, %v3800_v29   ;;  %v3929_v10 = vpop.permute.xlu0 %244 }
  0x9c   : > { %6215 = vst [vmem:[#allocation7_spill] sm:$0xff] %v3926_v7  ;;  %6216 = vst [vmem:[#allocation8_spill] sm:$0xff] %v3929_v10 }
  0x9e   : > { %416 = vperm.xlu0 %3513, %v3760_v13  }
  0x9f   : > { %v3932_v11 = vpop.permute.xlu1 %253  ;;  %526 = vperm.xlu1 %3504, %v3810_v33   ;;  %v3935_v14 = vpop.permute.xlu0 %247 }
  0xa0   : > { %6217 = vst [vmem:[#allocation9_spill] sm:$0xff] %v3932_v11  ;;  %6218 = vst [vmem:[#allocation10_spill] sm:$0xff] %v3935_v14  ;;  %v6250_v11 = vmov 3  }
  0xa2   : > { %422 = vperm.xlu0 %3513, %v3770_v17  }
  0xa3   : > { %v3938_v15 = vpop.permute.xlu1 %259  ;;  %3505 = vset.pattern.permute.xlu1 %v6177_v18  ;;  %v3941_v19 = vpop.permute.xlu0 %256 }
  0xa4   : > { %6219 = vst [vmem:[#allocation11_spill] sm:$0xff] %v3938_v15  ;;  %6220 = vst [vmem:[#allocation12_spill] sm:$0xff] %v3941_v19  ;;  %564 = vperm.xlu1 %3505, %v3741_v6  }
  0xa6   : > { %428 = vperm.xlu0 %3513, %v3780_v21  }
  0xa7   : > { %v3945_v22 = vpop.permute.xlu1 %265  ;;  %v3947_v23 = vpop.permute.xlu0 %262 }
  0xa8   : > { %6221 = vst [vmem:[#allocation13_spill] sm:$0xff] %v3945_v22  ;;  %6222 = vst [vmem:[#allocation14_spill] sm:$0xff] %v3947_v23  ;;  %570 = vperm.xlu1 %3505, %v3738_v5  }
  0xaa   : > { %434 = vperm.xlu0 %3513, %v3790_v25  }
  0xab   : > { %v3951_v26 = vpop.permute.xlu1 %271  ;;  %v3953_v27 = vpop.permute.xlu0 %268 }
  0xac   : > { %6223 = vst [vmem:[#allocation15_spill] sm:$0xff] %v3951_v26  ;;  %6224 = vst [vmem:[#allocation16_spill] sm:$0xff] %v3953_v27  ;;  %573 = vperm.xlu1 %3505, %v3747_v8  }
  0xae   : > { %440 = vperm.xlu0 %3513, %v3800_v29  }
  0xaf   : > { %v3957_v30 = vpop.permute.xlu1 %277  ;;  %v3959_v31 = vpop.permute.xlu0 %274 }
  0xb0   : > { %6225 = vst [vmem:[#allocation17_spill] sm:$0xff] %v3957_v30  ;;  %6226 = vst [vmem:[#allocation18_spill] sm:$0xff] %v3959_v31  ;;  %579 = vperm.xlu1 %3505, %v3757_v12  }
  0xb2   : > { %446 = vperm.xlu0 %3513, %v3810_v33  }
  0xb3   : > { %v3963_v34 = vpop.permute.xlu1 %283  ;;  %v3965_v36 = vpop.permute.xlu0 %280 }
  0xb4   : > { %6227 = vst [vmem:[#allocation19_spill] sm:$0xff] %v3963_v34  ;;  %6228 = vst [vmem:[#allocation20_spill] sm:$0xff] %v3965_v36  ;;  %585 = vperm.xlu1 %3505, %v3767_v16  }
  0xb6   : > { %1496 = vperm.xlu0 %3513, %v3816_v35  }
  0xb7   : > { %v3969_v39 = vpop.permute.xlu1 %289  ;;  %v3971_v41 = vpop.permute.xlu0 %286 }
  0xb8   : > { %6229 = vst [vmem:[#allocation21_spill] sm:$0xff] %v3969_v39  ;;  %6230 = vst [vmem:[#allocation22_spill] sm:$0xff] %v3971_v41  ;;  %591 = vperm.xlu1 %3505, %v3777_v20  }
  0xba   : > { %1505 = vperm.xlu0 %3513, %v3822_v38  }
  0xbb   : > { %v3975_v43 = vpop.permute.xlu0 %1336 }
  0xbc   : > { %6231 = vst [vmem:[#allocation23_spill] sm:$0xff] %v3975_v43  ;;  %v3977_v45 = vpop.permute.xlu1 %343  ;;  %597 = vperm.xlu1 %3505, %v3787_v24   ;;  %v6188_v43 = vmov 6  }
  0xbd   : > { %6232 = vst [vmem:[#allocation24_spill] sm:$0xff] %v3977_v45 }
  0xbe   : > { %1511 = vperm.xlu0 %3513, %v3828_v40  }
  0xbf   : > { %v3981_v47 = vpop.permute.xlu0 %1345 }
  0xc0   : > { %6233 = vst [vmem:[#allocation25_spill] sm:$0xff] %v3981_v47  ;;  %v3983_v49 = vpop.permute.xlu1 %346  ;;  %603 = vperm.xlu1 %3505, %v3797_v28  }
  0xc2   : > { %1517 = vperm.xlu0 %3513, %v3834_v42  }
  0xc3   : > { %v3987_v52 = vpop.permute.xlu0 %1351 }
  0xc4   : > { %6234 = vst [vmem:[#allocation26_spill] sm:$0xff] %v3987_v52  ;;  %v3989_v54 = vpop.permute.xlu1 %352  ;;  %609 = vperm.xlu1 %3505, %v3807_v32  }
  0xc5   : > { %6235 = vst [vmem:[#allocation27_spill] sm:$0xff] %v3989_v54 }
  0xc6   : > { %1523 = vperm.xlu0 %3513, %v3840_v44  }
  0xc7   : > { %v3993_v56 = vpop.permute.xlu0 %1357 }
  0xc8   : > { %6236 = vst [vmem:[#allocation28_spill] sm:$0xff] %v3993_v56  ;;  %v3995_v59 = vpop.permute.xlu1 %358  ;;  %3506 = vset.pattern.permute.xlu1 %v6181_v61 }
  0xc9   : > { %6237 = vst [vmem:[#allocation29_spill] sm:$0xff] %v3995_v59  ;;  %647 = vperm.xlu1 %3506, %v3750_v9   ;;  %v6269_v59 = vmov 8  }
  0xca   : > { %1529 = vperm.xlu0 %3513, %v3846_v46  }
  0xcb   : > { %v4000_v63 = vpop.permute.xlu0 %1363 }
  0xcc   : > { %6238 = vst [vmem:[#allocation30_spill] sm:$0xff] %v4000_v63  ;;  %v4002_v3 = vpop.permute.xlu1 %364 }
  0xcd   : > { %6239 = vst [vmem:[#allocation31_spill] sm:$0xff] %v4002_v3  ;;  %650 = vperm.xlu1 %3506, %v3738_v5  }
  0xce   : > { %1535 = vperm.xlu0 %3513, %v3852_v48  }
  0xcf   : > { %v4006_v18 = vpop.permute.xlu0 %1369 }
  0xd0   : > { %6240 = vst [vmem:[#allocation32_spill] sm:$0xff] %v4006_v18  ;;  %v4008_v51 = vpop.permute.xlu1 %370 }
  0xd1   : > { %6241 = vst [vmem:[#allocation33_spill] sm:$0xff] %v4008_v51  ;;  %656 = vperm.xlu1 %3506, %v3760_v13  }
  0xd2   : > { %1541 = vperm.xlu0 %3513, %v3858_v50  }
  0xd3   : > { %v4012_v37 = vpop.permute.xlu0 %1375 }
  0xd4   : > { %6242 = vst [vmem:[#allocation34_spill] sm:$0xff] %v4012_v37  ;;  %v4014_v61 = vpop.permute.xlu1 %376 }
  0xd5   : > { %6243 = vst [vmem:[#allocation35_spill] sm:$0xff] %v4014_v61  ;;  %662 = vperm.xlu1 %3506, %v3770_v17  }
  0xd6   : > { %3515 = vset.pattern.permute.xlu0 %v6186_v0 }
  0xd7   : > { %887 = vperm.xlu0 %3515, %v3750_v9   ;;  %v4019_v58 = vpop.permute.xlu0 %1381 }
  0xd8   : > { %6244 = vst [vmem:[#allocation36_spill] sm:$0xff] %v4019_v58  ;;  %v4021_v18 = vpop.permute.xlu1 %382 }
  0xd9   : > { %6245 = vst [vmem:[#allocation37_spill] sm:$0xff] %v4021_v18  ;;  %668 = vperm.xlu1 %3506, %v3780_v21  }
  0xdb   : > { %896 = vperm.xlu0 %3515, %v3760_v13  }
  0xdc   : > { %v4025_v63 = vpop.permute.xlu0 %340 }
  0xdd   : > { %674 = vperm.xlu1 %3506, %v3790_v25   ;;  %v4028_v37 = vpop.permute.xlu1 %404 }
  0xdf   : > { %902 = vperm.xlu0 %3515, %v3770_v17  }
  0xe0   : > { %v4031_v56 = vpop.permute.xlu0 %349 }
  0xe1   : > { %680 = vperm.xlu1 %3506, %v3800_v29   ;;  %v4034_v0 = vpop.permute.xlu1 %410 }
  0xe3   : > { %908 = vperm.xlu0 %3515, %v3780_v21  }
  0xe4   : > { %v4037_v58 = vpop.permute.xlu0 %355 }
  0xe5   : > { %686 = vperm.xlu1 %3506, %v3810_v33   ;;  %v4040_v52 = vpop.permute.xlu1 %413 }
  0xe7   : > { %914 = vperm.xlu0 %3515, %v3790_v25  }
  0xe8   : > { %v4043_v47 = vpop.permute.xlu0 %361 }
  0xe9   : > { %3507 = vset.pattern.permute.xlu1 %v6188_v43  ;;  %v4046_v39 = vpop.permute.xlu1 %419 }
  0xea   : > { %724 = vperm.xlu1 %3507, %v3741_v6  }
  0xeb   : > { %920 = vperm.xlu0 %3515, %v3800_v29  }
  0xec   : > { %v4050_v41 = vpop.permute.xlu0 %367 }
  0xed   : > { %v4052_v34 = vpop.permute.xlu1 %425 }
  0xee   : > { %730 = vperm.xlu1 %3507, %v3738_v5  }
  0xef   : > { %926 = vperm.xlu0 %3515, %v3810_v33  }
  0xf0   : > { %v4056_v36 = vpop.permute.xlu0 %373 }
  0xf1   : > { %v4058_v30 = vpop.permute.xlu1 %431 }
  0xf2   : > { %733 = vperm.xlu1 %3507, %v3747_v8  }
  0xf3   : > { %1976 = vperm.xlu0 %3515, %v3816_v35  }
  0xf4   : > { %v4062_v43 = vpop.permute.xlu0 %379 }
  0xf5   : > { %v4064_v31 = vpop.permute.xlu1 %437 }
  0xf6   : > { %6246 = vst [vmem:[#allocation38_spill] sm:$0xff] %v4064_v31  ;;  %739 = vperm.xlu1 %3507, %v3757_v12  }
  0xf7   : > { %1979 = vperm.xlu0 %3515, %v3882_v53  }
  0xf8   : > { %v4068_v26 = vpop.permute.xlu0 %385 }
  0xf9   : > { %v4070_v27 = vpop.permute.xlu1 %443 }
  0xfa   : > { %745 = vperm.xlu1 %3507, %v3767_v16  }
  0xfb   : > { %1985 = vperm.xlu0 %3515, %v3822_v38  }
  0xfc   : > { %v4074_v22 = vpop.permute.xlu0 %1435 }
  0xfd   : > { %6247 = vst [vmem:[#allocation39_spill] sm:$0xff] %v4074_v22  ;;  %v4076_v23 = vpop.permute.xlu1 %449  ;;  %v6190_v22 = vmov 7  }
  0xfe   : > { %751 = vperm.xlu1 %3507, %v3777_v20  }
  0xff   : > { %1997 = vperm.xlu0 %3515, %v3834_v42  }
 0x100   : > { %v4080_v15 = vpop.permute.xlu0 %1444 }
 0x101   : > { %6248 = vst [vmem:[#allocation40_spill] sm:$0xff] %v4080_v15 }
 0x102   : > { %757 = vperm.xlu1 %3507, %v3787_v24   ;;  %v4083_v19 = vpop.permute.xlu1 %487 }
 0x103   : > { %6249 = vst [vmem:[#allocation41_spill] sm:$0xff] %v4083_v19  ;;  %3539 = vset.pattern.permute.xlu0 %v6250_v11 }
 0x104   : > { %484 = vperm.xlu0 %3539, %v3741_v6   ;;  %v4087_v7 = vpop.permute.xlu0 %1450 }
 0x105   : > { %6251 = vst [vmem:[#allocation42_spill] sm:$0xff] %v4087_v7 }
 0x106   : > { %763 = vperm.xlu1 %3507, %v3797_v28   ;;  %v4090_v14 = vpop.permute.xlu1 %490 }
 0x108   : > { %493 = vperm.xlu0 %3539, %v3747_v8   ;;  %v4093_v10 = vpop.permute.xlu0 %1456 }
 0x109   : > { %6252 = vst [vmem:[#allocation43_spill] sm:$0xff] %v4093_v10 }
 0x10a   : > { %769 = vperm.xlu1 %3507, %v3807_v32   ;;  %v4096_v15 = vpop.permute.xlu1 %496 }
 0x10b   : > { %6253 = vst [vmem:[#allocation44_spill] sm:$0xff] %v4096_v15 }
 0x10c   : > { %499 = vperm.xlu0 %3539, %v3757_v12   ;;  %v4099_v18 = vpop.permute.xlu0 %1462 }
 0x10d   : > { %6254 = vst [vmem:[#allocation45_spill] sm:$0xff] %v4099_v18 }
 0x10e   : > { %3508 = vset.pattern.permute.xlu1 %v6190_v22  ;;  %v4102_v7 = vpop.permute.xlu1 %502 }
 0x10f   : > { %6255 = vst [vmem:[#allocation46_spill] sm:$0xff] %v4102_v7  ;;  %807 = vperm.xlu1 %3508, %v3750_v9  }
 0x110   : > { %505 = vperm.xlu0 %3539, %v3767_v16   ;;  %v4106_v61 = vpop.permute.xlu0 %1468 }
 0x111   : > { %6256 = vst [vmem:[#allocation47_spill] sm:$0xff] %v4106_v61 }
 0x112   : > { %v4108_v10 = vpop.permute.xlu1 %508 }
 0x113   : > { %6257 = vst [vmem:[#allocation48_spill] sm:$0xff] %v4108_v10  ;;  %810 = vperm.xlu1 %3508, %v3738_v5  }
 0x114   : > { %511 = vperm.xlu0 %3539, %v3777_v20   ;;  %v4112_v15 = vpop.permute.xlu0 %1474 }
 0x115   : > { %6258 = vst [vmem:[#allocation49_spill] sm:$0xff] %v4112_v15 }
 0x116   : > { %v4114_v18 = vpop.permute.xlu1 %514 }
 0x117   : > { %6259 = vst [vmem:[#allocation50_spill] sm:$0xff] %v4114_v18  ;;  %816 = vperm.xlu1 %3508, %v3760_v13  }
 0x118   : > { %517 = vperm.xlu0 %3539, %v3787_v24  }
 0x119   : > { %v4118_v22 = vpop.permute.xlu0 %407 }
 0x11a   : > { %v4120_v7 = vpop.permute.xlu1 %520 }
 0x11b   : > { %6260 = vst [vmem:[#allocation51_spill] sm:$0xff] %v4120_v7  ;;  %822 = vperm.xlu1 %3508, %v3770_v17  }
 0x11c   : > { %523 = vperm.xlu0 %3539, %v3797_v28  }
 0x11d   : > { %v4124_v61 = vpop.permute.xlu0 %416 }
 0x11e   : > { %6261 = vst [vmem:[#allocation52_spill] sm:$0xff] %v4124_v61  ;;  %v4126_v10 = vpop.permute.xlu1 %526 }
 0x11f   : > { %6262 = vst [vmem:[#allocation53_spill] sm:$0xff] %v4126_v10  ;;  %828 = vperm.xlu1 %3508, %v3780_v21  }
 0x120   : > { %529 = vperm.xlu0 %3539, %v3807_v32  }
 0x121   : > { %v4130_v15 = vpop.permute.xlu0 %422 }
 0x122   : > { %6263 = vst [vmem:[#allocation54_spill] sm:$0xff] %v4130_v15 }
 0x123   : > { %834 = vperm.xlu1 %3508, %v3790_v25   ;;  %v4133_v18 = vpop.permute.xlu1 %564 }
 0x124   : > { %1579 = vperm.xlu0 %3539, %v3882_v53  }
 0x125   : > { %v4136_v7 = vpop.permute.xlu0 %428 }
 0x126   : > { %6264 = vst [vmem:[#allocation55_spill] sm:$0xff] %v4136_v7 }
 0x127   : > { %840 = vperm.xlu1 %3508, %v3800_v29   ;;  %v4139_v19 = vpop.permute.xlu1 %570 }
 0x128   : > { %6265 = vst [vmem:[#allocation56_spill] sm:$0xff] %v4139_v19  ;;  %1588 = vperm.xlu0 %3539, %v3888_v55   ;;  %v6287_v19 = vmov 0  }
 0x129   : > { %v4142_v10 = vpop.permute.xlu0 %434 }
 0x12a   : > { %6266 = vst [vmem:[#allocation57_spill] sm:$0xff] %v4142_v10 }
 0x12b   : > { %846 = vperm.xlu1 %3508, %v3810_v33   ;;  %v4145_v51 = vpop.permute.xlu1 %573 }
 0x12c   : > { %6267 = vst [vmem:[#allocation58_spill] sm:$0xff] %v4145_v51  ;;  %1594 = vperm.xlu0 %3539, %v3894_v57  }
 0x12d   : > { %v4148_v3 = vpop.permute.xlu0 %440 }
 0x12e   : > { %6268 = vst [vmem:[#allocation59_spill] sm:$0xff] %v4148_v3 }
 0x12f   : > { %3509 = vset.pattern.permute.xlu1 %v6269_v59  ;;  %v4151_v54 = vpop.permute.xlu1 %579 }
 0x130   : > { %6270 = vst [vmem:[#allocation60_spill] sm:$0xff] %v4151_v54  ;;  %884 = vperm.xlu1 %3509, %v3741_v6   ;;  %1600 = vperm.xlu0 %3539, %v3901_v60  }
 0x131   : > { %v4155_v7 = vpop.permute.xlu0 %446 }
 0x132   : > { %6271 = vst [vmem:[#allocation61_spill] sm:$0xff] %v4155_v7  ;;  %v6277_v7 = vmov 7  }
 0x133   : > { %v4157_v15 = vpop.permute.xlu1 %585 }
 0x134   : > { %6272 = vst [vmem:[#allocation62_spill] sm:$0xff] %v4157_v15  ;;  %890 = vperm.xlu1 %3509, %v3738_v5   ;;  %1606 = vperm.xlu0 %3539, %v3907_v62  }
 0x135   : > { %v4161_v10 = vpop.permute.xlu0 %1496 }
 0x136   : > { %6273 = vst [vmem:[#allocation63_spill] sm:$0xff] %v4161_v10 }
 0x137   : > { %v4163_v51 = vpop.permute.xlu1 %591 }
 0x138   : > { %6274 = vst [vmem:[#allocation64_spill] sm:$0xff] %v4163_v51  ;;  %893 = vperm.xlu1 %3509, %v3747_v8   ;;  %1609 = vperm.xlu0 %3539, %v3846_v46  }
 0x139   : > { %v4167_v3 = vpop.permute.xlu0 %1505 }
 0x13a   : > { %6275 = vst [vmem:[#allocation65_spill] sm:$0xff] %v4167_v3 }
 0x13b   : > { %v4169_v54 = vpop.permute.xlu1 %597 }
 0x13c   : > { %6276 = vst [vmem:[#allocation66_spill] sm:$0xff] %v4169_v54  ;;  %899 = vperm.xlu1 %3509, %v3757_v12   ;;  %3542 = vset.pattern.permute.xlu0 %v6277_v7 }
 0x13d   : > { %804 = vperm.xlu0 %3542, %v3741_v6   ;;  %v4174_v5 = vpop.permute.xlu0 %1511 }
 0x13e   : > { %6278 = vst [vmem:[#allocation67_spill] sm:$0xff] %v4174_v5 }
 0x13f   : > { %v4176_v15 = vpop.permute.xlu1 %603 }
 0x140   : > { %905 = vperm.xlu1 %3509, %v3767_v16  }
 0x141   : > { %813 = vperm.xlu0 %3542, %v3747_v8   ;;  %v4180_v10 = vpop.permute.xlu0 %1517 }
 0x142   : > { %6279 = vst [vmem:[#allocation68_spill] sm:$0xff] %v4180_v10 }
 0x143   : > { %v4182_v51 = vpop.permute.xlu1 %609 }
 0x144   : > { %911 = vperm.xlu1 %3509, %v3777_v20  }
 0x145   : > { %819 = vperm.xlu0 %3542, %v3757_v12   ;;  %v4186_v3 = vpop.permute.xlu0 %1523 }
 0x146   : > { %6280 = vst [vmem:[#allocation69_spill] sm:$0xff] %v4186_v3 }
 0x148   : > { %917 = vperm.xlu1 %3509, %v3787_v24   ;;  %v4189_v5 = vpop.permute.xlu1 %647 }
 0x149   : > { %6281 = vst [vmem:[#allocation70_spill] sm:$0xff] %v4189_v5  ;;  %825 = vperm.xlu0 %3542, %v3767_v16   ;;  %v4192_v54 = vpop.permute.xlu0 %1529  ;;  %v2791_v5 = vld [vmem:[%s3732_s28 + $0x90] sm:$0xff] }
 0x14a   : > { %6282 = vst [vmem:[#allocation71_spill] sm:$0xff] %v4192_v54 }
 0x14c   : > { %923 = vperm.xlu1 %3509, %v3797_v28   ;;  %v4195_v10 = vpop.permute.xlu1 %650 }
 0x14d   : > { %6283 = vst [vmem:[#allocation72_spill] sm:$0xff] %v4195_v10  ;;  %831 = vperm.xlu0 %3542, %v3777_v20   ;;  %v4198_v61 = vpop.permute.xlu0 %1535  ;;  %v4213_v10 = vadd.s32 %v2791_v5, %v3727_v1 }
 0x14e   : > { %6284 = vst [vmem:[#allocation73_spill] sm:$0xff] %v4198_v61 }
 0x150   : > { %929 = vperm.xlu1 %3509, %v3807_v32   ;;  %v4201_v45 = vpop.permute.xlu1 %656 }
 0x151   : > { %6285 = vst [vmem:[#allocation74_spill] sm:$0xff] %v4201_v45  ;;  %837 = vperm.xlu0 %3542, %v3787_v24   ;;  %v4204_v3 = vpop.permute.xlu0 %1541  ;;  %v6304_v45 = vmov 1  }
 0x152   : > { %6286 = vst [vmem:[#allocation75_spill] sm:$0xff] %v4204_v3 }
 0x154   : > { %3510 = vset.pattern.permute.xlu1 %v6287_v19  ;;  %v4208_v54 = vpop.permute.xlu1 %662 }
 0x155   : > { %6288 = vst [vmem:[#allocation76_spill] sm:$0xff] %v4208_v54  ;;  %1339 = vperm.xlu1 %3510, %v3882_v53   ;;  %843 = vperm.xlu0 %3542, %v3797_v28  }
 0x156   : > { %v4215_v61 = vpop.permute.xlu0 %887 }
 0x157   : > { %6289 = vst [vmem:[#allocation77_spill] sm:$0xff] %v4215_v61 }
 0x158   : > { %v4217_v31 = vpop.permute.xlu1 %668 }
 0x159   : > { %6290 = vst [vmem:[#allocation78_spill] sm:$0xff] %v4217_v31  ;;  %1342 = vperm.xlu1 %3510, %v4213_v10   ;;  %849 = vperm.xlu0 %3542, %v3807_v32  }
 0x15a   : > { %v4221_v3 = vpop.permute.xlu0 %896 }
 0x15b   : > { %6291 = vst [vmem:[#allocation79_spill] sm:$0xff] %v4221_v3 }
 0x15c   : > { %v4223_v19 = vpop.permute.xlu1 %674 }
 0x15d   : > { %6292 = vst [vmem:[#allocation80_spill] sm:$0xff] %v4223_v19  ;;  %1348 = vperm.xlu1 %3510, %v3888_v55   ;;  %1896 = vperm.xlu0 %3542, %v3816_v35  }
 0x15e   : > { %v4227_v54 = vpop.permute.xlu0 %902 }
 0x15f   : > { %6293 = vst [vmem:[#allocation81_spill] sm:$0xff] %v4227_v54 }
 0x160   : > { %v4229_v1 = vpop.permute.xlu1 %680 }
 0x161   : > { %6294 = vst [vmem:[#allocation82_spill] sm:$0xff] %v4229_v1  ;;  %1354 = vperm.xlu1 %3510, %v3894_v57   ;;  %1911 = vperm.xlu0 %3542, %v3828_v40  }
 0x162   : > { %v4233_v5 = vpop.permute.xlu0 %908 }
 0x163   : > { %6295 = vst [vmem:[#allocation83_spill] sm:$0xff] %v4233_v5 }
 0x164   : > { %v4235_v61 = vpop.permute.xlu1 %686 }
 0x165   : > { %6296 = vst [vmem:[#allocation84_spill] sm:$0xff] %v4235_v61  ;;  %1360 = vperm.xlu1 %3510, %v3901_v60   ;;  %1923 = vperm.xlu0 %3542, %v3840_v44  }
 0x166   : > { %v4239_v3 = vpop.permute.xlu0 %914 }
 0x167   : > { %6297 = vst [vmem:[#allocation85_spill] sm:$0xff] %v4239_v3  ;;  %v6302_v3 = vmov 5  }
 0x169   : > { %1366 = vperm.xlu1 %3510, %v3907_v62   ;;  %v4242_v19 = vpop.permute.xlu1 %724  ;;  %1926 = vperm.xlu0 %3542, %v3907_v62  }
 0x16a   : > { %v4245_v54 = vpop.permute.xlu0 %920 }
 0x16b   : > { %6298 = vst [vmem:[#allocation86_spill] sm:$0xff] %v4245_v54 }
 0x16d   : > { %1372 = vperm.xlu1 %3510, %v3913_v2   ;;  %v4248_v1 = vpop.permute.xlu1 %730  ;;  %1929 = vperm.xlu0 %3542, %v3846_v46  }
 0x16e   : > { %6299 = vst [vmem:[#allocation87_spill] sm:$0xff] %v4248_v1  ;;  %v4251_v61 = vpop.permute.xlu0 %926 }
 0x16f   : > { %6300 = vst [vmem:[#allocation88_spill] sm:$0xff] %v4251_v61 }
 0x171   : > { %1378 = vperm.xlu1 %3510, %v3919_v4   ;;  %v4254_v5 = vpop.permute.xlu1 %733  ;;  %3552 = vset.pattern.permute.xlu0 %v6302_v3 }
 0x172   : > { %6301 = vst [vmem:[#allocation89_spill] sm:$0xff] %v4254_v5  ;;  %644 = vperm.xlu0 %3552, %v3741_v6   ;;  %v4258_v31 = vpop.permute.xlu0 %1976 }
 0x173   : > { %6303 = vst [vmem:[#allocation90_spill] sm:$0xff] %v4258_v31 }
 0x175   : > { %3512 = vset.pattern.permute.xlu1 %v6304_v45  ;;  %v4261_v54 = vpop.permute.xlu1 %739 }
 0x176   : > { %6305 = vst [vmem:[#allocation91_spill] sm:$0xff] %v4261_v54  ;;  %1432 = vperm.xlu1 %3512, %v3816_v35   ;;  %653 = vperm.xlu0 %3552, %v3747_v8   ;;  %v4265_v1 = vpop.permute.xlu0 %1979  ;;  %v6324_v54 = vmov 4  }
 0x177   : > { %6306 = vst [vmem:[#allocation92_spill] sm:$0xff] %v4265_v1 }
 0x179   : > { %v4267_v61 = vpop.permute.xlu1 %745 }
 0x17a   : > { %6307 = vst [vmem:[#allocation93_spill] sm:$0xff] %v4267_v61  ;;  %1438 = vperm.xlu1 %3512, %v4213_v10   ;;  %659 = vperm.xlu0 %3552, %v3757_v12   ;;  %v4271_v5 = vpop.permute.xlu0 %1985 }
 0x17b   : > { %6308 = vst [vmem:[#allocation94_spill] sm:$0xff] %v4271_v5 }
 0x17d   : > { %v4273_v6 = vpop.permute.xlu1 %751 }
 0x17e   : > { %6309 = vst [vmem:[#allocation95_spill] sm:$0xff] %v4273_v6  ;;  %1441 = vperm.xlu1 %3512, %v3822_v38   ;;  %665 = vperm.xlu0 %3552, %v3767_v16   ;;  %v4277_v45 = vpop.permute.xlu0 %1997 }
 0x17f   : > { %6310 = vst [vmem:[#allocation96_spill] sm:$0xff] %v4277_v45 }
 0x181   : > { %v4279_v31 = vpop.permute.xlu1 %757 }
 0x182   : > { %6311 = vst [vmem:[#allocation97_spill] sm:$0xff] %v4279_v31  ;;  %1447 = vperm.xlu1 %3512, %v3828_v40   ;;  %671 = vperm.xlu0 %3552, %v3777_v20  }
 0x183   : > { %v4283_v8 = vpop.permute.xlu0 %484 }
 0x185   : > { %v4285_v1 = vpop.permute.xlu1 %763 }
 0x186   : > { %1453 = vperm.xlu1 %3512, %v3834_v42   ;;  %677 = vperm.xlu0 %3552, %v3787_v24  }
 0x187   : > { %v4289_v12 = vpop.permute.xlu0 %493 }
 0x188   : > { %6312 = vst [vmem:[#allocation98_spill] sm:$0xff] %v4289_v12 }
 0x189   : > { %v4291_v5 = vpop.permute.xlu1 %769 }
 0x18a   : > { %1459 = vperm.xlu1 %3512, %v3840_v44   ;;  %683 = vperm.xlu0 %3552, %v3797_v28  }
 0x18b   : > { %v4295_v16 = vpop.permute.xlu0 %499 }
 0x18c   : > { %6313 = vst [vmem:[#allocation99_spill] sm:$0xff] %v4295_v16 }
 0x18e   : > { %1465 = vperm.xlu1 %3512, %v3846_v46   ;;  %v4298_v20 = vpop.permute.xlu1 %807  ;;  %689 = vperm.xlu0 %3552, %v3807_v32  }
 0x18f   : > { %6314 = vst [vmem:[#allocation100_spill] sm:$0xff] %v4298_v20  ;;  %v4301_v45 = vpop.permute.xlu0 %505  ;;  %v6320_v20 = vmov 2  }
 0x190   : > { %6315 = vst [vmem:[#allocation101_spill] sm:$0xff] %v4301_v45 }
 0x192   : > { %1471 = vperm.xlu1 %3512, %v3852_v48   ;;  %v4304_v24 = vpop.permute.xlu1 %810  ;;  %1739 = vperm.xlu0 %3552, %v3882_v53  }
 0x193   : > { %6316 = vst [vmem:[#allocation102_spill] sm:$0xff] %v4304_v24  ;;  %v4307_v31 = vpop.permute.xlu0 %511 }
 0x194   : > { %6317 = vst [vmem:[#allocation103_spill] sm:$0xff] %v4307_v31 }
 0x196   : > { %1477 = vperm.xlu1 %3512, %v3858_v50   ;;  %v4310_v28 = vpop.permute.xlu1 %816  ;;  %1754 = vperm.xlu0 %3552, %v3894_v57  }
 0x197   : > { %6318 = vst [vmem:[#allocation104_spill] sm:$0xff] %v4310_v28  ;;  %v4313_v46 = vpop.permute.xlu0 %517 }
 0x198   : > { %6319 = vst [vmem:[#allocation105_spill] sm:$0xff] %v4313_v46 }
 0x19a   : > { %3514 = vset.pattern.permute.xlu1 %v6320_v20  ;;  %v4316_v32 = vpop.permute.xlu1 %822  ;;  %1766 = vperm.xlu0 %3552, %v3907_v62  }
 0x19b   : > { %6321 = vst [vmem:[#allocation106_spill] sm:$0xff] %v4316_v32  ;;  %1499 = vperm.xlu1 %3514, %v3882_v53   ;;  %v4320_v6 = vpop.permute.xlu0 %523 }
 0x19e   : > { %v4322_v24 = vpop.permute.xlu1 %828  ;;  %1775 = vperm.xlu0 %3552, %v3852_v48  }
 0x19f   : > { %6322 = vst [vmem:[#allocation107_spill] sm:$0xff] %v4322_v24  ;;  %1502 = vperm.xlu1 %3514, %v4213_v10   ;;  %v4326_v28 = vpop.permute.xlu0 %529 }
 0x1a2   : > { %v4328_v61 = vpop.permute.xlu1 %834  ;;  %3556 = vset.pattern.permute.xlu0 %v6324_v54 }
 0x1a3   : > { %6323 = vst [vmem:[#allocation108_spill] sm:$0xff] %v4328_v61  ;;  %1508 = vperm.xlu1 %3514, %v3888_v55   ;;  %567 = vperm.xlu0 %3556, %v3750_v9   ;;  %v4333_v20 = vpop.permute.xlu0 %1579 }
 0x1a4   : > { %6325 = vst [vmem:[#allocation109_spill] sm:$0xff] %v4333_v20 }
 0x1a6   : > { %v4335_v32 = vpop.permute.xlu1 %840 }
 0x1a7   : > { %6326 = vst [vmem:[#allocation110_spill] sm:$0xff] %v4335_v32  ;;  %1514 = vperm.xlu1 %3514, %v3894_v57   ;;  %576 = vperm.xlu0 %3556, %v3760_v13   ;;  %v4339_v24 = vpop.permute.xlu0 %1588 }
 0x1a8   : > { %6327 = vst [vmem:[#allocation111_spill] sm:$0xff] %v4339_v24 }
 0x1aa   : > { %v4341_v46 = vpop.permute.xlu1 %846 }
 0x1ab   : > { %6328 = vst [vmem:[#allocation112_spill] sm:$0xff] %v4341_v46  ;;  %1520 = vperm.xlu1 %3514, %v3901_v60   ;;  %582 = vperm.xlu0 %3556, %v3770_v17   ;;  %v4345_v61 = vpop.permute.xlu0 %1594 }
 0x1ac   : > { %6329 = vst [vmem:[#allocation113_spill] sm:$0xff] %v4345_v61 }
 0x1af   : > { %1526 = vperm.xlu1 %3514, %v3907_v62   ;;  %v4348_v31 = vpop.permute.xlu1 %884  ;;  %588 = vperm.xlu0 %3556, %v3780_v21   ;;  %v4351_v32 = vpop.permute.xlu0 %1600 }
 0x1b0   : > { %6330 = vst [vmem:[#allocation114_spill] sm:$0xff] %v4351_v32 }
 0x1b3   : > { %1532 = vperm.xlu1 %3514, %v3913_v2   ;;  %v4354_v20 = vpop.permute.xlu1 %890  ;;  %594 = vperm.xlu0 %3556, %v3790_v25   ;;  %v4357_v24 = vpop.permute.xlu0 %1606 }
 0x1b4   : > { %6331 = vst [vmem:[#allocation115_spill] sm:$0xff] %v4354_v20  ;;  %6332 = vst [vmem:[#allocation116_spill] sm:$0xff] %v4357_v24 }
 0x1b7   : > { %1538 = vperm.xlu1 %3514, %v3919_v4   ;;  %v4360_v46 = vpop.permute.xlu1 %893  ;;  %600 = vperm.xlu0 %3556, %v3800_v29   ;;  %v4363_v61 = vpop.permute.xlu0 %1609 }
 0x1b8   : > { %6333 = vst [vmem:[#allocation117_spill] sm:$0xff] %v4360_v46  ;;  %6334 = vst [vmem:[#allocation118_spill] sm:$0xff] %v4363_v61  ;;  %v195_v61 = vld [vmem:[%s6175_s2 + $0x80] sm:$0xff] }
 0x1bb   : > { %3516 = vset.pattern.permute.xlu1 %v6250_v11  ;;  %v4366_v45 = vpop.permute.xlu1 %899  ;;  %606 = vperm.xlu0 %3556, %v3810_v33   ;;  %v196_v11 = vld [vmem:[%s6175_s2 + $0x88] sm:$0xff] }
 0x1bc   : > { %6335 = vst [vmem:[#allocation119_spill] sm:$0xff] %v4366_v45  ;;  %1576 = vperm.xlu1 %3516, %v3816_v35   ;;  %v4370_v32 = vpop.permute.xlu0 %804  ;;  %v3241_v45 = vpack.c.bf16 %v196_v11, %v195_v61 }
 0x1be   : > { %3242 = vmatprep.subr.bf16.mxu0 %v3241_v45  ;;  %3306 = vmatprep.subr.bf16.mxu1 %v3241_v45 }
 0x1bf   : > { %v4372_v2 = vpop.permute.xlu1 %905  ;;  %1656 = vperm.xlu0 %3556, %v3816_v35   ;;  %3244 = vmatpush3.bf16.msra.mxu0 %v3241_v45 }
 0x1c0   : > { %6336 = vst [vmem:[#allocation120_spill] sm:$0xff] %v4372_v2  ;;  %1582 = vperm.xlu1 %3516, %v4213_v10   ;;  %v4376_v24 = vpop.permute.xlu0 %813  ;;  %3308 = vmatpush3.bf16.msra.mxu1 %v3241_v45 }
 0x1c1   : > { %6337 = vst [vmem:[#allocation121_spill] sm:$0xff] %v4376_v24  ;;  %v198_v24 = vld [vmem:[%s6175_s2 + $0x98] sm:$0xff] }
 0x1c3   : > { %v4378_v46 = vpop.permute.xlu1 %911  ;;  %1668 = vperm.xlu0 %3556, %v3888_v55  }
 0x1c4   : > { %6338 = vst [vmem:[#allocation122_spill] sm:$0xff] %v4378_v46  ;;  %1585 = vperm.xlu1 %3516, %v3822_v38   ;;  %v4388_v2 = vpop.permute.xlu0 %819  ;;  %v197_v46 = vld [vmem:[%s6175_s2 + $0x90] sm:$0xff] }
 0x1c5   : > { %6339 = vst [vmem:[#allocation123_spill] sm:$0xff] %v4388_v2  ;;  %v3245_v11 = vpack.c.bf16 %v198_v24, %v197_v46  ;;  %v200_v2 = vld [vmem:[%s6175_s2 + $0xa8] sm:$0xff]  ;;  %v201_v24 = vld [vmem:[%s6175_s2 + $0xb0] sm:$0xff] }
 0x1c7   : > { %v4390_v20 = vpop.permute.xlu1 %917  ;;  %1671 = vperm.xlu0 %3556, %v3828_v40   ;;  %3246 = vmatprep.subr.bf16.mxu0 %v3245_v11 }
 0x1c8   : > { %6340 = vst [vmem:[#allocation124_spill] sm:$0xff] %v4390_v20  ;;  %1591 = vperm.xlu1 %3516, %v3828_v40   ;;  %v4400_v16 = vpop.permute.xlu0 %825  ;;  %3310 = vmatprep.subr.bf16.mxu1 %v3245_v11  ;;  %v199_v20 = vld [vmem:[%s6175_s2 + $0xa0] sm:$0xff] }
 0x1c9   : > { %6341 = vst [vmem:[#allocation125_spill] sm:$0xff] %v4400_v16  ;;  %3248 = vmatpush3.bf16.msra.mxu0 %v3245_v11  ;;  %v3249_v46 = vpack.c.bf16 %v200_v2, %v199_v20  ;;  %3312 = vmatpush3.bf16.msra.mxu1 %v3245_v11  ;;  %v203_v20 = vld [vmem:[%s6175_s2 + $0xc0] sm:$0xff]  ;;  %v204_v11 = vld [vmem:[%s6175_s2 + $0xc8] sm:$0xff] }
 0x1cb   : > { %v4402_v61 = vpop.permute.xlu1 %923  ;;  %1680 = vperm.xlu0 %3556, %v3901_v60   ;;  %3250 = vmatprep.subr.bf16.mxu0 %v3249_v46 }
 0x1cc   : > { %6342 = vst [vmem:[#allocation126_spill] sm:$0xff] %v4402_v61  ;;  %1597 = vperm.xlu1 %3516, %v3834_v42   ;;  %v4412_v16 = vpop.permute.xlu0 %831  ;;  %3314 = vmatprep.subr.bf16.mxu1 %v3249_v46  ;;  %v202_v61 = vld [vmem:[%s6175_s2 + $0xb8] sm:$0xff] }
 0x1cd   : > { %6343 = vst [vmem:[#allocation127_spill] sm:$0xff] %v4412_v16  ;;  %3252 = vmatpush3.bf16.msra.mxu0 %v3249_v46  ;;  %v3253_v2 = vpack.c.bf16 %v202_v61, %v201_v24  ;;  %3316 = vmatpush3.bf16.msra.mxu1 %v3249_v46  ;;  %v3257_v61 = vpack.c.bf16 %v204_v11, %v203_v20  ;;  %v205_v46 = vld [vmem:[%s6175_s2 + $0xd0] sm:$0xff]  ;;  %v206_v24 = vld [vmem:[%s6175_s2 + $0xd8] sm:$0xff]  ;;  %v207_v20 = vld [vmem:[%s6175_s2 + $0xe0] sm:$0xff] }
 0x1ce   : > { %v208_v11 = vld [vmem:[%s6175_s2 + $0xe8] sm:$0xff] }
 0x1cf   : > { %v4414_v45 = vpop.permute.xlu1 %929  ;;  %1683 = vperm.xlu0 %3556, %v3840_v44   ;;  %3254 = vmatprep.subr.bf16.mxu0 %v3253_v2 }
 0x1d0   : > { %6344 = vst [vmem:[#allocation128_spill] sm:$0xff] %v4414_v45  ;;  %1603 = vperm.xlu1 %3516, %v3840_v44   ;;  %v4424_v16 = vpop.permute.xlu0 %837  ;;  %3318 = vmatprep.subr.bf16.mxu1 %v3253_v2 }
 0x1d1   : > { %6345 = vst [vmem:[#allocation129_spill] sm:$0xff] %v4424_v16  ;;  %3256 = vmatpush3.bf16.msra.mxu0 %v3253_v2  ;;  %3320 = vmatpush3.bf16.msra.mxu1 %v3253_v2  ;;  %v3261_v2 = vpack.c.bf16 %v206_v24, %v205_v46  ;;  %v6349_v24 = vmov 6  }
 0x1d2   : > { %3258 = vmatprep.subr.bf16.mxu0 %v3257_v61  ;;  %3322 = vmatprep.subr.bf16.mxu1 %v3257_v61 }
 0x1d3   : > { %1695 = vperm.xlu0 %3556, %v3852_v48  }
 0x1d4   : > { %3517 = vset.pattern.permute.xlu1 %v6324_v54  ;;  %v4434_v45 = vpop.permute.xlu1 %1339  ;;  %v4436_v16 = vpop.permute.xlu0 %843 }
 0x1d5   : > { %6346 = vst [vmem:[#allocation130_spill] sm:$0xff] %v4434_v45  ;;  %1659 = vperm.xlu1 %3517, %v3882_v53   ;;  %3260 = vmatpush3.bf16.msra.mxu0 %v3257_v61 }
 0x1d6   : > { %3324 = vmatpush3.bf16.msra.mxu1 %v3257_v61  ;;  %3262 = vmatprep.subr.bf16.mxu0 %v3261_v2  ;;  %v3265_v61 = vpack.c.bf16 %v208_v11, %v207_v20  ;;  %v209_v20 = vld [vmem:[%s6175_s2 + $0xf0] sm:$0xff] }
 0x1d7   : > { %1698 = vperm.xlu0 %3556, %v3919_v4   ;;  %3326 = vmatprep.subr.bf16.mxu1 %v3261_v2 }
 0x1d8   : > { %v4446_v45 = vpop.permute.xlu1 %1342  ;;  %v4448_v44 = vpop.permute.xlu0 %849 }
 0x1d9   : > { %6347 = vst [vmem:[#allocation131_spill] sm:$0xff] %v4446_v45  ;;  %3518 = vset.pattern.permute.xlu1 %v6302_v3  ;;  %3264 = vmatpush3.bf16.msra.mxu0 %v3261_v2 }
 0x1da   : > { %1736 = vperm.xlu1 %3518, %v3816_v35   ;;  %3328 = vmatpush3.bf16.msra.mxu1 %v3261_v2  ;;  %v210_v2 = vld [vmem:[%s6175_s2 + $0xf8] sm:$0xff] }
 0x1db   : > { %1701 = vperm.xlu0 %3556, %v3858_v50   ;;  %3266 = vmatprep.subr.bf16.mxu0 %v3265_v61  ;;  %v3269_v11 = vpack.c.bf16 %v210_v2, %v209_v20  ;;  %v179_v20 = vld [vmem:[%s6175_s2] sm:$0xff] }
 0x1dc   : > { %v4459_v45 = vpop.permute.xlu1 %1348  ;;  %v4461_v46 = vpop.permute.xlu0 %1896  ;;  %3330 = vmatprep.subr.bf16.mxu1 %v3265_v61 }
 0x1dd   : > { %6348 = vst [vmem:[#allocation132_spill] sm:$0xff] %v4459_v45  ;;  %3268 = vmatpush3.bf16.msra.mxu0 %v3265_v61 }
 0x1de   : > { %3519 = vset.pattern.permute.xlu1 %v6349_v24  ;;  %3332 = vmatpush3.bf16.msra.mxu1 %v3265_v61  ;;  %v180_v61 = vld [vmem:[%s6175_s2 + $0x8] sm:$0xff] }
 0x1df   : > { %1816 = vperm.xlu1 %3519, %v3816_v35   ;;  %3563 = vset.pattern.permute.xlu0 %v6349_v24 }
 0x1e0   : > { %v4466_v60 = vpop.permute.xlu1 %1354  ;;  %727 = vperm.xlu0 %3563, %v3750_v9   ;;  %v4469_v12 = vpop.permute.xlu0 %1911  ;;  %3270 = vmatprep.subr.bf16.mxu0 %v3269_v11 }
 0x1e1   : > { %6350 = vst [vmem:[#allocation133_spill] sm:$0xff] %v4466_v60  ;;  %3272 = vmatpush3.bf16.msra.mxu0 %v3269_v11  ;;  %v172_v60 = vlaneseq  ;;  %3334 = vmatprep.subr.bf16.mxu1 %v3269_v11 }
 0x1e2   : > { %3336 = vmatpush3.bf16.msra.mxu1 %v3269_v11 }
 0x1e3   : > { %1819 = vperm.xlu1 %3519, %v3882_v53   ;;  %v4498_v11 = vand.u32 127, %v172_v60 }
 0x1e4   : > { %v4478_v35 = vpop.permute.xlu1 %1360  ;;  %736 = vperm.xlu0 %3563, %v3760_v13   ;;  %v4481_v9 = vpop.permute.xlu0 %1923 }
 0x1e5   : > { %6351 = vst [vmem:[#allocation134_spill] sm:$0xff] %v4478_v35  ;;  %6352 = vst [vmem:[#allocation135_spill] sm:$0xff] %v4481_v9  ;;  %v4496_v35 = vpack.c.bf16 %v180_v61, %v179_v20  ;;  %vm451_vm0 = vcmp.eq.s32.totalorder %v4498_v11, %v4028_v37  ;;  %vm387_vm1 = vcmp.eq.s32.totalorder %v4498_v11, %v4025_v63 }
 0x1e6   : > { %vm531_vm2 = vcmp.eq.s32.totalorder %v4498_v11, %v4283_v8  ;;  %vm467_vm3 = vmor %vm387_vm1, %vm451_vm0  ;;  %vm611_vm5 = vcmp.eq.s32.totalorder %v4498_v11, %v4133_v18  ;;  %vm851_vm6 = vcmp.eq.s32.totalorder %v4498_v11, %v4370_v32  ;;  %vm771_vm9 = vcmp.eq.s32.totalorder %v4498_v11, %v4242_v19 }
 0x1e7   : > { %3520 = vset.pattern.permute.xlu1 %v6324_v54  ;;  %3274 = vmatprep.subr.bf16.mxu0 %v4496_v35  ;;  %vm547_vm4 = vmor %vm467_vm3, %vm531_vm2  ;;  %vm931_vm13 = vcmp.eq.s32.totalorder %v4498_v11, %v4348_v31  ;;  %vm400_vm15 = vcmp.eq.s32.totalorder %v4498_v11, %v4062_v43  ;;  %vm464_vm0 = vcmp.eq.s32.totalorder %v4498_v11, %v4070_v27 }
 0x1e8   : > { %1662 = vperm.xlu1 %3520, %v4213_v10   ;;  %v4491_v2 = vpop.permute.xlu1 %1366  ;;  %742 = vperm.xlu0 %3563, %v3770_v17   ;;  %v4494_v13 = vpop.permute.xlu0 %1926  ;;  %vm627_vm7 = vmor %vm547_vm4, %vm611_vm5  ;;  %vm544_vm1 = vcmp.eq.s32.totalorder %v4498_v11, %v4320_v6  ;;  %vm402_vm3 = vcmp.eq.s32.totalorder %v4498_v11, %v4068_v26  ;;  %vm466_vm4 = vcmp.eq.s32.totalorder %v4498_v11, %v4076_v23  ;;  %v6359_v23 = vmov 0 }
 0x1e9   : > { %6353 = vst [vmem:[#allocation136_spill] sm:$0xff] %v4491_v2  ;;  %6354 = vst [vmem:[#allocation137_spill] sm:$0xff] %v4494_v13  ;;  %3338 = vmatprep.subr.bf16.mxu1 %v4496_v35 }
 0x1ea   : > { %vm480_vm2 = vmor %vm400_vm15, %vm464_vm0  ;;  %vm626_vm0 = vcmp.eq.s32.totalorder %v4498_v11, %v4182_v51 }
 0x1eb   : > { %vm560_vm5 = vmor %vm480_vm2, %vm544_vm1 }
 0x1ec   : > { %3521 = vset.pattern.permute.xlu1 %v6277_v7  ;;  %v4509_v17 = vpop.permute.xlu1 %1372  ;;  %748 = vperm.xlu0 %3563, %v3780_v21   ;;  %v4512_v60 = vpop.permute.xlu0 %1929 }
 0x1ed   : > { %6355 = vst [vmem:[#allocation138_spill] sm:$0xff] %v4509_v17  ;;  %6356 = vst [vmem:[#allocation139_spill] sm:$0xff] %v4512_v60  ;;  %1899 = vperm.xlu1 %3521, %v3882_v53   ;;  %v6208_v53 = vmov 0.0  }
 0x1f0   : > { %v4515_v20 = vpop.permute.xlu1 %1378  ;;  %754 = vperm.xlu0 %3563, %v3790_v25  }
 0x1f1   : > { %6357 = vst [vmem:[#allocation140_spill] sm:$0xff] %v4515_v20  ;;  %3522 = vset.pattern.permute.xlu1 %v6324_v54  ;;  %v645_v37 = vpop.permute.xlu0 %644 }
 0x1f2   : > { %vm691_vm8 = vcmp.eq.s32.totalorder %v4498_v11, %v645_v37  ;;  %1665 = vperm.xlu1 %3522, %v3822_v38  }
 0x1f3   : > { %vm707_vm10 = vmor %vm627_vm7, %vm691_vm8  ;;  %vm624_vm8 = vcmp.eq.s32.totalorder %v4498_v11, %v4176_v15 }
 0x1f4   : > { %vm787_vm11 = vmor %vm707_vm10, %vm771_vm9  ;;  %760 = vperm.xlu0 %3563, %v3800_v29  }
 0x1f5   : > { %v4528_v21 = vpop.permute.xlu1 %1432  ;;  %v4530_v25 = vpop.permute.xlu0 %653  ;;  %vm867_vm12 = vmor %vm787_vm11, %vm851_vm6  ;;  %vm546_vm6 = vcmp.eq.s32.totalorder %v4498_v11, %v4326_v28 }
 0x1f6   : > { %3523 = vset.pattern.permute.xlu1 %v6302_v3  ;;  %vm947_vm14 = vmor %vm867_vm12, %vm931_vm13  ;;  %vm864_vm12 = vcmp.eq.s32.totalorder %v4498_v11, %v4436_v16  ;;  %vm784_vm13 = vcmp.eq.s32.totalorder %v4498_v11, %v4285_v1  ;;  %v6362_v1 = vmov 0 }
 0x1f7   : > { %1742 = vperm.xlu1 %3523, %v4213_v10   ;;  %v2757_v18 = vsel %vm947_vm14, 1.0, %v6208_v53  ;;  %vm482_vm7 = vmor %vm402_vm3, %vm466_vm4  ;;  %vm866_vm3 = vcmp.eq.s32.totalorder %v4498_v11, %v4448_v44 }
 0x1f8   : > { %766 = vperm.xlu0 %3563, %v3810_v33   ;;  %3049 = vmatprep.mubr.f32.mxu0 %v2757_v18  ;;  %vm640_vm9 = vmor %vm560_vm5, %vm624_vm8  ;;  %vm786_vm5 = vcmp.eq.s32.totalorder %v4498_v11, %v4291_v5 }
 0x1f9   : > { %v4538_v29 = vpop.permute.xlu1 %1438  ;;  %v4540_v63 = vpop.permute.xlu0 %659  ;;  %vm562_vm11 = vmor %vm482_vm7, %vm546_vm6 }
 0x1fa   : > { %vm642_vm4 = vmor %vm562_vm11, %vm626_vm0  ;;  %vm454_vm11 = vcmp.eq.s32.totalorder %v4498_v11, %v4040_v52  ;;  %vm394_vm0 = vcmp.eq.s32.totalorder %v4498_v11, %v4043_v47  ;;  %v6385_v52 = vmov 0  ;;  %v6428_v47 = vld [vmem:[#allocation59_spill] sm:$0xff] }
 0x1fb   : > { %1745 = vperm.xlu1 %3523, %v3822_v38  }
 0x1fc   : > { %1822 = vperm.xlu0 %3563, %v4213_v10  }
 0x1fd   : > { %v4544_v31 = vpop.permute.xlu1 %1441  ;;  %v4546_v19 = vpop.permute.xlu0 %665 }
 0x1ff   : > { %3524 = vset.pattern.permute.xlu1 %v6349_v24 }
 0x200   : > { %1825 = vperm.xlu1 %3524, %v3822_v38   ;;  %1831 = vperm.xlu0 %3563, %v3828_v40  }
 0x201   : > { %v4551_v33 = vpop.permute.xlu1 %1447  ;;  %v4553_v8 = vpop.permute.xlu0 %671 }
 0x204   : > { %3525 = vset.pattern.permute.xlu1 %v6277_v7  ;;  %1834 = vperm.xlu0 %3563, %v3894_v57  }
 0x205   : > { %1902 = vperm.xlu1 %3525, %v4213_v10   ;;  %v4564_v32 = vpop.permute.xlu1 %1453  ;;  %v4566_v61 = vpop.permute.xlu0 %677 }
 0x208   : > { %1846 = vperm.xlu0 %3563, %v3907_v62  }
 0x209   : > { %1905 = vperm.xlu1 %3525, %v3822_v38   ;;  %v4578_v27 = vpop.permute.xlu1 %1459  ;;  %v684_v43 = vpop.permute.xlu0 %683 }
 0x20a   : > { %vm704_vm10 = vcmp.eq.s32.totalorder %v4498_v11, %v684_v43 }
 0x20b   : > { %vm720_vm14 = vmor %vm640_vm9, %vm704_vm10  ;;  %vm453_vm9 = vcmp.eq.s32.totalorder %v4498_v11, %v4034_v0  ;;  %vm390_vm10 = vcmp.eq.s32.totalorder %v4498_v11, %v4031_v56  ;;  %v6387_v56 = vld [vmem:[#allocation72_spill] sm:$0xff] }
 0x20c   : > { %1855 = vperm.xlu0 %3563, %v3852_v48   ;;  %vm800_vm15 = vmor %vm720_vm14, %vm784_vm13  ;;  %vm392_vm13 = vcmp.eq.s32.totalorder %v4498_v11, %v4037_v58  ;;  %vm456_vm14 = vcmp.eq.s32.totalorder %v4498_v11, %v4046_v39  ;;  %v6375_v58 = vmov 0  ;;  %v6377_v39 = vmov 0 }
 0x20d   : > { %3526 = vset.pattern.permute.xlu1 %v6269_v59  ;;  %v4587_v38 = vpop.permute.xlu1 %1465  ;;  %v690_v15 = vpop.permute.xlu0 %689  ;;  %vm4591_vm1 = vmor %vm800_vm15, %vm864_vm12  ;;  %vm389_vm12 = vcmp.eq.s32.totalorder %v4498_v11, %v3983_v49  ;;  %v6400_v49 = vld [vmem:[#allocation29_spill] sm:$0xff] }
 0x20e   : > { %6358 = vst [vmem:[#allocation141_spill] sm:$0xff] %v4587_v38  ;;  %v6360_v23 = vsel %vm4591_vm1, 4294967295, %v6359_v23  ;;  %vm706_vm2 = vcmp.eq.s32.totalorder %v4498_v11, %v690_v15  ;;  %1982 = vperm.xlu1 %3526, %v4213_v10   ;;  %vm4682_vm15 = vmor %vm389_vm12, %vm453_vm9  ;;  %vm452_vm9 = vcmp.eq.s32.totalorder %v4498_v11, %v4118_v22 }
 0x20f   : > { %vm722_vm6 = vmor %vm642_vm4, %vm706_vm2  ;;  %vm458_vm2 = vcmp.eq.s32.totalorder %v4498_v11, %v4052_v34  ;;  %vm396_vm4 = vcmp.eq.s32.totalorder %v4498_v11, %v4050_v41  ;;  %v6381_v41 = vld [vmem:[#allocation24_spill] sm:$0xff] }
 0x210   : > { %1861 = vperm.xlu0 %3563, %v3858_v50   ;;  %vm802_vm7 = vmor %vm722_vm6, %vm786_vm5  ;;  %vm460_vm5 = vcmp.eq.s32.totalorder %v4498_v11, %v4058_v30  ;;  %vm533_vm6 = vcmp.eq.s32.totalorder %v4498_v11, %v4090_v14  ;;  %v6379_v30 = vld [vmem:[#allocation38_spill] sm:$0xff]  ;;  %v6380_v14 = vld [vmem:[#allocation56_spill] sm:$0xff] }
 0x211   : > { %v4602_v51 = vpop.permute.xlu1 %1471  ;;  %v4604_v26 = vpop.permute.xlu0 %1739  ;;  %vm4606_vm8 = vmor %vm802_vm7, %vm866_vm3  ;;  %vm462_vm12 = vcmp.eq.s32.totalorder %v4498_v11, %v6379_v30  ;;  %v6388_v30 = vmov 0 }
 0x212   : > { %6361 = vst [vmem:[#allocation142_spill] sm:$0xff] %v4602_v51  ;;  %v6363_v1 = vsel %vm4606_vm8, 4294967295, %v6362_v1  ;;  %3527 = vset.pattern.permute.xlu1 %v6302_v3  ;;  %vm4690_vm3 = vmor %vm390_vm10, %vm454_vm11  ;;  %vm398_vm11 = vcmp.eq.s32.totalorder %v4498_v11, %v4056_v36  ;;  %v6384_v36 = vld [vmem:[#allocation98_spill] sm:$0xff]  ;;  %v6408_v51 = vld [vmem:[#allocation103_spill] sm:$0xff] }
 0x213   : > { %1748 = vperm.xlu1 %3527, %v3888_v55   ;;  %vm4700_vm7 = vmor %vm392_vm13, %vm456_vm14  ;;  %vm613_vm13 = vcmp.eq.s32.totalorder %v4498_v11, %v6380_v14  ;;  %vm388_vm14 = vcmp.eq.s32.totalorder %v4498_v11, %v6381_v41  ;;  %vm534_vm8 = vcmp.eq.s32.totalorder %v4498_v11, %v6384_v36  ;;  %v6390_v14 = vld [vmem:[#allocation52_spill] sm:$0xff]  ;;  %v6392_v36 = vld [vmem:[#allocation54_spill] sm:$0xff] }
 0x214   : > { %3566 = vset.pattern.permute.xlu0 %v6269_v59  ;;  %v6376_v58 = vsel %vm4700_vm7, 4294967295, %v6375_v58  ;;  %vm4709_vm10 = vmor %vm394_vm0, %vm458_vm2 }
 0x215   : > { %v4613_v44 = vpop.permute.xlu1 %1477  ;;  %v4615_v10 = vpop.permute.xlu0 %1754  ;;  %2015 = vperm.xlu0 %3566, %v3852_v48   ;;  %v6378_v39 = vsel %vm4709_vm10, 4294967295, %v6377_v39  ;;  %vm4724_vm0 = vmor %vm396_vm4, %vm460_vm5  ;;  %vm693_vm10 = vcmp.eq.s32.totalorder %v4498_v11, %v6387_v56  ;;  %vm455_vm4 = vcmp.eq.s32.totalorder %v4498_v11, %v6390_v14  ;;  %v6395_v14 = vld [vmem:[#allocation27_spill] sm:$0xff]  ;;  %v6416_v56 = vld [vmem:[#allocation105_spill] sm:$0xff] }
 0x216   : > { %6364 = vst [vmem:[#allocation143_spill] sm:$0xff] %v4613_v44  ;;  %vm549_vm2 = vmor %vm4682_vm15, %vm533_vm6  ;;  %vm457_vm6 = vcmp.eq.s32.totalorder %v4498_v11, %v6392_v36  ;;  %v6399_v36 = vld [vmem:[#allocation101_spill] sm:$0xff] }
 0x217   : > { %1751 = vperm.xlu1 %3527, %v3828_v40   ;;  %vm4732_vm1 = vmor %vm388_vm14, %vm452_vm9 }
 0x218   : > { %v6386_v52 = vsel %vm4732_vm1, 4294967295, %v6385_v52  ;;  %vm4738_vm7 = vmor %vm398_vm11, %vm462_vm12  ;;  %vm391_vm11 = vcmp.eq.s32.totalorder %v4498_v11, %v6395_v14  ;;  %v6403_v14 = vld [vmem:[#allocation58_spill] sm:$0xff] }
 0x219   : > { %v4619_v5 = vpop.permute.xlu0 %1766  ;;  %2018 = vperm.xlu0 %3566, %v3919_v4   ;;  %v6389_v30 = vsel %vm4738_vm7, 4294967295, %v6388_v30  ;;  %vm629_vm5 = vmor %vm549_vm2, %vm613_vm13  ;;  %vm614_vm2 = vcmp.eq.s32.totalorder %v4498_v11, %v6403_v14  ;;  %vm540_vm7 = vcmp.eq.s32.totalorder %v4498_v11, %v6408_v51  ;;  %v6415_v51 = vld [vmem:[#allocation57_spill] sm:$0xff] }
 0x21a   : > { %6365 = vst [vmem:[#allocation144_spill] sm:$0xff] %v4619_v5  ;;  %v4622_v6 = vpop.permute.xlu1 %1499  ;;  %vm4752_vm9 = vmor %vm4690_vm3, %vm534_vm8  ;;  %vm538_vm8 = vcmp.eq.s32.totalorder %v4498_v11, %v6399_v36  ;;  %vm393_vm3 = vcmp.eq.s32.totalorder %v4498_v11, %v6400_v49  ;;  %v6406_v36 = vmov 0  ;;  %v6455_v5 = vld [vmem:[#allocation48_spill] sm:$0xff]  ;;  %v6507_v49 = vmov 0 }
 0x21b   : > { %3528 = vset.pattern.permute.xlu1 %v6349_v24  ;;  %vm4763_vm13 = vmor %vm629_vm5, %vm693_vm10  ;;  %vm6404_vm10 = vnez %v6376_v58  ;;  %v6411_v58 = vmov 0 }
 0x21c   : > { %1828 = vperm.xlu1 %3528, %v3888_v55   ;;  %vm4772_vm14 = vmor %vm391_vm11, %vm455_vm4 }
 0x21d   : > { %v4626_v16 = vpop.permute.xlu0 %1775  ;;  %vm4782_vm1 = vmor %vm393_vm3, %vm457_vm6  ;;  %vm6414_vm6 = vnez %v6378_v39  ;;  %v6420_v39 = vld [vmem:[#allocation33_spill] sm:$0xff] }
 0x21e   : > { %6366 = vst [vmem:[#allocation145_spill] sm:$0xff] %v4626_v16  ;;  %v4628_v28 = vpop.permute.xlu1 %1502  ;;  %v6407_v36 = vsel %vm4782_vm1, 4294967295, %v6406_v36  ;;  %vm4790_vm4 = vmor %vm4752_vm9, %vm614_vm2  ;;  %vm461_vm9 = vcmp.eq.s32.totalorder %v4498_v11, %v6415_v51  ;;  %vm542_vm2 = vcmp.eq.s32.totalorder %v4498_v11, %v6416_v56  ;;  %v6425_v56 = vld [vmem:[#allocation41_spill] sm:$0xff]  ;;  %v6460_v16 = vmov 0 }
 0x21f   : > { %vm554_vm3 = vmor %vm6414_vm6, %vm538_vm8  ;;  %vm397_vm8 = vcmp.eq.s32.totalorder %v4498_v11, %v6420_v39  ;;  %v6429_v39 = vld [vmem:[#allocation64_spill] sm:$0xff]  ;;  %v6463_v51 = vmov 0 }
 0x220   : > { %3529 = vset.pattern.permute.xlu1 %v6277_v7  ;;  %vm4833_vm1 = vmor %vm397_vm8, %vm461_vm9  ;;  %vm6433_vm9 = vnez %v6386_v52  ;;  %v6443_v52 = vmov 0 }
 0x221   : > { %1908 = vperm.xlu1 %3529, %v3888_v55  }
 0x222   : > { %v4632_v37 = vpop.permute.xlu1 %1508  ;;  %v4634_v18 = vpop.permute.xlu0 %567 }
 0x225   : > { %3530 = vset.pattern.permute.xlu1 %v6324_v54 }
 0x226   : > { %1674 = vperm.xlu1 %3530, %v3894_v57   ;;  %v4638_v43 = vpop.permute.xlu1 %1514  ;;  %v4640_v15 = vpop.permute.xlu0 %576 }
 0x22a   : > { %3531 = vset.pattern.permute.xlu1 %v6269_v59  ;;  %v4643_v53 = vpop.permute.xlu1 %1520  ;;  %v4645_v20 = vpop.permute.xlu0 %582 }
 0x22b   : > { %6367 = vst [vmem:[#allocation146_spill] sm:$0xff] %v4643_v53  ;;  %1988 = vperm.xlu1 %3531, %v3888_v55   ;;  %v6471_v53 = vld [vmem:[#allocation102_spill] sm:$0xff] }
 0x22e   : > { %v4648_v17 = vpop.permute.xlu1 %1526  ;;  %v4650_v2 = vpop.permute.xlu0 %588 }
 0x22f   : > { %6368 = vst [vmem:[#allocation147_spill] sm:$0xff] %v4648_v17  ;;  %3532 = vset.pattern.permute.xlu1 %v6324_v54  ;;  %v6419_v17 = vld [vmem:[#allocation62_spill] sm:$0xff] }
 0x230   : > { %1677 = vperm.xlu1 %3532, %v3834_v42  }
 0x232   : > { %v4654_v45 = vpop.permute.xlu1 %1532  ;;  %v4656_v44 = vpop.permute.xlu0 %594 }
 0x233   : > { %6369 = vst [vmem:[#allocation148_spill] sm:$0xff] %v4654_v45  ;;  %v6396_v45 = vld [vmem:[#allocation55_spill] sm:$0xff] }
 0x234   : > { %3533 = vset.pattern.permute.xlu1 %v6269_v59  ;;  %vm459_vm12 = vcmp.eq.s32.totalorder %v4498_v11, %v6396_v45  ;;  %v6405_v45 = vld [vmem:[#allocation31_spill] sm:$0xff] }
 0x235   : > { %1991 = vperm.xlu1 %3533, %v3828_v40   ;;  %v6391_v40 = vld [vmem:[#allocation99_spill] sm:$0xff] }
 0x236   : > { %v4660_v60 = vpop.permute.xlu1 %1538  ;;  %v4662_v38 = vpop.permute.xlu0 %600  ;;  %vm536_vm15 = vcmp.eq.s32.totalorder %v4498_v11, %v6391_v40  ;;  %v6397_v40 = vmov 0 }
 0x237   : > { %6370 = vst [vmem:[#allocation149_spill] sm:$0xff] %v4660_v60  ;;  %v6398_v40 = vsel %vm4763_vm13, 4294967295, %v6397_v40  ;;  %vm552_vm5 = vmor %vm6404_vm10, %vm536_vm15  ;;  %vm395_vm13 = vcmp.eq.s32.totalorder %v4498_v11, %v6405_v45  ;;  %v6413_v45 = vld [vmem:[#allocation60_spill] sm:$0xff] }
 0x238   : > { %vm4796_vm11 = vmor %vm395_vm13, %vm459_vm12  ;;  %vm616_vm15 = vcmp.eq.s32.totalorder %v4498_v11, %v6413_v45  ;;  %vm618_vm12 = vcmp.eq.s32.totalorder %v4498_v11, %v6419_v17  ;;  %v6421_v45 = vld [vmem:[#allocation87_spill] sm:$0xff]  ;;  %v6426_v17 = vmov 0 }
 0x239   : > { %3534 = vset.pattern.permute.xlu1 %v6302_v3  ;;  %v6412_v58 = vsel %vm4796_vm11, 4294967295, %v6411_v58  ;;  %vm4810_vm10 = vmor %vm552_vm5, %vm616_vm15  ;;  %vm532_vm11 = vcmp.eq.s32.totalorder %v4498_v11, %v6425_v56  ;;  %v6427_v17 = vsel %vm4833_vm1, 4294967295, %v6426_v17  ;;  %v6431_v56 = vmov 0 }
 0x23a   : > { %1757 = vperm.xlu1 %3534, %v3834_v42   ;;  %v4672_v55 = vpop.permute.xlu0 %606  ;;  %vm556_vm13 = vmor %vm4724_vm0, %vm540_vm7  ;;  %vm463_vm7 = vcmp.eq.s32.totalorder %v4498_v11, %v6428_v47  ;;  %vm620_vm0 = vcmp.eq.s32.totalorder %v4498_v11, %v6429_v39  ;;  %v6436_v47 = vld [vmem:[#allocation35_spill] sm:$0xff] }
 0x23b   : > { %v4680_v0 = vpop.permute.xlu1 %1576  ;;  %vm4825_vm15 = vmor %vm554_vm3, %vm618_vm12  ;;  %vm6430_vm3 = vnez %v6389_v30  ;;  %v6437_v30 = vld [vmem:[#allocation66_spill] sm:$0xff] }
 0x23c   : > { %vm558_vm12 = vmor %vm6430_vm3, %vm542_vm2  ;;  %vm399_vm2 = vcmp.eq.s32.totalorder %v4498_v11, %v6436_v47  ;;  %vm622_vm3 = vcmp.eq.s32.totalorder %v4498_v11, %v6437_v30  ;;  %v6447_v47 = vld [vmem:[#allocation44_spill] sm:$0xff]  ;;  %v6456_v30 = vld [vmem:[#allocation91_spill] sm:$0xff] }
 0x23d   : > { %vm4847_vm6 = vmor %vm556_vm13, %vm620_vm0  ;;  %vm6438_vm13 = vcmp.eq.s32.totalorder %v4498_v11, %v6421_v45  ;;  %vm6439_vm0 = vnez %v6398_v40  ;;  %v6498_v40 = vld [vmem:[#allocation95_spill] sm:$0xff] }
 0x23e   : > { %3535 = vset.pattern.permute.xlu1 %v6349_v24  ;;  %v4707_v34 = vpop.permute.xlu0 %1656  ;;  %v6432_v56 = vsel %vm4847_vm6, 4294967295, %v6431_v56  ;;  %vm4853_vm8 = vmor %vm6433_vm9, %vm532_vm11  ;;  %vm6442_vm11 = vcmp.eq.s32.totalorder %v4498_v11, %v4530_v25  ;;  %v6448_v25 = vld [vmem:[#allocation89_spill] sm:$0xff] }
 0x23f   : > { %1837 = vperm.xlu1 %3535, %v3834_v42   ;;  %v4720_v22 = vpop.permute.xlu1 %1582  ;;  %vm4867_vm5 = vmor %vm6439_vm0, %vm6438_vm13  ;;  %vm535_vm13 = vcmp.eq.s32.totalorder %v4498_v11, %v6447_v47  ;;  %v6489_v47 = vmov 0 }
 0x240   : > { %vm710_vm9 = vmor %vm4790_vm4, %vm6442_vm11  ;;  %vm774_vm4 = vcmp.eq.s32.totalorder %v4498_v11, %v6448_v25  ;;  %v6462_v25 = vld [vmem:[#allocation63_spill] sm:$0xff] }
 0x241   : > { %vm4877_vm1 = vmor %vm399_vm2, %vm463_vm7  ;;  %vm6449_vm7 = vcmp.eq.s32.totalorder %v4498_v11, %v4540_v63  ;;  %v6453_v63 = vmov 0  ;;  %vm1543_vm11 = vcmp.eq.s32.totalorder %v4498_v11, %v6462_v25  ;;  %v6470_v25 = vld [vmem:[#allocation93_spill] sm:$0xff] }
 0x242   : > { %v4746_v41 = vpop.permute.xlu0 %1668  ;;  %v6444_v52 = vsel %vm4877_vm1, 4294967295, %v6443_v52  ;;  %vm4883_vm6 = vmor %vm558_vm12, %vm622_vm3 }
 0x243   : > { %3536 = vset.pattern.permute.xlu1 %v6277_v7  ;;  %v4757_v60 = vpop.permute.xlu1 %1585  ;;  %vm712_vm2 = vmor %vm4810_vm10, %vm6449_vm7  ;;  %vm539_vm10 = vcmp.eq.s32.totalorder %v4498_v11, %v6455_v5  ;;  %vm776_vm7 = vcmp.eq.s32.totalorder %v4498_v11, %v6456_v30  ;;  %v6469_v30 = vld [vmem:[#allocation39_spill] sm:$0xff] }
 0x244   : > { %1914 = vperm.xlu1 %3536, %v3894_v57   ;;  %vm4904_vm0 = vmor %vm710_vm9, %vm774_vm4 }
 0x245   : > { %vm4912_vm1 = vmor %vm4772_vm14, %vm535_vm13  ;;  %vm6459_vm14 = vnez %v6407_v36  ;;  %v6466_v36 = vmov 0 }
 0x246   : > { %v4794_v14 = vpop.permute.xlu0 %1671  ;;  %v6454_v63 = vsel %vm4912_vm1, 4294967295, %v6453_v63  ;;  %vm4937_vm3 = vmor %vm712_vm2, %vm776_vm7  ;;  %vm778_vm2 = vcmp.eq.s32.totalorder %v4498_v11, %v6470_v25  ;;  %vm853_vm7 = vcmp.eq.s32.totalorder %v4498_v11, %v6471_v53  ;;  %v6479_v53 = vld [vmem:[#allocation109_spill] sm:$0xff]  ;;  %v6481_v25 = vmov 0 }
 0x247   : > { %v4804_v13 = vpop.permute.xlu1 %1591  ;;  %v6464_v51 = vsel %vm4937_vm3, 4294967295, %v6463_v51  ;;  %vm702_vm3 = vcmp.eq.s32.totalorder %v4498_v11, %v4566_v61  ;;  %v6518_v61 = vmov 0 }
 0x248   : > { %1917 = vperm.xlu1 %3536, %v3834_v42  }
 0x24a   : > { %v4829_v42 = vpop.permute.xlu0 %1680 }
 0x24b   : > { %6424 = vst [vmem:[#allocation38_spill] sm:$0xff] %v4829_v42  ;;  %v4843_v9 = vpop.permute.xlu1 %1597  ;;  %v6434_v42 = vmov 0 }
 0x24c   : > { %v6435_v42 = vsel %vm4853_vm8, 4294967295, %v6434_v42  ;;  %3537 = vset.pattern.permute.xlu1 %v6269_v59  ;;  %vm698_vm8 = vcmp.eq.s32.totalorder %v4498_v11, %v4546_v19  ;;  %v6450_v19 = vld [vmem:[#allocation46_spill] sm:$0xff] }
 0x24d   : > { %1994 = vperm.xlu1 %3537, %v3894_v57   ;;  %vm537_vm12 = vcmp.eq.s32.totalorder %v4498_v11, %v6450_v19  ;;  %vm4922_vm9 = vmor %vm4825_vm15, %vm698_vm8  ;;  %vm6465_vm8 = vnez %v6412_v58  ;;  %v6468_v19 = vld [vmem:[#allocation5_spill] sm:$0xff]  ;;  %v6473_v58 = vmov 0  ;;  %vm6476_vm15 = vnez %v6432_v56  ;;  %v6484_v56 = vld [vmem:[#allocation50_spill] sm:$0xff] }
 0x24e   : > { %v4887_v45 = vpop.permute.xlu0 %1683  ;;  %vm4930_vm13 = vmor %vm6459_vm14, %vm537_vm12  ;;  %vm1480_vm12 = vcmp.eq.s32.totalorder %v4498_v11, %v6469_v30  ;;  %vm6472_vm14 = vcmp.eq.s32.totalorder %v4498_v11, %v4528_v21  ;;  %v6477_v30 = vmov 0  ;;  %v6480_v21 = vld [vmem:[#allocation121_spill] sm:$0xff]  ;;  %vm6486_vm1 = vnez %v6435_v42  ;;  %v6496_v42 = vld [vmem:[#allocation3_spill] sm:$0xff] }
 0x24f   : > { %v4898_v57 = vpop.permute.xlu1 %1603  ;;  %v6461_v16 = vsel %vm4930_vm13, 4294967295, %v6460_v16  ;;  %vm4945_vm4 = vmor %vm6465_vm8, %vm539_vm10  ;;  %vm6475_vm8 = vcmp.eq.s32.totalorder %v4498_v11, %v4553_v8  ;;  %vm6485_vm13 = vcmp.eq.s32.totalorder %v4498_v11, %v4634_v18  ;;  %v6494_v18 = vmov 0 }
 0x250   : > { %v6467_v36 = vsel %vm4945_vm4, 4294967295, %v6466_v36  ;;  %vm4961_vm10 = vmor %vm6472_vm14, %vm1543_vm11  ;;  %vm854_vm11 = vcmp.eq.s32.totalorder %v4498_v11, %v6480_v21  ;;  %v6497_v21 = vld [vmem:[#allocation70_spill] sm:$0xff] }
 0x251   : > { %3538 = vset.pattern.permute.xlu1 %v6302_v3  ;;  %v6474_v58 = vsel %vm4961_vm10, 4294967295, %v6473_v58  ;;  %vm4970_vm4 = vmor %vm6476_vm15, %vm6475_vm8  ;;  %vm6483_vm15 = vcmp.eq.s32.totalorder %v4498_v11, %v4622_v6  ;;  %vm541_vm10 = vcmp.eq.s32.totalorder %v4498_v11, %v6484_v56  ;;  %v6504_v56 = vld [vmem:[#allocation51_spill] sm:$0xff]  ;;  %v6546_v6 = vld [vmem:[#allocation76_spill] sm:$0xff] }
 0x252   : > { %1760 = vperm.xlu1 %3538, %v6468_v19   ;;  %v4950_v5 = vpop.permute.xlu0 %1695  ;;  %v6478_v30 = vsel %vm4970_vm4, 4294967295, %v6477_v30  ;;  %vm4982_vm14 = vmor %vm4922_vm9, %vm778_vm2  ;;  %vm615_vm2 = vcmp.eq.s32.totalorder %v4498_v11, %v4640_v15  ;;  %v6499_v15 = vmov 0 }
 0x253   : > { %v6482_v25 = vsel %vm4982_vm14, 4294967295, %v6481_v25  ;;  %vm1560_vm8 = vmor %vm1480_vm12, %vm6483_vm15 }
 0x254   : > { %v1660_v8 = vpop.permute.xlu1 %1659  ;;  %vm4996_vm4 = vmor %vm6486_vm1, %vm6485_vm13  ;;  %vm6493_vm1 = vnez %v6427_v17 }
 0x255   : > { %vm5002_vm9 = vmor %vm4867_vm5, %vm853_vm7  ;;  %vm692_vm5 = vcmp.eq.s32.totalorder %v4498_v11, %v6497_v21  ;;  %vm617_vm7 = vcmp.eq.s32.totalorder %v4498_v11, %v4645_v20  ;;  %v6505_v21 = vld [vmem:[#allocation123_spill] sm:$0xff]  ;;  %v6509_v20 = vmov 0 }
 0x256   : > { %v6490_v47 = vsel %vm5002_vm9, 4294967295, %v6489_v47  ;;  %vm5008_vm12 = vmor %vm4883_vm6, %vm702_vm3  ;;  %1763 = vperm.xlu1 %3538, %v6496_v42   ;;  %v5021_v39 = vpop.permute.xlu0 %1698  ;;  %vm780_vm6 = vcmp.eq.s32.totalorder %v4498_v11, %v6498_v40  ;;  %v6522_v40 = vld [vmem:[#allocation74_spill] sm:$0xff] }
 0x257   : > { %vm5016_vm13 = vmor %vm6493_vm1, %vm541_vm10  ;;  %vm6501_vm10 = vcmp.eq.s32.totalorder %v4498_v11, %v6479_v53  ;;  %vm543_vm1 = vcmp.eq.s32.totalorder %v4498_v11, %v6504_v56  ;;  %v6523_v56 = vld [vmem:[#allocation97_spill] sm:$0xff]  ;;  %v6551_v53 = vmov 0 }
 0x258   : > { %v6495_v18 = vsel %vm5016_vm13, 4294967295, %v6494_v18  ;;  %vm5029_vm3 = vmor %vm4904_vm0, %vm854_vm11  ;;  %vm6506_vm0 = vnez %v6478_v30  ;;  %v6515_v30 = vmov 0 }
 0x259   : > { %v6500_v15 = vsel %vm5029_vm3, 4294967295, %v6499_v15  ;;  %vm5038_vm15 = vmor %vm1560_vm8, %vm6501_vm10  ;;  %vm619_vm3 = vcmp.eq.s32.totalorder %v4498_v11, %v4650_v2  ;;  %vm6511_vm10 = vnez %v6454_v63  ;;  %v1737_v2 = vpop.permute.xlu1 %1736  ;;  %v6521_v63 = vld [vmem:[#allocation61_spill] sm:$0xff] }
 0x25a   : > { %vm5048_vm11 = vmor %vm6506_vm0, %vm780_vm6  ;;  %vm6514_vm6 = vnez %v6444_v52  ;;  %3540 = vset.pattern.permute.xlu1 %v6349_v24  ;;  %v5083_v52 = vpop.permute.xlu0 %1701 }
 0x25b   : > { %v6508_v49 = vsel %vm5048_vm11, 4294967295, %v6507_v49  ;;  %vm5056_vm8 = vmor %vm4996_vm4, %vm692_vm5  ;;  %vm6517_vm4 = vnez %v6461_v16  ;;  %6520 = vst [vmem:[#allocation56_spill] sm:$0xff] %v5083_v52  ;;  %v6526_v16 = vmov 0  ;;  %v6529_v52 = vmov 0  ;;  %1840 = vperm.xlu1 %3540, %v6468_v19  }
 0x25c   : > { %v6510_v20 = vsel %vm5056_vm8, 4294967295, %v6509_v20  ;;  %vm5062_vm13 = vmor %vm6511_vm10, %vm615_vm2  ;;  %vm695_vm10 = vcmp.eq.s32.totalorder %v4498_v11, %v6522_v40  ;;  %vm6528_vm2 = vnez %v6467_v36  ;;  %v6531_v40 = vld [vmem:[#allocation115_spill] sm:$0xff]  ;;  %v6590_v36 = vld [vmem:[#allocation90_spill] sm:$0xff] }
 0x25d   : > { %vm5068_vm0 = vmor %vm6514_vm6, %vm543_vm1  ;;  %vm782_vm6 = vcmp.eq.s32.totalorder %v4498_v11, %v6523_v56  ;;  %vm1704_vm1 = vcmp.eq.s32.totalorder %v4498_v11, %v1660_v8  ;;  %v6539_v8 = vld [vmem:[#allocation37_spill] sm:$0xff] }
 0x25e   : > { %v6516_v30 = vsel %vm5068_vm0, 4294967295, %v6515_v30  ;;  %vm5076_vm5 = vmor %vm6517_vm4, %vm617_vm7  ;;  %vm6524_vm7 = vcmp.eq.s32.totalorder %v4498_v11, %v6505_v21  ;;  %vm6525_vm4 = vnez %v6464_v51  ;;  %v6532_v21 = vld [vmem:[#allocation125_spill] sm:$0xff]  ;;  %v6533_v51 = vmov 0 }
 0x25f   : > { %v6519_v61 = vsel %vm5076_vm5, 4294967295, %v6518_v61  ;;  %vm5096_vm9 = vmor %vm6525_vm4, %vm6524_vm7  ;;  %vm858_vm8 = vcmp.eq.s32.totalorder %v4498_v11, %v6532_v21  ;;  %vm6536_vm4 = vnez %v6474_v58  ;;  %vm1783_vm0 = vcmp.eq.s32.totalorder %v4498_v11, %v1737_v2  ;;  %v1817_v58 = vpop.permute.xlu1 %1816  ;;  %1843 = vperm.xlu1 %3540, %v6496_v42   ;;  %v728_v17 = vpop.permute.xlu0 %727  ;;  %v6580_v21 = vld [vmem:[#allocation78_spill] sm:$0xff]  ;;  %v6594_v2 = vld [vmem:[#allocation53_spill] sm:$0xff] }
 0x260   : > { %v6527_v16 = vsel %vm5096_vm9, 4294967295, %v6526_v16  ;;  %vm5102_vm11 = vmor %vm6528_vm2, %vm619_vm3  ;;  %vm621_vm3 = vcmp.eq.s32.totalorder %v4498_v11, %v4656_v44  ;;  %vm6535_vm2 = vcmp.eq.s32.totalorder %v4498_v11, %v4680_v0  ;;  %vm6541_vm5 = vcmp.eq.s32.totalorder %v4498_v11, %v6521_v63  ;;  %v6563_v63 = vld [vmem:[#allocation117_spill] sm:$0xff]  ;;  %v6584_v0 = vld [vmem:[#allocation119_spill] sm:$0xff] }
 0x261   : > { %v6530_v52 = vsel %vm5102_vm11, 4294967295, %v6529_v52  ;;  %vm5114_vm7 = vmor %vm5008_vm12, %vm782_vm6  ;;  %vm401_vm12 = vcmp.eq.s32.totalorder %v4498_v11, %v6539_v8  ;;  %vm6540_vm6 = vcmp.eq.s32.totalorder %v4498_v11, %v4707_v34  ;;  %v6542_v44 = vmov 0  ;;  %v6583_v8 = vld [vmem:[#allocation104_spill] sm:$0xff] }
 0x262   : > { %v6534_v51 = vsel %vm5114_vm7, 4294967295, %v6533_v51  ;;  %vm1639_vm9 = vmor %vm6536_vm4, %vm6535_vm2  ;;  %vm6547_vm2 = vnez %v6482_v25  ;;  %v6548_v34 = vmov 0  ;;  %v6555_v25 = vmov 0 }
 0x263   : > { %vm5128_vm11 = vmor %vm5062_vm13, %vm695_vm10  ;;  %vm697_vm10 = vcmp.eq.s32.totalorder %v4498_v11, %v6546_v6  ;;  %v1820_v56 = vpop.permute.xlu1 %1819  ;;  %3541 = vset.pattern.permute.xlu1 %v6277_v7  ;;  %v6586_v6 = vmov 0 }
 0x264   : > { %vm1719_vm7 = vmor %vm1639_vm9, %vm6540_vm6  ;;  %vm6554_vm6 = vnez %v6490_v47  ;;  %v6561_v47 = vmov 0  ;;  %1920 = vperm.xlu1 %3541, %v6468_v19  }
 0x265   : > { %vm5140_vm14 = vmor %vm401_vm12, %vm6541_vm5  ;;  %vm6550_vm5 = vnez %v6495_v18  ;;  %vm1863_vm12 = vcmp.eq.s32.totalorder %v4498_v11, %v1817_v58  ;;  %v6557_v18 = vld [vmem:[#allocation127_spill] sm:$0xff]  ;;  %v181_v58 = vld [vmem:[%s6175_s2 + $0x10] sm:$0xff] }
 0x266   : > { %v6543_v44 = vsel %vm5140_vm14, 4294967295, %v6542_v44  ;;  %vm5146_vm13 = vmor %vm5038_vm15, %vm1704_vm1  ;;  %vm6560_vm15 = vnez %v6519_v61  ;;  %v185_v61 = vld [vmem:[%s6175_s2 + $0x30] sm:$0xff] }
 0x267   : > { %vm5154_vm9 = vmor %vm6547_vm2, %vm858_vm8  ;;  %vm6553_vm8 = vcmp.eq.s32.totalorder %v4498_v11, %v6531_v40  ;;  %v194_v40 = vld [vmem:[%s6175_s2 + $0x78] sm:$0xff] }
 0x268   : > { %v6549_v34 = vsel %vm5154_vm9, 4294967295, %v6548_v34  ;;  %vm5160_vm4 = vmor %vm6550_vm5, %vm621_vm3  ;;  %vm860_vm3 = vcmp.eq.s32.totalorder %v4498_v11, %v6557_v18  ;;  %v6592_v18 = vmov 0  ;;  %3543 = vset.pattern.permute.xlu1 %v6324_v54 }
 0x269   : > { %v6552_v53 = vsel %vm5160_vm4, 4294967295, %v6551_v53  ;;  %vm1799_vm1 = vmor %vm1719_vm7, %vm1783_vm0  ;;  %vm1784_vm0 = vcmp.eq.s32.totalorder %v4498_v11, %v4604_v26  ;;  %vm772_vm7 = vcmp.eq.s32.totalorder %v4498_v11, %v728_v17  ;;  %vm6564_vm4 = vnez %v6510_v20  ;;  %v6565_v26 = vld [vmem:[#allocation100_spill] sm:$0xff]  ;;  %1686 = vperm.xlu1 %3543, %v3907_v62  }
 0x26a   : > { %vm5173_vm2 = vmor %vm6554_vm6, %vm6553_vm8  ;;  %vm934_vm8 = vcmp.eq.s32.totalorder %v4498_v11, %v6563_v63  ;;  %v6574_v20 = vmov 0  ;;  %v6598_v63 = vmov 0 }
 0x26b   : > { %v6556_v25 = vsel %vm5173_vm2, 4294967295, %v6555_v25  ;;  %vm5182_vm5 = vmor %vm1799_vm1, %vm1863_vm12  ;;  %vm852_vm1 = vcmp.eq.s32.totalorder %v4498_v11, %v6565_v26  ;;  %vm6566_vm12 = vcmp.eq.s32.totalorder %v4498_v11, %v4662_v38 }
 0x26c   : > { %vm5188_vm9 = vmor %vm6560_vm15, %vm697_vm10  ;;  %vm6567_vm10 = vnez %v6516_v30 }
 0x26d   : > { %v6562_v47 = vsel %vm5188_vm9, 4294967295, %v6561_v47  ;;  %vm788_vm2 = vmor %vm6564_vm4, %vm772_vm7  ;;  %vm6570_vm9 = vnez %v6500_v15  ;;  %vm6573_vm4 = vnez %v6508_v49  ;;  %v737_v15 = vpop.permute.xlu0 %736  ;;  %v6581_v49 = vld [vmem:[#allocation129_spill] sm:$0xff]  ;;  %3544 = vset.pattern.permute.xlu1 %v6269_v59 }
 0x26e   : > { %vm5205_vm15 = vmor %vm6567_vm10, %vm6566_vm12  ;;  %2000 = vperm.xlu1 %3544, %v6468_v19   ;;  %v6633_v19 = vld [vmem:[#allocation107_spill] sm:$0xff] }
 0x26f   : > { %vm5211_vm14 = vmor %vm6570_vm9, %vm934_vm8  ;;  %vm699_vm9 = vcmp.eq.s32.totalorder %v4498_v11, %v6580_v21  ;;  %vm6582_vm8 = vcmp.eq.s32.totalorder %v4498_v11, %v4461_v46  ;;  %v182_v46 = vld [vmem:[%s6175_s2 + $0x18] sm:$0xff]  ;;  %v6601_v21 = vmov 0.0  }
 0x270   : > { %vm5217_vm7 = vmor %vm6573_vm4, %vm860_vm3  ;;  %vm6585_vm4 = vnez %v6530_v52  ;;  %v6595_v52 = vld [vmem:[#allocation77_spill] sm:$0xff]  ;;  %v2760_v30 = vsel %vm5211_vm14, 1.0, %v6601_v21 }
 0x271   : > { %v6575_v20 = vsel %vm5217_vm7, 4294967295, %v6574_v20  ;;  %vm5221_vm6 = vmor %vm788_vm2, %vm852_vm1  ;;  %vm775_vm2 = vcmp.eq.s32.totalorder %v4498_v11, %v737_v15  ;;  %vm936_vm1 = vcmp.eq.s32.totalorder %v4498_v11, %v6584_v0  ;;  %vm545_vm7 = vcmp.eq.s32.totalorder %v4498_v11, %v6594_v2  ;;  %v743_v26 = vpop.permute.xlu0 %742  ;;  %v6600_v15 = vld [vmem:[#allocation80_spill] sm:$0xff] }
 0x272   : > { %vm5227_vm12 = vmor %vm5146_vm13, %vm1784_vm0  ;;  %vm855_vm0 = vcmp.eq.s32.totalorder %v4498_v11, %v6583_v8  ;;  %v6603_v0 = vld [vmem:[#allocation120_spill] sm:$0xff]  ;;  %vm6629_vm14 = vnez %v6575_v20  ;;  %3545 = vset.pattern.permute.xlu1 %v6324_v54 }
 0x273   : > { %vm1959_vm13 = vmor %vm5182_vm5, %vm6582_vm8 }
 0x274   : > { %vm791_vm10 = vmor %vm5128_vm11, %vm775_vm2  ;;  %vm2023_vm11 = vcmp.eq.s32.totalorder %v4498_v11, %v6590_v36  ;;  %vm6591_vm2 = vnez %v6527_v16  ;;  %v5286_v16 = vpop.permute.xlu1 %1662 }
 0x275   : > { %vm5257_vm5 = vmor %vm6585_vm4, %vm699_vm9  ;;  %vm932_vm9 = vcmp.eq.s32.totalorder %v4498_v11, %v6595_v52 }
 0x276   : > { %v6587_v6 = vsel %vm5257_vm5, 4294967295, %v6586_v6  ;;  %vm5261_vm8 = vmor %vm791_vm10, %vm855_vm0  ;;  %vm6596_vm0 = vcmp.eq.s32.totalorder %v4498_v11, %v6581_v49  ;;  %vm6597_vm10 = vnez %v6534_v51  ;;  %v5295_v51 = vpack.c.bf16 %v182_v46, %v181_v58  ;;  %v6602_v49 = vld [vmem:[#allocation106_spill] sm:$0xff]  ;;  %v183_v58 = vld [vmem:[%s6175_s2 + $0x20] sm:$0xff] }
 0x277   : > { %vm5269_vm3 = vmor %vm6591_vm2, %vm936_vm1  ;;  %vm701_vm1 = vcmp.eq.s32.totalorder %v4498_v11, %v6600_v15  ;;  %v6608_v46 = vld [vmem:[#allocation79_spill] sm:$0xff]  ;;  %v6619_v15 = vld [vmem:[#allocation81_spill] sm:$0xff] }
 0x278   : > { %v6593_v18 = vsel %vm5269_vm3, 4294967295, %v6592_v18  ;;  %vm5282_vm4 = vmor %vm6597_vm10, %vm6596_vm0  ;;  %vm777_vm3 = vcmp.eq.s32.totalorder %v4498_v11, %v743_v26  ;;  %vm6604_vm0 = vnez %v6543_v44  ;;  %v184_v44 = vld [vmem:[%s6175_s2 + $0x28] sm:$0xff]  ;;  %v1900_v17 = vpop.permute.xlu1 %1899 }
 0x279   : > { %v6599_v63 = vsel %vm5282_vm4, 4294967295, %v6598_v63  ;;  %vm2039_vm5 = vmor %vm1959_vm13, %vm2023_vm11  ;;  %vm857_vm13 = vcmp.eq.s32.totalorder %v4498_v11, %v6602_v49  ;;  %vm938_vm11 = vcmp.eq.s32.totalorder %v4498_v11, %v6603_v0  ;;  %v5360_v49 = vpack.c.bf16 %v184_v44, %v183_v58  ;;  %v6632_v44 = vld [vmem:[#allocation92_spill] sm:$0xff] }
 0x27a   : > { %v2821_v8 = vsel %vm2039_vm5, 1.0, %v6601_v21  ;;  %vm948_vm2 = vmor %vm5221_vm6, %vm932_vm9  ;;  %vm6607_vm5 = vnez %v6562_v47  ;;  %vm6615_vm6 = vnez %v6549_v34  ;;  %v187_v34 = vld [vmem:[%s6175_s2 + $0x40] sm:$0xff]  ;;  %v6651_v26 = vld [vmem:[#allocation84_spill] sm:$0xff] }
 0x27b   : > { %vm5303_vm10 = vmor %vm6604_vm0, %vm545_vm7  ;;  %3161 = vmatprep.mubr.f32.mxu1 %v2821_v8  ;;  %v2758_v38 = vsel %vm948_vm2, 1.0, %v6601_v21  ;;  %vm935_vm7 = vcmp.eq.s32.totalorder %v4498_v11, %v6608_v46  ;;  %vm6609_vm2 = vnez %v6556_v25  ;;  %v6618_v25 = vld [vmem:[#allocation82_spill] sm:$0xff]  ;;  %v6657_v47 = vld [vmem:[#allocation85_spill] sm:$0xff] }
 0x27c   : > { %vm793_vm9 = vmor %vm6607_vm5, %vm777_vm3  ;;  %3050 = vmatmul.mubr.f32.vlgmr.msra.gmra.mrb[0].mxu0 %v2758_v38  ;;  %v2759_v2 = vsel %vm6609_vm2, 1.0, %v6601_v21  ;;  %vm6612_vm3 = vnez %v6552_v53  ;;  %v749_v53 = vpop.permute.xlu0 %748  ;;  %vm6620_vm2 = vcmp.eq.s32.totalorder %v4498_v11, %v1820_v56  ;;  %v6625_v56 = vld [vmem:[#allocation122_spill] sm:$0xff]  ;;  %v6668_v0 = vld [vmem:[#allocation128_spill] sm:$0xff] }
 0x27d   : > { %vm5323_vm0 = vmor %vm793_vm9, %vm857_vm13  ;;  %vm703_vm13 = vcmp.eq.s32.totalorder %v4498_v11, %v6618_v25  ;;  %3052 = vmatprep.mubr.f32.mxu0 %v2759_v2  ;;  %3276 = vmatpush3.bf16.msra.mxu0 %v4496_v35  ;;  %v186_v38 = vld [vmem:[%s6175_s2 + $0x38] sm:$0xff]  ;;  %v6634_v2 = vld [vmem:[#allocation124_spill] sm:$0xff] }
 0x27e   : > { %vm5332_vm5 = vmor %vm6612_vm3, %vm701_vm1  ;;  %vm937_vm1 = vcmp.eq.s32.totalorder %v4498_v11, %v6619_v15  ;;  %3278 = vmatprep.subr.bf16.mxu0 %v5295_v51  ;;  %v5408_v46 = vpack.c.bf16 %v186_v38, %v185_v61  ;;  %v6648_v38 = vld [vmem:[#allocation4_spill] sm:$0xff] }
 0x27f   : > { %vm5338_vm4 = vmor %vm6615_vm6, %vm938_vm11  ;;  %vm779_vm6 = vcmp.eq.s32.totalorder %v4498_v11, %v749_v53  ;;  %v5421_v53 = vpop.permute.xlu1 %1665  ;;  %1689 = vperm.xlu1 %3545, %v6648_v38  }
 0x280   : > { %vm951_vm9 = vmor %vm5261_vm8, %vm935_vm7  ;;  %vm1944_vm7 = vcmp.eq.s32.totalorder %v4498_v11, %v1900_v17  ;;  %3053 = vmatmul.mubr.f32.gmra.mrb[2].mxu0 %v2760_v30  ;;  %v6647_v30 = vld [vmem:[#allocation108_spill] sm:$0xff]  ;;  %v2764_v52 = vsel %vm5338_vm4, 1.0, %v6601_v21  ;;  %vm705_vm4 = vcmp.eq.s32.totalorder %v4498_v11, %v6651_v26 }
 0x281   : > { %vm5353_vm11 = vmor %vm5227_vm12, %vm6620_vm2  ;;  %v2761_v8 = vsel %vm951_vm9, 1.0, %v6601_v21  ;;  %vm940_vm12 = vcmp.eq.s32.totalorder %v4498_v11, %v6625_v56  ;;  %vm2024_vm9 = vcmp.eq.s32.totalorder %v4498_v11, %v6632_v44  ;;  %3280 = vmatpush3.bf16.msra.mxu0 %v5295_v51  ;;  %v6644_v56 = vld [vmem:[#allocation83_spill] sm:$0xff]  ;;  %v189_v44 = vld [vmem:[%s6175_s2 + $0x50] sm:$0xff] }
 0x282   : > { %vm5364_vm8 = vmor %vm5205_vm15, %vm703_vm13  ;;  %vm6626_vm15 = vnez %v6587_v6  ;;  %3055 = vmatprep.mubr.f32.mxu0 %v2761_v8  ;;  %v755_v6 = vpop.permute.xlu0 %754  ;;  %3282 = vmatprep.subr.bf16.mxu0 %v5360_v49  ;;  %v188_v8 = vld [vmem:[%s6175_s2 + $0x48] sm:$0xff] }
 0x283   : > { %vm953_vm3 = vmor %vm5323_vm0, %vm937_vm1  ;;  %3546 = vset.pattern.permute.xlu1 %v6269_v59 }
 0x284   : > { %vm5385_vm13 = vmor %vm6626_vm15, %vm779_vm6  ;;  %vm859_vm6 = vcmp.eq.s32.totalorder %v4498_v11, %v6633_v19  ;;  %v2763_v20 = vsel %vm953_vm3, 1.0, %v6601_v21  ;;  %v5491_v19 = vpop.permute.xlu1 %1742  ;;  %2003 = vperm.xlu1 %3546, %v6496_v42   ;;  %v6664_v42 = vld [vmem:[#allocation126_spill] sm:$0xff] }
 0x285   : > { %vm5392_vm0 = vmor %vm6629_vm14, %vm940_vm12  ;;  %vm781_vm12 = vcmp.eq.s32.totalorder %v4498_v11, %v755_v6  ;;  %vm942_vm14 = vcmp.eq.s32.totalorder %v4498_v11, %v6634_v2  ;;  %3284 = vmatpush3.bf16.msra.mxu0 %v5360_v49  ;;  %v190_v6 = vld [vmem:[%s6175_s2 + $0x58] sm:$0xff] }
 0x286   : > { %vm1960_vm2 = vmor %vm5353_vm11, %vm1944_vm7  ;;  %vm6637_vm11 = vnez %v6593_v18  ;;  %vm6638_vm7 = vcmp.eq.s32.totalorder %v4498_v11, %v4672_v55  ;;  %v761_v36 = vpop.permute.xlu0 %760  ;;  %3286 = vmatprep.subr.bf16.mxu0 %v5408_v46  ;;  %v192_v18 = vld [vmem:[%s6175_s2 + $0x68] sm:$0xff] }
 0x287   : > { %vm2040_vm15 = vmor %vm1960_vm2, %vm2024_vm9  ;;  %v2762_v25 = vsel %vm6637_vm11, 1.0, %v6601_v21  ;;  %vm939_vm2 = vcmp.eq.s32.totalorder %v4498_v11, %v6644_v56  ;;  %vm941_vm11 = vcmp.eq.s32.totalorder %v4498_v11, %v6657_v47  ;;  %v6660_v55 = vld [vmem:[#allocation112_spill] sm:$0xff]  ;;  %v6680_v47 = vld [vmem:[#allocation7_spill] sm:$0xff] }
 0x288   : > { %vm5414_vm1 = vmor %vm5385_vm13, %vm859_vm6  ;;  %v2822_v15 = vsel %vm2040_vm15, 1.0, %v6601_v21  ;;  %3056 = vmatmul.mubr.f32.gmra.mrb[4].mxu0 %v2762_v25  ;;  %vm6641_vm13 = vnez %v6599_v63  ;;  %vm783_vm15 = vcmp.eq.s32.totalorder %v4498_v11, %v761_v36  ;;  %v5461_v63 = vpack.c.bf16 %v188_v8, %v187_v34  ;;  %v191_v8 = vld [vmem:[%s6175_s2 + $0x60] sm:$0xff]  ;;  %v5532_v58 = vpop.permute.xlu1 %1745  ;;  %v6661_v36 = vld [vmem:[#allocation86_spill] sm:$0xff]  ;;  %3547 = vset.pattern.permute.xlu1 %v6302_v3 }
 0x289   : > { %vm5435_vm3 = vmor %vm5303_vm10, %vm6638_vm7  ;;  %3162 = vmatmul.mubr.f32.vlgmr.msra.gmra.mrb[0].mxu1 %v2822_v15  ;;  %3058 = vmatprep.mubr.f32.mxu0 %v2763_v20  ;;  %v6654_v20 = vld [vmem:[#allocation110_spill] sm:$0xff]  ;;  %v5513_v15 = vpack.c.bf16 %v190_v6, %v189_v44  ;;  %v2766_v34 = vsel %vm5392_vm0, 1.0, %v6601_v21  ;;  %v6665_v44 = vld [vmem:[#allocation88_spill] sm:$0xff] }
 0x28a   : > { %vm5441_vm9 = vmor %vm6641_vm13, %vm942_vm14  ;;  %vm861_vm14 = vcmp.eq.s32.totalorder %v4498_v11, %v6647_v30  ;;  %3340 = vmatpush3.bf16.msra.mxu1 %v4496_v35  ;;  %3288 = vmatpush3.bf16.msra.mxu0 %v5408_v46  ;;  %v767_v2 = vpop.permute.xlu0 %766  ;;  %v5544_v30 = vpack.c.bf16 %v192_v18, %v191_v8  ;;  %v6667_v6 = vld [vmem:[#allocation65_spill] sm:$0xff]  ;;  %v6682_v25 = vld [vmem:[#allocation94_spill] sm:$0xff] }
 0x28b   : > { %vm5452_vm10 = vmor %vm5332_vm5, %vm781_vm12  ;;  %3342 = vmatprep.subr.bf16.mxu1 %v5295_v51  ;;  %3290 = vmatprep.subr.bf16.mxu0 %v5461_v63  ;;  %vm785_vm13 = vcmp.eq.s32.totalorder %v4498_v11, %v767_v2  ;;  %v6683_v8 = vld [vmem:[#allocation12_spill] sm:$0xff]  ;;  %v6684_v18 = vld [vmem:[#allocation11_spill] sm:$0xff] }
 0x28c   : > { %vm955_vm6 = vmor %vm5414_vm1, %vm939_vm2  ;;  %3059 = vmatmul.mubr.f32.gmra.mrb[6].mxu0 %v2764_v52  ;;  %vm865_vm2 = vcmp.eq.s32.totalorder %v4498_v11, %v6660_v55  ;;  %v2768_v52 = vsel %vm5441_vm9, 1.0, %v6601_v21  ;;  %vm6666_vm9 = vnez %v6360_v23  ;;  %1769 = vperm.xlu1 %3547, %v6648_v38   ;;  %v6686_v55 = vld [vmem:[#allocation67_spill] sm:$0xff]  ;;  %v6712_v2 = vld [vmem:[#allocation114_spill] sm:$0xff] }
 0x28d   : > { %v2765_v61 = vsel %vm955_vm6, 1.0, %v6601_v21  ;;  %vm5472_vm5 = vmor %vm5364_vm8, %vm783_vm15  ;;  %vm863_vm8 = vcmp.eq.s32.totalorder %v4498_v11, %v6654_v20  ;;  %vm944_vm15 = vcmp.eq.s32.totalorder %v4498_v11, %v6664_v42  ;;  %v6722_v42 = vld [vmem:[#allocation145_spill] sm:$0xff] }
 0x28e   : > { %vm5487_vm1 = vmor %vm5452_vm10, %vm861_vm14  ;;  %3061 = vmatprep.mubr.f32.mxu0 %v2765_v61  ;;  %3344 = vmatpush3.bf16.msra.mxu1 %v5295_v51  ;;  %vm943_vm10 = vcmp.eq.s32.totalorder %v4498_v11, %v6661_v36  ;;  %v193_v61 = vld [vmem:[%s6175_s2 + $0x70] sm:$0xff]  ;;  %v6688_v51 = vld [vmem:[#allocation16_spill] sm:$0xff] }
 0x28f   : > { %vm5499_vm12 = vmor %vm5435_vm3, %vm705_vm4  ;;  %3292 = vmatpush3.bf16.msra.mxu0 %v5461_v63  ;;  %3346 = vmatprep.subr.bf16.mxu1 %v5360_v49  ;;  %vm1482_vm4 = vcmp.eq.s32.totalorder %v4498_v11, %v4544_v31  ;;  %v5579_v26 = vpack.c.bf16 %v194_v40, %v193_v61  ;;  %v6687_v36 = vld [vmem:[#allocation13_spill] sm:$0xff]  ;;  %v6695_v40 = vld [vmem:[#allocation19_spill] sm:$0xff] }
 0x290   : > { %vm5507_vm7 = vmor %vm5472_vm5, %vm863_vm8  ;;  %3062 = vmatmul.mubr.f32.gmra.mrb[8].mxu0 %v2766_v34  ;;  %3294 = vmatprep.subr.bf16.mxu0 %v5513_v15  ;;  %vm945_vm5 = vcmp.eq.s32.totalorder %v4498_v11, %v6665_v44  ;;  %v6693_v61 = vld [vmem:[#allocation17_spill] sm:$0xff]  ;;  %v6696_v44 = vld [vmem:[#allocation22_spill] sm:$0xff] }
 0x291   : > { %vm957_vm3 = vmor %vm5487_vm1, %vm941_vm11  ;;  %vm1545_vm11 = vcmp.eq.s32.totalorder %v4498_v11, %v4628_v28  ;;  %v6675_v28 = vld [vmem:[#allocation6_spill] sm:$0xff] }
 0x292   : > { %v2767_v56 = vsel %vm957_vm3, 1.0, %v6601_v21  ;;  %vm801_vm0 = vmor %vm5499_vm12, %vm785_vm13  ;;  %3348 = vmatpush3.bf16.msra.mxu1 %v5360_v49  ;;  %v1826_v49 = vpop.permute.xlu1 %1825  ;;  %vm1546_vm12 = vcmp.eq.s32.totalorder %v4498_v11, %v6667_v6  ;;  %vm1625_vm3 = vcmp.eq.s32.totalorder %v4498_v11, %v4720_v22  ;;  %v6676_v22 = vld [vmem:[#allocation8_spill] sm:$0xff]  ;;  %v6699_v6 = vld [vmem:[#allocation21_spill] sm:$0xff] }
 0x293   : > { %3064 = vmatprep.mubr.f32.mxu0 %v2767_v56  ;;  %vm5539_vm6 = vmor %vm801_vm0, %vm865_vm2  ;;  %3296 = vmatpush3.bf16.msra.mxu0 %v5513_v15  ;;  %vm1481_vm0 = vcmp.eq.s32.totalorder %v4498_v11, %v4538_v29  ;;  %vm1626_vm2 = vcmp.eq.s32.totalorder %v4498_v11, %v4757_v60  ;;  %v6674_v60 = vmov 3  }
 0x294   : > { %vm959_vm14 = vmor %vm5507_vm7, %vm943_vm10  ;;  %3065 = vmatmul.mubr.f32.gmra.mrb[10].mxu0 %v2768_v52  ;;  %3298 = vmatprep.subr.bf16.mxu0 %v5544_v30  ;;  %vm946_vm7 = vcmp.eq.s32.totalorder %v4498_v11, %v6668_v0  ;;  %vm6671_vm10 = vnez %v6363_v1 }
 0x295   : > { %v2769_v17 = vsel %vm959_vm14, 1.0, %v6601_v21  ;;  %vm960_vm1 = vmor %vm6666_vm9, %vm944_vm15  ;;  %3350 = vmatprep.subr.bf16.mxu1 %v5408_v46  ;;  %vm1706_vm14 = vcmp.eq.s32.totalorder %v4498_v11, %v5421_v53  ;;  %3548 = vset.pattern.permute.xlu1 %v6674_v60  ;;  %v3667_v53 = vmov 1.0  }
 0x296   : > { %3067 = vmatprep.mubr.f32.mxu0 %v2769_v17  ;;  %vm961_vm8 = vmor %vm5539_vm6, %vm945_vm5  ;;  %v2770_v35 = vsel %vm960_vm1, 1.0, %v6601_v21  ;;  %3352 = vmatpush3.bf16.msra.mxu1 %v5408_v46  ;;  %v1903_v31 = vpop.permute.xlu1 %1902  ;;  %vm1785_vm1 = vcmp.eq.s32.totalorder %v4498_v11, %v5491_v19  ;;  %v1823_v46 = vpop.permute.xlu0 %1822  ;;  %v6681_v19 = vld [vmem:[#allocation9_spill] sm:$0xff]  ;;  %v6697_v17 = vld [vmem:[#allocation40_spill] sm:$0xff] }
 0x297   : > { %v2771_v23 = vsel %vm961_vm8, 1.0, %v6601_v21  ;;  %vm5586_vm13 = vmor %vm1482_vm4, %vm1546_vm12  ;;  %3300 = vmatpush3.bf16.msra.mxu0 %v5544_v30  ;;  %vm1705_vm4 = vcmp.eq.s32.totalorder %v4498_v11, %v5286_v16  ;;  %1612 = vperm.xlu1 %3548, %v6675_v28   ;;  %vm291_vm8 = vcmp.eq.s32.totalorder %v4498_v11, %v6676_v22  ;;  %v6679_v16 = vld [vmem:[#allocation10_spill] sm:$0xff] }
 0x298   : > { %3068 = vmatmul.mubr.f32.gmra.mrb[12].mxu0 %v2770_v35  ;;  %vm962_vm6 = vmor %vm6671_vm10, %vm946_vm7  ;;  %3302 = vmatprep.subr.bf16.mxu0 %v5579_v26  ;;  %vm1865_vm10 = vcmp.eq.s32.totalorder %v4498_v11, %v1823_v46  ;;  %v6700_v35 = vld [vmem:[#allocation42_spill] sm:$0xff] }
 0x299   : > { %vm1561_vm15 = vmor %vm1481_vm0, %vm1545_vm11  ;;  %3070 = vmatprep.mubr.f32.mxu0 %v2771_v23  ;;  %v2772_v1 = vsel %vm962_vm6, 1.0, %v6601_v21  ;;  %3354 = vmatprep.subr.bf16.mxu1 %v5461_v63  ;;  %vm1786_vm11 = vcmp.eq.s32.totalorder %v4498_v11, %v5532_v58  ;;  %vm292_vm0 = vcmp.eq.s32.totalorder %v4498_v11, %v6679_v16  ;;  %v6685_v58 = vld [vmem:[#allocation14_spill] sm:$0xff] }
 0x29a   : > { %vm5607_vm5 = vmor %vm1561_vm15, %vm1625_vm3  ;;  %3356 = vmatpush3.bf16.msra.mxu1 %v5461_v63  ;;  %v1906_v63 = vpop.permute.xlu1 %1905  ;;  %vm293_vm15 = vcmp.eq.s32.totalorder %v4498_v11, %v6680_v47  ;;  %v6714_v47 = vld [vmem:[#allocation38_spill] sm:$0xff] }
 0x29b   : > { %vm1642_vm9 = vmor %vm5586_vm13, %vm1626_vm2  ;;  %vm1866_vm13 = vcmp.eq.s32.totalorder %v4498_v11, %v1826_v49  ;;  %3304 = vmatpush3.bf16.msra.mxu0 %v5579_v26  ;;  %3358 = vmatprep.subr.bf16.mxu1 %v5513_v15  ;;  %vm1946_vm6 = vcmp.eq.s32.totalorder %v4498_v11, %v1906_v63  ;;  %v6698_v49 = vld [vmem:[#allocation111_spill] sm:$0xff]  ;;  %v6713_v63 = vld [vmem:[#allocation116_spill] sm:$0xff] }
 0x29c   : > { %vm1722_vm12 = vmor %vm1642_vm9, %vm1706_vm14  ;;  %3071 = vmatmul.mubr.f32.gmra.mrb[14].mxu0 %v2772_v1  ;;  %3549 = vset.pattern.permute.xlu1 %v6349_v24 }
 0x29d   : > { %vm1721_vm7 = vmor %vm5607_vm5, %vm1705_vm4  ;;  %3105 = vmatprep.mubr.msk.f32.mxu0 %vm291_vm8, %v3667_v53  ;;  %vm1945_vm5 = vcmp.eq.s32.totalorder %v4498_v11, %v1903_v31  ;;  %1849 = vperm.xlu1 %3549, %v6648_v38   ;;  %vm2026_vm8 = vcmp.eq.s32.totalorder %v4498_v11, %v6682_v25 }
 0x29e   : > { %vm5638_vm3 = vmor %vm1721_vm7, %vm1785_vm1  ;;  %3360 = vmatpush3.bf16.msra.mxu1 %v5513_v15  ;;  %vm294_vm1 = vcmp.eq.s32.totalorder %v4498_v11, %v6681_v19  ;;  %v1983_v34 = vpop.permute.xlu1 %1982 }
 0x29f   : > { %vm1802_vm2 = vmor %vm1722_vm12, %vm1786_vm11  ;;  %3362 = vmatprep.subr.bf16.mxu1 %v5544_v30  ;;  %vm295_vm11 = vcmp.eq.s32.totalorder %v4498_v11, %v6683_v8  ;;  %v6716_v8 = vld [vmem:[#allocation137_spill] sm:$0xff] }
 0x2a0   : > { %vm1882_vm14 = vmor %vm1802_vm2, %vm1866_vm13  ;;  %3106 = vmatmul.mubr.msk.f32.vlgmr.msra.gmra.mrb[0].mxu0 %vm292_vm0, %v3667_v53  ;;  %vm2025_vm13 = vcmp.eq.s32.totalorder %v4498_v11, %v1983_v34  ;;  %vm1484_vm0 = vcmp.eq.s32.totalorder %v4498_v11, %v4551_v33  ;;  %vm296_vm2 = vcmp.eq.s32.totalorder %v4498_v11, %v6684_v18  ;;  %v6715_v34 = vld [vmem:[#allocation144_spill] sm:$0xff] }
 0x2a1   : > { %3108 = vmatprep.mubr.msk.f32.mxu0 %vm293_vm15, %v3667_v53  ;;  %vm1962_vm4 = vmor %vm1882_vm14, %vm1946_vm6  ;;  %3550 = vset.pattern.permute.xlu1 %v6674_v60  ;;  %vm297_vm6 = vcmp.eq.s32.totalorder %v4498_v11, %v6685_v58  ;;  %vm1548_vm15 = vcmp.eq.s32.totalorder %v4498_v11, %v6686_v55 }
 0x2a2   : > { %vm1881_vm9 = vmor %vm5638_vm3, %vm1865_vm10  ;;  %1615 = vperm.xlu1 %3550, %v3852_v48   ;;  %3364 = vmatpush3.bf16.msra.mxu1 %v5544_v30  ;;  %vm1628_vm10 = vcmp.eq.s32.totalorder %v4498_v11, %v4804_v13  ;;  %v1749_v33 = vpop.permute.xlu1 %1748  ;;  %v1832_v13 = vpop.permute.xlu0 %1831 }
 0x2a3   : > { %vm1961_vm12 = vmor %vm1881_vm9, %vm1945_vm5  ;;  %3366 = vmatprep.subr.bf16.mxu1 %v5579_v26  ;;  %vm1708_vm5 = vcmp.eq.s32.totalorder %v4498_v11, %v4794_v14  ;;  %vm298_vm9 = vcmp.eq.s32.totalorder %v4498_v11, %v6687_v36  ;;  %v6690_v14 = vld [vmem:[#allocation18_spill] sm:$0xff] }
 0x2a4   : > { %vm2042_vm7 = vmor %vm1962_vm4, %vm2026_vm8  ;;  %3109 = vmatmul.mubr.msk.f32.gmra.mrb[2].mxu0 %vm294_vm1, %v3667_v53  ;;  %vm299_vm1 = vcmp.eq.s32.totalorder %v4498_v11, %v6688_v51  ;;  %vm1868_vm8 = vcmp.eq.s32.totalorder %v4498_v11, %v1832_v13 }
 0x2a5   : > { %3111 = vmatprep.mubr.msk.f32.mxu0 %vm295_vm11, %v3667_v53  ;;  %vm2041_vm3 = vmor %vm1961_vm12, %vm2025_vm13  ;;  %v2824_v56 = vsel %vm2042_vm7, 1.0, %v6601_v21 }
 0x2a6   : > { %v2823_v15 = vsel %vm2041_vm3, 1.0, %v6601_v21  ;;  %vm1564_vm14 = vmor %vm1484_vm0, %vm1548_vm15  ;;  %3551 = vset.pattern.permute.xlu1 %v6324_v54  ;;  %3368 = vmatpush3.bf16.msra.mxu1 %v5579_v26  ;;  %v1752_v30 = vpop.permute.xlu1 %1751  ;;  %v6689_v54 = vld [vmem:[#allocation15_spill] sm:$0xff]  ;;  %vm1948_vm3 = vcmp.eq.s32.totalorder %v4498_v11, %v4469_v12  ;;  %v6694_v12 = vld [vmem:[#allocation20_spill] sm:$0xff]  ;;  %v1835_v31 = vpop.permute.xlu0 %1834 }
 0x2a7   : > { %3164 = vmatprep.mubr.f32.mxu1 %v2823_v15  ;;  %vm1644_vm4 = vmor %vm1564_vm14, %vm1628_vm10  ;;  %1692 = vperm.xlu1 %3551, %v6675_v28   ;;  %vm1788_vm11 = vcmp.eq.s32.totalorder %v4498_v11, %v1752_v30  ;;  %vm300_vm13 = vcmp.eq.s32.totalorder %v4498_v11, %v6689_v54  ;;  %vm303_vm15 = vcmp.eq.s32.totalorder %v4498_v11, %v6694_v12  ;;  %v6720_v30 = vld [vmem:[#allocation142_spill] sm:$0xff]  ;;  %v6721_v54 = vld [vmem:[#allocation73_spill] sm:$0xff] }
 0x2a8   : > { %3112 = vmatmul.mubr.msk.f32.gmra.mrb[4].mxu0 %vm296_vm2, %v3667_v53  ;;  %3165 = vmatmul.mubr.f32.gmra.mrb[2].mxu1 %v2824_v56  ;;  %vm1724_vm12 = vmor %vm1644_vm4, %vm1708_vm5  ;;  %vm301_vm2 = vcmp.eq.s32.totalorder %v4498_v11, %v6690_v14  ;;  %vm304_vm14 = vcmp.eq.s32.totalorder %v4498_v11, %v6695_v40  ;;  %vm1547_vm5 = vcmp.eq.s32.totalorder %v4498_v11, %v4632_v37  ;;  %v6725_v12 = vld [vmem:[#allocation141_spill] sm:$0xff] }
 0x2a9   : > { %3114 = vmatprep.mubr.msk.f32.mxu0 %vm297_vm6, %v3667_v53  ;;  %vm1804_vm7 = vmor %vm1724_vm12, %vm1788_vm11  ;;  %vm302_vm6 = vcmp.eq.s32.totalorder %v4498_v11, %v6693_v61  ;;  %vm305_vm4 = vcmp.eq.s32.totalorder %v4498_v11, %v6696_v44  ;;  %vm306_vm12 = vcmp.eq.s32.totalorder %v4498_v11, %v6699_v6  ;;  %vm1707_vm11 = vcmp.eq.s32.totalorder %v4498_v11, %v4746_v41 }
 0x2aa   : > { %vm1884_vm0 = vmor %vm1804_vm7, %vm1868_vm8  ;;  %v1829_v52 = vpop.permute.xlu1 %1828  ;;  %vm1787_vm7 = vcmp.eq.s32.totalorder %v4498_v11, %v1749_v33  ;;  %v1847_v19 = vpop.permute.xlu0 %1846 }
 0x2ab   : > { %3553 = vset.pattern.permute.xlu1 %v6269_v59  ;;  %vm5707_vm10 = vmor %vm1884_vm0, %vm1948_vm3  ;;  %vm1867_vm3 = vcmp.eq.s32.totalorder %v4498_v11, %v1829_v52 }
 0x2ac   : > { %3115 = vmatmul.mubr.msk.f32.gmra.mrb[6].mxu0 %vm298_vm9, %v3667_v53  ;;  %2006 = vperm.xlu1 %3553, %v3907_v62   ;;  %vm1483_vm9 = vcmp.eq.s32.totalorder %v4498_v11, %v6697_v17 }
 0x2ad   : > { %3117 = vmatprep.mubr.msk.f32.mxu0 %vm299_vm1, %v3667_v53  ;;  %vm1627_vm1 = vcmp.eq.s32.totalorder %v4498_v11, %v6698_v49  ;;  %vm1563_vm8 = vmor %vm1483_vm9, %vm1547_vm5  ;;  %v6728_v49 = vld [vmem:[#allocation139_spill] sm:$0xff] }
 0x2ae   : > { %v1909_v62 = vpop.permute.xlu1 %1908 }
 0x2b0   : > { %3118 = vmatmul.mubr.msk.f32.gmra.mrb[8].mxu0 %vm300_vm13, %v3667_v53  ;;  %3554 = vset.pattern.permute.xlu1 %v6302_v3  ;;  %vm1643_vm13 = vmor %vm1563_vm8, %vm1627_vm1  ;;  %vm1549_vm8 = vcmp.eq.s32.totalorder %v4498_v11, %v4638_v43 }
 0x2b1   : > { %3120 = vmatprep.mubr.msk.f32.mxu0 %vm301_vm2, %v3667_v53  ;;  %1772 = vperm.xlu1 %3554, %v6675_v28   ;;  %vm1723_vm0 = vmor %vm1643_vm13, %vm1707_vm11  ;;  %vm1947_vm2 = vcmp.eq.s32.totalorder %v4498_v11, %v1909_v62  ;;  %vm1486_vm13 = vcmp.eq.s32.totalorder %v4498_v11, %v4564_v32  ;;  %v6726_v62 = vld [vmem:[#allocation71_spill] sm:$0xff] }
 0x2b2   : > { %v1675_v37 = vpop.permute.xlu1 %1674 }
 0x2b4   : > { %3121 = vmatmul.mubr.msk.f32.gmra.mrb[10].mxu0 %vm302_vm6, %v3667_v53  ;;  %vm1803_vm6 = vmor %vm1723_vm0, %vm1787_vm7  ;;  %vm1709_vm7 = vcmp.eq.s32.totalorder %v4498_v11, %v1675_v37 }
 0x2b5   : > { %3123 = vmatprep.mubr.msk.f32.mxu0 %vm303_vm15, %v3667_v53  ;;  %3555 = vset.pattern.permute.xlu1 %v6269_v59  ;;  %vm1883_vm15 = vmor %vm1803_vm6, %vm1867_vm3  ;;  %vm1630_vm3 = vcmp.eq.s32.totalorder %v4498_v11, %v4843_v9  ;;  %vm1789_vm6 = vcmp.eq.s32.totalorder %v4498_v11, %v4615_v10 }
 0x2b6   : > { %2009 = vperm.xlu1 %3555, %v6648_v38   ;;  %v1989_v38 = vpop.permute.xlu1 %1988 }
 0x2b7   : > { %vm2027_vm5 = vcmp.eq.s32.totalorder %v4498_v11, %v1989_v38 }
 0x2b8   : > { %3124 = vmatmul.mubr.msk.f32.gmra.mrb[12].mxu0 %vm304_vm14, %v3667_v53  ;;  %vm1963_vm14 = vmor %vm1883_vm15, %vm1947_vm2 }
 0x2b9   : > { %3126 = vmatprep.mubr.msk.f32.mxu0 %vm305_vm4, %v3667_v53  ;;  %vm2043_vm4 = vmor %vm1963_vm14, %vm2027_vm5 }
 0x2ba   : > { %3557 = vset.pattern.permute.xlu1 %v6349_v24  ;;  %v2825_v41 = vsel %vm2043_vm4, 1.0, %v6601_v21  ;;  %v1678_v23 = vpop.permute.xlu1 %1677 }
 0x2bb   : > { %1852 = vperm.xlu1 %3557, %v6675_v28   ;;  %3167 = vmatprep.mubr.f32.mxu1 %v2825_v41  ;;  %vm1710_vm5 = vcmp.eq.s32.totalorder %v4498_v11, %v1678_v23 }
 0x2bc   : > { %3127 = vmatmul.mubr.msk.f32.gmra.mrb[14].mxu0 %vm306_vm12, %v3667_v53  ;;  %vm1485_vm12 = vcmp.eq.s32.totalorder %v4498_v11, %v6700_v35 }
 0x2bd   : > { %vm1565_vm11 = vmor %vm1485_vm12, %vm1549_vm8 }
 0x2be   : > { %v1992_v26 = vpop.permute.xlu1 %1991 }
 0x2bf   : > { %3558 = vset.pattern.permute.xlu1 %v6674_v60  ;;  %vm2028_vm9 = vcmp.eq.s32.totalorder %v4498_v11, %v1992_v26  ;;  %v1856_v26 = vpop.permute.xlu0 %1855 }
 0x2c0   : > { %1618 = vperm.xlu1 %3558, %v3919_v4   ;;  %vm2044_vm1 = vmor %vm5707_vm10, %vm2028_vm9 }
 0x2c1   : > { %v2826_v0 = vsel %vm2044_vm1, 1.0, %v6601_v21 }
 0x2c2   : > { %3168 = vmatmul.mubr.f32.gmra.mrb[4].mxu1 %v2826_v0  ;;  %v1758_v20 = vpop.permute.xlu1 %1757  ;;  %v6729_v0 = vld [vmem:[#allocation148_spill] sm:$0xff] }
 0x2c3   : > { %vm1790_vm9 = vcmp.eq.s32.totalorder %v4498_v11, %v1758_v20  ;;  %v5878_v35 = vpop.permute.xlu0 %1861 }
 0x2c4   : > { %3559 = vset.pattern.permute.xlu1 %v6277_v7 }
 0x2c5   : > { %1932 = vperm.xlu1 %3559, %v6675_v28  }
 0x2c6   : > { %v1838_v29 = vpop.permute.xlu1 %1837 }
 0x2c7   : > { %vm1870_vm8 = vcmp.eq.s32.totalorder %v4498_v11, %v1838_v29  ;;  %v6730_v29 = vld [vmem:[#allocation47_spill] sm:$0xff] }
 0x2c9   : > { %3560 = vset.pattern.permute.xlu1 %v6674_v60  ;;  %v6701_v60 = vld [vmem:[#allocation113_spill] sm:$0xff] }
 0x2ca   : > { %1621 = vperm.xlu1 %3560, %v3858_v50   ;;  %vm1629_vm10 = vcmp.eq.s32.totalorder %v4498_v11, %v6701_v60  ;;  %v1915_v43 = vpop.permute.xlu1 %1914 }
 0x2cb   : > { %vm1645_vm0 = vmor %vm1565_vm11, %vm1629_vm10  ;;  %vm1869_vm10 = vcmp.eq.s32.totalorder %v4498_v11, %v1835_v31 }
 0x2cc   : > { %vm1725_vm15 = vmor %vm1645_vm0, %vm1709_vm7  ;;  %vm1949_vm0 = vcmp.eq.s32.totalorder %v4498_v11, %v1915_v43 }
 0x2cd   : > { %vm1805_vm1 = vmor %vm1725_vm15, %vm1789_vm6 }
 0x2ce   : > { %3561 = vset.pattern.permute.xlu1 %v6277_v7  ;;  %v1918_v9 = vpop.permute.xlu1 %1917 }
 0x2cf   : > { %1935 = vperm.xlu1 %3561, %v3852_v48   ;;  %v6702_v48 = vld [vmem:[#allocation68_spill] sm:$0xff]  ;;  %vm1950_vm7 = vcmp.eq.s32.totalorder %v4498_v11, %v1918_v9 }
 0x2d0   : > { %vm1550_vm2 = vcmp.eq.s32.totalorder %v4498_v11, %v6702_v48  ;;  %v2016_v48 = vpop.permute.xlu0 %2015 }
 0x2d1   : > { %vm1566_vm14 = vmor %vm1486_vm13, %vm1550_vm2 }
 0x2d2   : > { %vm1646_vm4 = vmor %vm1566_vm14, %vm1630_vm3  ;;  %v1995_v32 = vpop.permute.xlu1 %1994 }
 0x2d3   : > { %3562 = vset.pattern.permute.xlu1 %v6269_v59  ;;  %vm1726_vm12 = vmor %vm1646_vm4, %vm1710_vm5  ;;  %vm2029_vm5 = vcmp.eq.s32.totalorder %v4498_v11, %v1995_v32 }
 0x2d4   : > { %2012 = vperm.xlu1 %3562, %v6675_v28   ;;  %vm1806_vm11 = vmor %vm1726_vm12, %vm1790_vm9  ;;  %vm1488_vm9 = vcmp.eq.s32.totalorder %v4498_v11, %v4578_v27  ;;  %v6706_v27 = vld [vmem:[#allocation135_spill] sm:$0xff] }
 0x2d5   : > { %vm1886_vm13 = vmor %vm1806_vm11, %vm1870_vm8  ;;  %vm1712_vm11 = vcmp.eq.s32.totalorder %v4498_v11, %v4887_v45  ;;  %v6708_v45 = vld [vmem:[#allocation43_spill] sm:$0xff] }
 0x2d6   : > { %vm1966_vm3 = vmor %vm1886_vm13, %vm1950_vm7  ;;  %v1761_v28 = vpop.permute.xlu1 %1760 }
 0x2d7   : > { %vm1885_vm2 = vmor %vm1805_vm1, %vm1869_vm10  ;;  %vm1632_vm1 = vcmp.eq.s32.totalorder %v4498_v11, %v4898_v57  ;;  %v6707_v57 = vld [vmem:[#allocation147_spill] sm:$0xff] }
 0x2d8   : > { %3564 = vset.pattern.permute.xlu1 %v6302_v3  ;;  %v6703_v3 = vld [vmem:[#allocation96_spill] sm:$0xff]  ;;  %vm1965_vm15 = vmor %vm1885_vm2, %vm1949_vm0 }
 0x2d9   : > { %1778 = vperm.xlu1 %3564, %v3919_v4   ;;  %vm2030_vm6 = vcmp.eq.s32.totalorder %v4498_v11, %v6703_v3  ;;  %vm2045_vm4 = vmor %vm1965_vm15, %vm2029_vm5  ;;  %vm1553_vm15 = vcmp.eq.s32.totalorder %v4498_v11, %v6707_v57  ;;  %vm1487_vm5 = vcmp.eq.s32.totalorder %v4498_v11, %v6708_v45 }
 0x2da   : > { %vm2046_vm14 = vmor %vm1966_vm3, %vm2030_vm6  ;;  %v2827_v10 = vsel %vm2045_vm4, 1.0, %v6601_v21  ;;  %v1764_v22 = vpop.permute.xlu1 %1763  ;;  %vm1952_vm6 = vcmp.eq.s32.totalorder %v4498_v11, %v6706_v27 }
 0x2db   : > { %3170 = vmatprep.mubr.f32.mxu1 %v2827_v10  ;;  %v2828_v1 = vsel %vm2046_vm14, 1.0, %v6601_v21  ;;  %vm1792_vm7 = vcmp.eq.s32.totalorder %v4498_v11, %v1764_v22  ;;  %v6731_v10 = vld [vmem:[#allocation149_spill] sm:$0xff] }
 0x2dc   : > { %3171 = vmatmul.mubr.f32.gmra.mrb[6].mxu1 %v2828_v1  ;;  %v6732_v1 = vld [vmem:[#allocation49_spill] sm:$0xff] }
 0x2dd   : > { %1781 = vperm.xlu1 %3564, %v3858_v50  }
 0x2de   : > { %v1841_v46 = vpop.permute.xlu1 %1840 }
 0x2e1   : > { %3565 = vset.pattern.permute.xlu1 %v6349_v24  ;;  %v6704_v24 = vld [vmem:[#allocation69_spill] sm:$0xff] }
 0x2e2   : > { %1858 = vperm.xlu1 %3565, %v3919_v4   ;;  %vm1552_vm8 = vcmp.eq.s32.totalorder %v4498_v11, %v6704_v24  ;;  %v6734_v24 = vld [vmem:[#allocation75_spill] sm:$0xff] }
 0x2e3   : > { %vm1568_vm12 = vmor %vm1488_vm9, %vm1552_vm8 }
 0x2e4   : > { %vm1648_vm10 = vmor %vm1568_vm12, %vm1632_vm1  ;;  %vm1631_vm1 = vcmp.eq.s32.totalorder %v4498_v11, %v6712_v2  ;;  %vm1633_vm12 = vcmp.eq.s32.totalorder %v4498_v11, %v6713_v63  ;;  %v6736_v2 = vld [vmem:[#allocation23_spill] sm:$0xff] }
 0x2e5   : > { %vm1728_vm13 = vmor %vm1648_vm10, %vm1712_vm11  ;;  %vm1711_vm11 = vcmp.eq.s32.totalorder %v4498_v11, %v6714_v47  ;;  %v6737_v47 = vld [vmem:[#allocation130_spill] sm:$0xff] }
 0x2e6   : > { %3567 = vset.pattern.permute.xlu1 %v6277_v7  ;;  %v6705_v7 = vld [vmem:[#allocation146_spill] sm:$0xff]  ;;  %vm1808_vm3 = vmor %vm1728_vm13, %vm1792_vm7  ;;  %vm1791_vm13 = vcmp.eq.s32.totalorder %v4498_v11, %v1761_v28  ;;  %v6733_v28 = vld [vmem:[#allocation143_spill] sm:$0xff] }
 0x2e7   : > { %1938 = vperm.xlu1 %3567, %v3919_v4   ;;  %v1844_v4 = vpop.permute.xlu1 %1843  ;;  %vm1551_vm0 = vcmp.eq.s32.totalorder %v4498_v11, %v6705_v7 }
 0x2e8   : > { %vm1872_vm2 = vcmp.eq.s32.totalorder %v4498_v11, %v1844_v4  ;;  %vm1567_vm8 = vmor %vm1487_vm5, %vm1551_vm0  ;;  %vm1873_vm5 = vcmp.eq.s32.totalorder %v4498_v11, %v1847_v19  ;;  %v6738_v19 = vld [vmem:[#allocation131_spill] sm:$0xff] }
 0x2e9   : > { %vm1888_vm14 = vmor %vm1808_vm3, %vm1872_vm2  ;;  %vm1871_vm3 = vcmp.eq.s32.totalorder %v4498_v11, %v1841_v46  ;;  %v2019_v46 = vpop.permute.xlu0 %2018 }
 0x2ea   : > { %vm5814_vm4 = vmor %vm1888_vm14, %vm1952_vm6 }
 0x2eb   : > { %1941 = vperm.xlu1 %3567, %v3858_v50   ;;  %v1921_v16 = vpop.permute.xlu1 %1920  ;;  %vm1647_vm7 = vmor %vm1567_vm8, %vm1631_vm1 }
 0x2ec   : > { %vm1727_vm6 = vmor %vm1647_vm7, %vm1711_vm11  ;;  %vm1951_vm1 = vcmp.eq.s32.totalorder %v4498_v11, %v1921_v16 }
 0x2ed   : > { %vm1807_vm14 = vmor %vm1727_vm6, %vm1791_vm13 }
 0x2ef   : > { %3568 = vset.pattern.permute.xlu1 %v6269_v59  ;;  %v6711_v59 = vld [vmem:[#allocation45_spill] sm:$0xff]  ;;  %v1687_v25 = vpop.permute.xlu1 %1686 }
 0x2f0   : > { %2021 = vperm.xlu1 %3568, %v3858_v50   ;;  %v6709_v50 = vmov 0  ;;  %vm1489_vm9 = vcmp.eq.s32.totalorder %v4498_v11, %v6711_v59  ;;  %vm1713_vm0 = vcmp.eq.s32.totalorder %v4498_v11, %v1687_v25 }
 0x2f1   : > { %v6710_v50 = vsel %vm5814_vm4, 4294967295, %v6709_v50  ;;  %vm1569_vm10 = vmor %vm1489_vm9, %vm1553_vm15  ;;  %vm1793_vm15 = vcmp.eq.s32.totalorder %v4498_v11, %v6715_v34  ;;  %v6739_v34 = vld [vmem:[#allocation25_spill] sm:$0xff] }
 0x2f2   : > { %vm1649_vm2 = vmor %vm1569_vm10, %vm1633_vm12  ;;  %vm1953_vm10 = vcmp.eq.s32.totalorder %v4498_v11, %v6716_v8  ;;  %vm6719_vm6 = vnez %v6710_v50  ;;  %v6740_v8 = vld [vmem:[#allocation132_spill] sm:$0xff] }
 0x2f3   : > { %vm1887_vm4 = vmor %vm1807_vm14, %vm1871_vm3  ;;  %v2001_v15 = vpop.permute.xlu1 %2000 }
 0x2f4   : > { %vm1729_vm9 = vmor %vm1649_vm2, %vm1713_vm0  ;;  %vm2031_vm13 = vcmp.eq.s32.totalorder %v4498_v11, %v2001_v15  ;;  %vm1556_vm0 = vcmp.eq.s32.totalorder %v4498_v11, %v6721_v54  ;;  %v6745_v54 = vld [vmem:[#allocation30_spill] sm:$0xff] }
 0x2f5   : > { %vm1809_vm8 = vmor %vm1729_vm9, %vm1793_vm15  ;;  %vm1716_vm9 = vcmp.eq.s32.totalorder %v4498_v11, %v4950_v5  ;;  %v6727_v5 = vld [vmem:[#allocation118_spill] sm:$0xff] }
 0x2f6   : > { %vm1889_vm12 = vmor %vm1809_vm8, %vm1873_vm5  ;;  %vm1796_vm8 = vcmp.eq.s32.totalorder %v4498_v11, %v6722_v42 }
 0x2f7   : > { %vm5835_vm11 = vmor %vm1889_vm12, %vm1953_vm10 }
 0x2f8   : > { %vm1967_vm7 = vmor %vm1887_vm4, %vm1951_vm1  ;;  %vm1492_vm4 = vcmp.eq.s32.totalorder %v4498_v11, %v6720_v30 }
 0x2f9   : > { %vm2047_vm3 = vmor %vm1967_vm7, %vm2031_vm13  ;;  %vm1490_vm7 = vcmp.eq.s32.totalorder %v4498_v11, %v6725_v12  ;;  %vm1554_vm13 = vcmp.eq.s32.totalorder %v4498_v11, %v6726_v62  ;;  %v6748_v12 = vld [vmem:[#allocation138_spill] sm:$0xff] }
 0x2fa   : > { %v2829_v56 = vsel %vm2047_vm3, 1.0, %v6601_v21  ;;  %vm1572_vm5 = vmor %vm1492_vm4, %vm1556_vm0 }
 0x2fb   : > { %3173 = vmatprep.mubr.f32.mxu1 %v2829_v56  ;;  %vm1570_vm3 = vmor %vm1490_vm7, %vm1554_vm13  ;;  %v6741_v56 = vld [vmem:[#allocation26_spill] sm:$0xff] }
 0x2fe   : > { %v1690_v58 = vpop.permute.xlu1 %1689 }
 0x2ff   : > { %vm1714_vm4 = vcmp.eq.s32.totalorder %v4498_v11, %v1690_v58  ;;  %v6742_v58 = vld [vmem:[#allocation133_spill] sm:$0xff] }
 0x303   : > { %v2004_v55 = vpop.permute.xlu1 %2003 }
 0x304   : > { %vm2032_vm2 = vcmp.eq.s32.totalorder %v4498_v11, %v2004_v55 }
 0x305   : > { %vm2048_vm14 = vmor %vm6719_vm6, %vm2032_vm2  ;;  %vm1634_vm6 = vcmp.eq.s32.totalorder %v4498_v11, %v6727_v5  ;;  %v6749_v5 = vld [vmem:[#allocation34_spill] sm:$0xff] }
 0x306   : > { %v2830_v33 = vsel %vm2048_vm14, 1.0, %v6601_v21 }
 0x307   : > { %3174 = vmatmul.mubr.f32.gmra.mrb[8].mxu1 %v2830_v33 }
 0x30b   : > { %v1770_v13 = vpop.permute.xlu1 %1769 }
 0x30c   : > { %vm1794_vm0 = vcmp.eq.s32.totalorder %v4498_v11, %v1770_v13  ;;  %v6743_v13 = vld [vmem:[#allocation28_spill] sm:$0xff] }
 0x316   : > { %v1613_v36 = vpop.permute.xlu1 %1612 }
 0x31c   : > { %v1850_v51 = vpop.permute.xlu1 %1849 }
 0x321   : > { %v1616_v14 = vpop.permute.xlu1 %1615 }
 0x322   : > { %vm1636_vm15 = vcmp.eq.s32.totalorder %v4498_v11, %v1616_v14  ;;  %v6746_v14 = vld [vmem:[#allocation136_spill] sm:$0xff] }
 0x323   : > { %vm1652_vm1 = vmor %vm1572_vm5, %vm1636_vm15  ;;  %vm1874_vm15 = vcmp.eq.s32.totalorder %v4498_v11, %v1850_v51 }
 0x324   : > { %vm1732_vm10 = vmor %vm1652_vm1, %vm1716_vm9 }
 0x325   : > { %vm5854_vm12 = vmor %vm1732_vm10, %vm1796_vm8  ;;  %vm1954_vm10 = vcmp.eq.s32.totalorder %v4498_v11, %v6728_v49 }
 0x326   : > { %v1693_v61 = vpop.permute.xlu1 %1692  ;;  %vm1650_vm5 = vmor %vm1570_vm3, %vm1634_vm6  ;;  %vm1555_vm3 = vcmp.eq.s32.totalorder %v4498_v11, %v6729_v0  ;;  %vm1491_vm6 = vcmp.eq.s32.totalorder %v4498_v11, %v6730_v29 }
 0x327   : > { %vm1730_vm9 = vmor %vm1650_vm5, %vm1714_vm4 }
 0x328   : > { %vm1810_vm1 = vmor %vm1730_vm9, %vm1794_vm0  ;;  %vm1715_vm0 = vcmp.eq.s32.totalorder %v4498_v11, %v1693_v61  ;;  %v6747_v61 = vld [vmem:[#allocation32_spill] sm:$0xff] }
 0x329   : > { %vm1890_vm8 = vmor %vm1810_vm1, %vm1874_vm15 }
 0x32a   : > { %vm1970_vm7 = vmor %vm1890_vm8, %vm1954_vm10 }
 0x32b   : > { %v2007_v40 = vpop.permute.xlu1 %2006  ;;  %vm1571_vm4 = vmor %vm1491_vm6, %vm1555_vm3  ;;  %vm2036_vm3 = vcmp.eq.s32.totalorder %v4498_v11, %v2016_v48 }
 0x32c   : > { %vm2033_vm2 = vcmp.eq.s32.totalorder %v4498_v11, %v2007_v40 }
 0x32d   : > { %vm2049_vm14 = vmor %vm5835_vm11, %vm2033_vm2  ;;  %vm1635_vm2 = vcmp.eq.s32.totalorder %v4498_v11, %v1613_v36  ;;  %v6744_v36 = vld [vmem:[#allocation134_spill] sm:$0xff] }
 0x32e   : > { %v2831_v44 = vsel %vm2049_vm14, 1.0, %v6601_v21  ;;  %vm1876_vm14 = vcmp.eq.s32.totalorder %v4498_v11, %v1856_v26  ;;  %vm1651_vm5 = vmor %vm1571_vm4, %vm1635_vm2 }
 0x32f   : > { %3176 = vmatprep.mubr.f32.mxu1 %v2831_v44  ;;  %vm1892_vm9 = vmor %vm5854_vm12, %vm1876_vm14  ;;  %v6750_v44 = vld [vmem:[#allocation140_spill] sm:$0xff] }
 0x330   : > { %v1773_v17 = vpop.permute.xlu1 %1772  ;;  %vm1731_vm1 = vmor %vm1651_vm5, %vm1715_vm0  ;;  %vm1557_vm0 = vcmp.eq.s32.totalorder %v4498_v11, %v6731_v10 }
 0x331   : > { %vm1795_vm15 = vcmp.eq.s32.totalorder %v4498_v11, %v1773_v17  ;;  %v6751_v17 = vld [vmem:[#allocation36_spill] sm:$0xff] }
 0x335   : > { %v2010_v6 = vpop.permute.xlu1 %2009 }
 0x336   : > { %vm2034_vm11 = vcmp.eq.s32.totalorder %v4498_v11, %v2010_v6 }
 0x337   : > { %vm2050_vm13 = vmor %vm1970_vm7, %vm2034_vm11 }
 0x338   : > { %v2832_v37 = vsel %vm2050_vm13, 1.0, %v6601_v21  ;;  %vm1811_vm7 = vmor %vm1731_vm1, %vm1795_vm15  ;;  %vm1493_vm15 = vcmp.eq.s32.totalorder %v4498_v11, %v6732_v1 }
 0x339   : > { %3177 = vmatmul.mubr.f32.gmra.mrb[10].mxu1 %v2832_v37  ;;  %vm1573_vm1 = vmor %vm1493_vm15, %vm1557_vm0 }
 0x33a   : > { %v1853_v38 = vpop.permute.xlu1 %1852 }
 0x33b   : > { %vm1875_vm8 = vcmp.eq.s32.totalorder %v4498_v11, %v1853_v38 }
 0x33c   : > { %vm1891_vm6 = vmor %vm1811_vm7, %vm1875_vm8 }
 0x33f   : > { %v1619_v41 = vpop.permute.xlu1 %1618 }
 0x340   : > { %vm1637_vm5 = vcmp.eq.s32.totalorder %v4498_v11, %v1619_v41 }
 0x341   : > { %vm1653_vm8 = vmor %vm1573_vm1, %vm1637_vm5 }
 0x344   : > { %v1933_v23 = vpop.permute.xlu1 %1932 }
 0x345   : > { %vm1955_vm11 = vcmp.eq.s32.totalorder %v4498_v11, %v1933_v23 }
 0x346   : > { %vm1971_vm2 = vmor %vm1891_vm6, %vm1955_vm11  ;;  %vm1717_vm11 = vcmp.eq.s32.totalorder %v4498_v11, %v5021_v39  ;;  %v6735_v39 = vld [vmem:[#allocation56_spill] sm:$0xff] }
 0x347   : > { %vm1733_vm6 = vmor %vm1653_vm8, %vm1717_vm11 }
 0x349   : > { %v1622_v20 = vpop.permute.xlu1 %1621 }
 0x34a   : > { %vm1638_vm7 = vcmp.eq.s32.totalorder %v4498_v11, %v1622_v20 }
 0x34e   : > { %v1936_v60 = vpop.permute.xlu1 %1935 }
 0x34f   : > { %vm1956_vm10 = vcmp.eq.s32.totalorder %v4498_v11, %v1936_v60 }
 0x350   : > { %vm1972_vm13 = vmor %vm1892_vm9, %vm1956_vm10  ;;  %vm1494_vm9 = vcmp.eq.s32.totalorder %v4498_v11, %v6733_v28  ;;  %vm1558_vm10 = vcmp.eq.s32.totalorder %v4498_v11, %v6734_v24 }
 0x351   : > { %vm2052_vm4 = vmor %vm1972_vm13, %vm2036_vm3 }
 0x352   : > { %v2834_v9 = vsel %vm2052_vm4, 1.0, %v6601_v21  ;;  %vm1574_vm13 = vmor %vm1494_vm9, %vm1558_vm10  ;;  %vm1718_vm10 = vcmp.eq.s32.totalorder %v4498_v11, %v6735_v39 }
 0x353   : > { %v2013_v43 = vpop.permute.xlu1 %2012  ;;  %vm1654_vm4 = vmor %vm1574_vm13, %vm1638_vm7  ;;  %vm1878_vm13 = vcmp.eq.s32.totalorder %v4498_v11, %v5878_v35 }
 0x354   : > { %vm2035_vm12 = vcmp.eq.s32.totalorder %v4498_v11, %v2013_v43  ;;  %vm1734_vm8 = vmor %vm1654_vm4, %vm1718_vm10  ;;  %vm1389_vm10 = vcmp.eq.s32.totalorder %v4498_v11, %v6742_v58 }
 0x355   : > { %vm2051_vm14 = vmor %vm1971_vm2, %vm2035_vm12 }
 0x356   : > { %v2833_v31 = vsel %vm2051_vm14, 1.0, %v6601_v21  ;;  %vm2037_vm14 = vcmp.eq.s32.totalorder %v4498_v11, %v2019_v46 }
 0x357   : > { %3179 = vmatprep.mubr.f32.mxu1 %v2833_v31 }
 0x358   : > { %v1779_v3 = vpop.permute.xlu1 %1778  ;;  %3180 = vmatmul.mubr.f32.gmra.mrb[12].mxu1 %v2834_v9 }
 0x359   : > { %vm1797_vm3 = vcmp.eq.s32.totalorder %v4498_v11, %v1779_v3 }
 0x35a   : > { %vm1813_vm12 = vmor %vm1733_vm6, %vm1797_vm3  ;;  %vm1285_vm3 = vcmask 261120  }
 0x35c   : > { %v1782_v32 = vpop.permute.xlu1 %1781 }
 0x35d   : > { %vm1798_vm1 = vcmp.eq.s32.totalorder %v4498_v11, %v1782_v32 }
 0x35e   : > { %vm1814_vm7 = vmor %vm1734_vm8, %vm1798_vm1  ;;  %vm1387_vm1 = vcmp.eq.s32.totalorder %v4498_v11, %v6740_v8  ;;  %vm1390_vm8 = vcmp.eq.s32.totalorder %v4498_v11, %v6743_v13 }
 0x35f   : > { %vm1894_vm6 = vmor %vm1814_vm7, %vm1878_vm13  ;;  %vm1391_vm7 = vcmp.eq.s32.totalorder %v4498_v11, %v6744_v36  ;;  %vm1393_vm13 = vcmp.eq.s32.totalorder %v4498_v11, %v6746_v14 }
 0x361   : > { %v1859_v22 = vpop.permute.xlu1 %1858 }
 0x362   : > { %vm1877_vm2 = vcmp.eq.s32.totalorder %v4498_v11, %v1859_v22 }
 0x363   : > { %vm1893_vm0 = vmor %vm1813_vm12, %vm1877_vm2 }
 0x366   : > { %v1939_v4 = vpop.permute.xlu1 %1938 }
 0x367   : > { %vm1957_vm5 = vcmp.eq.s32.totalorder %v4498_v11, %v1939_v4 }
 0x368   : > { %vm1973_vm15 = vmor %vm1893_vm0, %vm1957_vm5  ;;  %vm1384_vm0 = vcmp.eq.s32.totalorder %v4498_v11, %v6737_v47  ;;  %vm1385_vm5 = vcmp.eq.s32.totalorder %v4498_v11, %v6738_v19 }
 0x369   : > { %vm2053_vm9 = vmor %vm1973_vm15, %vm2037_vm14  ;;  %vm1383_vm14 = vcmp.eq.s32.totalorder %v4498_v11, %v6736_v2  ;;  %vm1386_vm15 = vcmp.eq.s32.totalorder %v4498_v11, %v6739_v34 }
 0x36a   : > { %v1942_v7 = vpop.permute.xlu1 %1941  ;;  %v2835_v27 = vsel %vm2053_vm9, 1.0, %v6601_v21  ;;  %vm1388_vm9 = vcmp.eq.s32.totalorder %v4498_v11, %v6741_v56 }
 0x36b   : > { %3182 = vmatprep.mubr.f32.mxu1 %v2835_v27  ;;  %vm1958_vm11 = vcmp.eq.s32.totalorder %v4498_v11, %v1942_v7 }
 0x36c   : > { %vm1974_vm2 = vmor %vm1894_vm6, %vm1958_vm11  ;;  %vm1392_vm11 = vcmp.eq.s32.totalorder %v4498_v11, %v6745_v54  ;;  %vm1394_vm6 = vcmp.eq.s32.totalorder %v4498_v11, %v6747_v61 }
 0x36f   : > { %v2022_v57 = vpop.permute.xlu1 %2021 }
 0x370   : > { %vm2038_vm12 = vcmp.eq.s32.totalorder %v4498_v11, %v2022_v57 }
 0x371   : > { %vm2054_vm4 = vmor %vm1974_vm2, %vm2038_vm12  ;;  %vm1395_vm2 = vcmp.eq.s32.totalorder %v4498_v11, %v6748_v12  ;;  %vm1396_vm12 = vcmp.eq.s32.totalorder %v4498_v11, %v6749_v5 }
 0x372   : > { %v2836_v59 = vsel %vm2054_vm4, 1.0, %v6601_v21  ;;  %vm1397_vm4 = vcmp.eq.s32.totalorder %v4498_v11, %v6750_v44 }
 0x373   : > { %v3107_v45 = vpop.f32.mrb[0].mxu0  ;;  %3183 = vmatmul.mubr.f32.gmra.mrb[14].mxu1 %v2836_v59 }
 0x374   : > { %1287 = vst.msk [vmem:[%s5919_s12 + $0x8] sm:$0xff] %vm1285_vm3, %v3107_v45  ;;  %v1206_v50 = vpop.f32.mrb[1].mxu0  ;;  %3217 = vmatprep.mubr.msk.f32.mxu1 %vm1383_vm14, %v3667_v53  ;;  %vm1398_vm14 = vcmp.eq.s32.totalorder %v4498_v11, %v6751_v17 }
 0x375   : > { %1286 = vst.msk [vmem:[%s5919_s12] sm:$0xff] %vm1285_vm3, %v1206_v50 }
 0x377   : > { %v3110_v63 = vpop.f32.mrb[2].mxu0  ;;  %3218 = vmatmul.mubr.msk.f32.vlgmr.msra.gmra.mrb[0].mxu1 %vm1384_vm0, %v3667_v53 }
 0x378   : > { %1289 = vst.msk [vmem:[%s5919_s12 + $0x18] sm:$0xff] %vm1285_vm3, %v3110_v63  ;;  %v1216_v16 = vpop.f32.mrb[3].mxu0  ;;  %3220 = vmatprep.mubr.msk.f32.mxu1 %vm1385_vm5, %v3667_v53 }
 0x379   : > { %1288 = vst.msk [vmem:[%s5919_s12 + $0x10] sm:$0xff] %vm1285_vm3, %v1216_v16 }
 0x37b   : > { %v3113_v21 = vpop.f32.mrb[4].mxu0  ;;  %3221 = vmatmul.mubr.msk.f32.gmra.mrb[2].mxu1 %vm1386_vm15, %v3667_v53 }
 0x37c   : > { %1291 = vst.msk [vmem:[%s5919_s12 + $0x28] sm:$0xff] %vm1285_vm3, %v3113_v21  ;;  %v1226_v25 = vpop.f32.mrb[5].mxu0  ;;  %3223 = vmatprep.mubr.msk.f32.mxu1 %vm1387_vm1, %v3667_v53 }
 0x37d   : > { %1290 = vst.msk [vmem:[%s5919_s12 + $0x20] sm:$0xff] %vm1285_vm3, %v1226_v25 }
 0x37f   : > { %v3116_v15 = vpop.f32.mrb[6].mxu0  ;;  %3224 = vmatmul.mubr.msk.f32.gmra.mrb[4].mxu1 %vm1388_vm9, %v3667_v53 }
 0x380   : > { %1293 = vst.msk [vmem:[%s5919_s12 + $0x38] sm:$0xff] %vm1285_vm3, %v3116_v15  ;;  %v1236_v18 = vpop.f32.mrb[7].mxu0  ;;  %3226 = vmatprep.mubr.msk.f32.mxu1 %vm1389_vm10, %v3667_v53 }
 0x381   : > { %1292 = vst.msk [vmem:[%s5919_s12 + $0x30] sm:$0xff] %vm1285_vm3, %v1236_v18 }
 0x383   : > { %v3119_v55 = vpop.f32.mrb[8].mxu0  ;;  %3227 = vmatmul.mubr.msk.f32.gmra.mrb[6].mxu1 %vm1390_vm8, %v3667_v53 }
 0x384   : > { %1295 = vst.msk [vmem:[%s5919_s12 + $0x48] sm:$0xff] %vm1285_vm3, %v3119_v55  ;;  %v1246_v33 = vpop.f32.mrb[9].mxu0  ;;  %3229 = vmatprep.mubr.msk.f32.mxu1 %vm1391_vm7, %v3667_v53 }
 0x385   : > { %1294 = vst.msk [vmem:[%s5919_s12 + $0x40] sm:$0xff] %vm1285_vm3, %v1246_v33 }
 0x387   : > { %v3122_v51 = vpop.f32.mrb[10].mxu0  ;;  %3230 = vmatmul.mubr.msk.f32.gmra.mrb[8].mxu1 %vm1392_vm11, %v3667_v53 }
 0x388   : > { %1297 = vst.msk [vmem:[%s5919_s12 + $0x58] sm:$0xff] %vm1285_vm3, %v3122_v51  ;;  %v1256_v30 = vpop.f32.mrb[11].mxu0  ;;  %3232 = vmatprep.mubr.msk.f32.mxu1 %vm1393_vm13, %v3667_v53 }
 0x389   : > { %1296 = vst.msk [vmem:[%s5919_s12 + $0x50] sm:$0xff] %vm1285_vm3, %v1256_v30 }
 0x38b   : > { %v3125_v42 = vpop.f32.mrb[12].mxu0  ;;  %3233 = vmatmul.mubr.msk.f32.gmra.mrb[10].mxu1 %vm1394_vm6, %v3667_v53 }
 0x38c   : > { %1299 = vst.msk [vmem:[%s5919_s12 + $0x68] sm:$0xff] %vm1285_vm3, %v3125_v42  ;;  %v1266_v52 = vpop.f32.mrb[13].mxu0  ;;  %3235 = vmatprep.mubr.msk.f32.mxu1 %vm1395_vm2, %v3667_v53 }
 0x38d   : > { %1298 = vst.msk [vmem:[%s5919_s12 + $0x60] sm:$0xff] %vm1285_vm3, %v1266_v52 }
 0x38f   : > { %v3128_v62 = vpop.f32.mrb[14].mxu0  ;;  %3236 = vmatmul.mubr.msk.f32.gmra.mrb[12].mxu1 %vm1396_vm12, %v3667_v53 }
 0x390   : > { %1301 = vst.msk [vmem:[%s5919_s12 + $0x78] sm:$0xff] %vm1285_vm3, %v3128_v62  ;;  %v1276_v40 = vpop.f32.mrb[15].mxu0  ;;  %3238 = vmatprep.mubr.msk.f32.mxu1 %vm1397_vm4, %v3667_v53 }
 0x391   : > { %1300 = vst.msk [vmem:[%s5919_s12 + $0x70] sm:$0xff] %vm1285_vm3, %v1276_v40 }
 0x393   : > { %3239 = vmatmul.mubr.msk.f32.gmra.mrb[14].mxu1 %vm1398_vm14, %v3667_v53 }
 0x44a   : > { %v3219_v49 = vpop.f32.mrb[0].mxu1 }
 0x44b   : > { %2854 = vst.msk [vmem:[%s5919_s12 + $0x88] sm:$0xff] %vm1285_vm3, %v3219_v49  ;;  %v2298_v6 = vpop.f32.mrb[1].mxu1 }
 0x44c   : > { %2853 = vst.msk [vmem:[%s5919_s12 + $0x80] sm:$0xff] %vm1285_vm3, %v2298_v6 }
 0x44e   : > { %v3222_v37 = vpop.f32.mrb[2].mxu1 }
 0x44f   : > { %2856 = vst.msk [vmem:[%s5919_s12 + $0x98] sm:$0xff] %vm1285_vm3, %v3222_v37  ;;  %v2308_v38 = vpop.f32.mrb[3].mxu1 }
 0x450   : > { %2855 = vst.msk [vmem:[%s5919_s12 + $0x90] sm:$0xff] %vm1285_vm3, %v2308_v38 }
 0x452   : > { %v3225_v11 = vpop.f32.mrb[4].mxu1 }
 0x453   : > { %2858 = vst.msk [vmem:[%s5919_s12 + $0xa8] sm:$0xff] %vm1285_vm3, %v3225_v11  ;;  %v2318_v53 = vpop.f32.mrb[5].mxu1 }
 0x454   : > { %2857 = vst.msk [vmem:[%s5919_s12 + $0xa0] sm:$0xff] %vm1285_vm3, %v2318_v53 }
 0x456   : > { %v3228_v41 = vpop.f32.mrb[6].mxu1 }
 0x457   : > { %2860 = vst.msk [vmem:[%s5919_s12 + $0xb8] sm:$0xff] %vm1285_vm3, %v3228_v41  ;;  %v2328_v23 = vpop.f32.mrb[7].mxu1 }
 0x458   : > { %2859 = vst.msk [vmem:[%s5919_s12 + $0xb0] sm:$0xff] %vm1285_vm3, %v2328_v23 }
 0x45a   : > { %v3231_v26 = vpop.f32.mrb[8].mxu1 }
 0x45b   : > { %2862 = vst.msk [vmem:[%s5919_s12 + $0xc8] sm:$0xff] %vm1285_vm3, %v3231_v26  ;;  %v2338_v0 = vpop.f32.mrb[9].mxu1 }
 0x45c   : > { %2861 = vst.msk [vmem:[%s5919_s12 + $0xc0] sm:$0xff] %vm1285_vm3, %v2338_v0 }
 0x45e   : > { %v3234_v20 = vpop.f32.mrb[10].mxu1 }
 0x45f   : > { %2864 = vst.msk [vmem:[%s5919_s12 + $0xd8] sm:$0xff] %vm1285_vm3, %v3234_v20  ;;  %v2348_v35 = vpop.f32.mrb[11].mxu1 }
 0x460   : > { %2863 = vst.msk [vmem:[%s5919_s12 + $0xd0] sm:$0xff] %vm1285_vm3, %v2348_v35 }
 0x462   : > { %v3237_v29 = vpop.f32.mrb[12].mxu1  ;;  %2400 = sbr.rel (!%p3713_p4) target bundleno = 1185 (0x4a1), region = 36 }
 0x463   : > { %2866 = vst.msk [vmem:[%s5919_s12 + $0xe8] sm:$0xff] %vm1285_vm3, %v3237_v29  ;;  %v2358_v60 = vpop.f32.mrb[13].mxu1 }
 0x464   : > { %2865 = vst.msk [vmem:[%s5919_s12 + $0xe0] sm:$0xff] %vm1285_vm3, %v2358_v60 }
 0x466   : > { %v3240_v48 = vpop.f32.mrb[14].mxu1 }
 0x467   : > { %2868 = vst.msk [vmem:[%s5919_s12 + $0xf8] sm:$0xff] %vm1285_vm3, %v3240_v48  ;;  %v2368_v43 = vpop.f32.mrb[15].mxu1 }
 0x468   : > { %2867 = vst.msk [vmem:[%s5919_s12 + $0xf0] sm:$0xff] %vm1285_vm3, %v2368_v43 }
 0x469   : > { %s6761_s8 = smov (!%p2403_p8, %s2402_s8), 32 }
 0x46a   : > { %s2871_s17 = sshll.u32 %s6761_s8, 7 }
 0x46b   : > { %p2874_p9 = scmp.eq.s32.totalorder %s2871_s17, 0 }
 0x46c   : > { %s6047_s18 = sshrl.u32 (!%p2874_p9), %s6761_s8, 5 }
 0x46d   : > { %2411 = sbr.rel (%p2874_p9) target bundleno = 1185 (0x4a1), region = 40  ;;  %p2875_p10 = scmp.le.s32.totalorder (!%p2874_p9), %s6047_s18, 0 }
 0x474   : > { %2689 = sbr.rel (%p2875_p10) target bundleno = 1164 (0x48c), region = 118  ;;  %s6752_s15 = smov (!%p2875_p10), %s6041_s14 }
 0x475   : > { %s6753_s20 = smov (!%p2875_p10), %s5919_s12  ;;  %s6056_s21 = smov (!%p2875_p10), 0  }
 0x476   : > { %s6058_s22 = smov (!%p2875_p10), 0  }
 0x47b LB: >> { %v2535_v31 = vld [vmem:[%s3631_s20] sm:$0xff]  ;;  %v2537_v9 = vld [vmem:[%s3631_s20 + $0x8] sm:$0xff]  ;;  %v2539_v3 = vld [vmem:[%s3631_s20 + $0x10] sm:$0xff]  ;;  %s2599_s23 = sadd.s32 1, %s3635_s21  ;;  %s2529_s22 = sadd.s32 1, %s3639_s22   ;;  %s3639_s22 = sphi %s6058_s22, %s2529_s22   ;;  %s3635_s21 = sphi %s6056_s21, %s6756_s21   ;;  %s3631_s20 = sphi %s6753_s20, %s6755_s20   ;;  %s3627_s15 = sphi %s6752_s15, %s6754_s15  }
 0x47c   : >> { %2536 = vst [vmem:[%s3627_s15] sm:$0xff] %v2535_v31  ;;  %2538 = vst [vmem:[%s3627_s15 + $0x8] sm:$0xff] %v2537_v9  ;;  %v2541_v32 = vld [vmem:[%s3631_s20 + $0x18] sm:$0xff]  ;;  %v2543_v10 = vld [vmem:[%s3631_s20 + $0x20] sm:$0xff]  ;;  %p2600_p11 = scmp.ge.s32.totalorder %s2599_s23, %s6047_s18  ;;  %p2528_p12 = scmp.ge.s32.totalorder %s2529_s22, %s6047_s18 }
 0x47d   : >> { %2540 = vst [vmem:[%s3627_s15 + $0x10] sm:$0xff] %v2539_v3  ;;  %v2545_v1 = vld [vmem:[%s3631_s20 + $0x28] sm:$0xff]  ;;  %2542 = vst [vmem:[%s3627_s15 + $0x18] sm:$0xff] %v2541_v32  ;;  %v2547_v28 = vld [vmem:[%s3631_s20 + $0x30] sm:$0xff] }
 0x47e   : >> { %2544 = vst [vmem:[%s3627_s15 + $0x20] sm:$0xff] %v2543_v10  ;;  %2546 = vst [vmem:[%s3627_s15 + $0x28] sm:$0xff] %v2545_v1  ;;  %v2549_v22 = vld [vmem:[%s3631_s20 + $0x38] sm:$0xff]  ;;  %v2551_v24 = vld [vmem:[%s3631_s20 + $0x40] sm:$0xff]  ;;  %s6763_s23 = smov (%p2600_p11, %s2599_s23), 0 }
 0x47f   : >> { %2548 = vst [vmem:[%s3627_s15 + $0x30] sm:$0xff] %v2547_v28  ;;  %2550 = vst [vmem:[%s3627_s15 + $0x38] sm:$0xff] %v2549_v22  ;;  %v2553_v46 = vld [vmem:[%s3631_s20 + $0x48] sm:$0xff]  ;;  %v2555_v4 = vld [vmem:[%s3631_s20 + $0x50] sm:$0xff]  ;;  %s2876_s24 = sshll.u32 %s6763_s23, 8  ;;  %s6756_s21 = smov %s6763_s23 }
 0x480   : >> { %2552 = vst [vmem:[%s3627_s15 + $0x40] sm:$0xff] %v2551_v24  ;;  %v2557_v39 = vld [vmem:[%s3631_s20 + $0x58] sm:$0xff]  ;;  %2554 = vst [vmem:[%s3627_s15 + $0x48] sm:$0xff] %v2553_v46  ;;  %v2559_v7 = vld [vmem:[%s3631_s20 + $0x60] sm:$0xff]  ;;  %s6114_s25 = scalar_lea.vmem %s5919_s12, %s2876_s24 [#allocation2]   ;;  %s2605_s26 = scalar_lea.vmem %s6041_s14, %s2876_s24  }
 0x481   : >> { %2556 = vst [vmem:[%s3627_s15 + $0x50] sm:$0xff] %v2555_v4  ;;  %2558 = vst [vmem:[%s3627_s15 + $0x58] sm:$0xff] %v2557_v39  ;;  %v2561_v27 = vld [vmem:[%s3631_s20 + $0x68] sm:$0xff]  ;;  %v2563_v57 = vld [vmem:[%s3631_s20 + $0x70] sm:$0xff] }
 0x482   : >> { %2560 = vst [vmem:[%s3627_s15 + $0x60] sm:$0xff] %v2559_v7  ;;  %2562 = vst [vmem:[%s3627_s15 + $0x68] sm:$0xff] %v2561_v27  ;;  %v2565_v45 = vld [vmem:[%s3631_s20 + $0x78] sm:$0xff]  ;;  %v2567_v50 = vld [vmem:[%s3631_s20 + $0x80] sm:$0xff] }
 0x483   : >> { %2564 = vst [vmem:[%s3627_s15 + $0x70] sm:$0xff] %v2563_v57  ;;  %v2569_v59 = vld [vmem:[%s3631_s20 + $0x88] sm:$0xff]  ;;  %2566 = vst [vmem:[%s3627_s15 + $0x78] sm:$0xff] %v2565_v45  ;;  %v2571_v2 = vld [vmem:[%s3631_s20 + $0x90] sm:$0xff] }
 0x484   : >> { %2568 = vst [vmem:[%s3627_s15 + $0x80] sm:$0xff] %v2567_v50  ;;  %2570 = vst [vmem:[%s3627_s15 + $0x88] sm:$0xff] %v2569_v59  ;;  %v2573_v63 = vld [vmem:[%s3631_s20 + $0x98] sm:$0xff]  ;;  %v2575_v16 = vld [vmem:[%s3631_s20 + $0xa0] sm:$0xff] }
 0x485   : >> { %2572 = vst [vmem:[%s3627_s15 + $0x90] sm:$0xff] %v2571_v2  ;;  %2574 = vst [vmem:[%s3627_s15 + $0x98] sm:$0xff] %v2573_v63  ;;  %v2577_v47 = vld [vmem:[%s3631_s20 + $0xa8] sm:$0xff]  ;;  %v2579_v19 = vld [vmem:[%s3631_s20 + $0xb0] sm:$0xff]  ;;  %2531 = sbr.rel (!%p2528_p12) target bundleno = 1147 (0x47b), region = 124 }
 0x486   : >> { %2576 = vst [vmem:[%s3627_s15 + $0xa0] sm:$0xff] %v2575_v16  ;;  %v2581_v21 = vld [vmem:[%s3631_s20 + $0xb8] sm:$0xff]  ;;  %2578 = vst [vmem:[%s3627_s15 + $0xa8] sm:$0xff] %v2577_v47  ;;  %v2583_v25 = vld [vmem:[%s3631_s20 + $0xc0] sm:$0xff] }
 0x487   : >> { %2580 = vst [vmem:[%s3627_s15 + $0xb0] sm:$0xff] %v2579_v19  ;;  %2582 = vst [vmem:[%s3627_s15 + $0xb8] sm:$0xff] %v2581_v21  ;;  %v2585_v34 = vld [vmem:[%s3631_s20 + $0xc8] sm:$0xff]  ;;  %v2587_v8 = vld [vmem:[%s3631_s20 + $0xd0] sm:$0xff] }
 0x488   : >> { %2584 = vst [vmem:[%s3627_s15 + $0xc0] sm:$0xff] %v2583_v25  ;;  %2586 = vst [vmem:[%s3627_s15 + $0xc8] sm:$0xff] %v2585_v34  ;;  %v2589_v15 = vld [vmem:[%s3631_s20 + $0xd8] sm:$0xff]  ;;  %v2591_v18 = vld [vmem:[%s3631_s20 + $0xe0] sm:$0xff] }
 0x489   : >> { %2588 = vst [vmem:[%s3627_s15 + $0xd0] sm:$0xff] %v2587_v8  ;;  %v2593_v56 = vld [vmem:[%s3631_s20 + $0xe8] sm:$0xff]  ;;  %2590 = vst [vmem:[%s3627_s15 + $0xd8] sm:$0xff] %v2589_v15  ;;  %v2595_v58 = vld [vmem:[%s3631_s20 + $0xf0] sm:$0xff] }
 0x48a   : >> { %2592 = vst [vmem:[%s3627_s15 + $0xe0] sm:$0xff] %v2591_v18  ;;  %2594 = vst [vmem:[%s3627_s15 + $0xe8] sm:$0xff] %v2593_v56  ;;  %v2597_v55 = vld [vmem:[%s3631_s20 + $0xf8] sm:$0xff]  ;;  %s6755_s20 = smov %s6114_s25 }
 0x48b   : >> { %2596 = vst [vmem:[%s3627_s15 + $0xf0] sm:$0xff] %v2595_v58  ;;  %2598 = vst [vmem:[%s3627_s15 + $0xf8] sm:$0xff] %v2597_v55  ;;  %s6754_s15 = smov %s2605_s26 }
 0x48c PF: > { %s6155_s27 = sand.u32 31, %s6761_s8   ;;  %s2887_s28 = sshll.u32 %s6047_s18, 8 }
 0x48d   : > { %s2610_s29 = scalar_lea.vmem %s5919_s12, %s2887_s28 [#allocation2]   ;;  %s2612_s30 = scalar_lea.vmem %s6041_s14, %s2887_s28  }
 0x48e   : > { %p2881_p13 = scmp.le.s32.totalorder %s6155_s27, 0 }
 0x48f   : > { %s3641_s4 = smov (!%p2881_p13), %s2612_s30   ;;  %s3645_s5 = smov (!%p2881_p13), %s2610_s29  }
 0x490   : > { %2703 = sbr.rel (%p2881_p13) target bundleno = 1185 (0x4a1), region = 129  ;;  %s3649_s6 = smov (!%p2881_p13), 0  }
 0x491   : > { %s3653_s7 = smov (!%p2881_p13), 0  }
 0x497 LB: >> { %v2622_v33 = vld [vmem:[%s3647_s5] sm:$0xff]  ;;  %s2624_s8 = sadd.s32 1, %s3651_s6  ;;  %s2616_s7 = sadd.s32 1, %s3655_s7   ;;  %s3655_s7 = sphi %s3653_s7, %s2616_s7   ;;  %s3651_s6 = sphi %s3649_s6, %s3650_s6   ;;  %s3647_s5 = sphi %s3645_s5, %s2629_s5   ;;  %s3643_s4 = sphi %s3641_s4, %s2630_s4  }
 0x498   : >> { %2623 = vst [vmem:[%s3643_s4] sm:$0xff] %v2622_v33  ;;  %p2625_p0 = scmp.ge.s32.totalorder %s2624_s8, %s6155_s27  ;;  %p2615_p1 = scmp.ge.s32.totalorder %s2616_s7, %s6155_s27 }
 0x49a   : >> { %s6765_s8 = smov (%p2625_p0, %s2624_s8), 0  ;;  %2618 = sbr.rel (!%p2615_p1) target bundleno = 1175 (0x497), region = 135 }
 0x49b   : >> { %s2882_s12 = sshll.u32 %s6765_s8, 3  ;;  %s3650_s6 = smov %s6765_s8  }
 0x49c   : >> { %s2629_s5 = scalar_lea.vmem %s2610_s29, %s2882_s12 [#allocation2]   ;;  %s2630_s4 = scalar_lea.vmem %s2612_s30, %s2882_s12  }
 0x4a1 PF: > { %p10_p2 = scmp.ge.s32.totalorder %s3703_s16, 4   ;;  %s6757_s12 = smov %s3619_s13 }
 0x4a2   : > { %s6758_s13 = smov %s3711_s19  ;;  %s6759_s14 = smov %s3703_s16 }
 0x4a3   :  { %12 = sbr.rel (!%p10_p2) target bundleno = 2 (0x2), region = 146 }

</bundles_post_ra>
